<compile_context>
chip_gen: v7x
topology: tpu7x:2x2x1
jax: 0.10.0
libtpu: 0.0.40
codegen_flags: <defaults>
</compile_context>

<pallas_src>
from types import SimpleNamespace

import jax
import jax.numpy as jnp
from jax.experimental import pallas as pl
from jax.experimental.pallas import tpu as pltpu


# ----------------------------------------------------------------------------
# Kernel 1: "BERT" encoder stand-in (single big matmul over B*S rows)
# ----------------------------------------------------------------------------

def _encoder_kernel(x_ref, m_ref, w_ref, b_ref, o_ref):
    # TODO(synk): pretrained BertModel('bert-base-uncased') has no in-script equivalent;
    # deterministic stand-in encoder body (dense + tanh), gated by the attention mask.
    h = jnp.dot(x_ref[...], w_ref[...], preferred_element_type=jnp.float32) + b_ref[...]
    o_ref[...] = (jnp.tanh(h) * m_ref[...]).astype(o_ref.dtype)


def encoder_pallas(emb2d, mask2d, w, b):
    BS, H = emb2d.shape
    return pl.pallas_call(
        _encoder_kernel,
        out_shape=jax.ShapeDtypeStruct((BS, H), jnp.bfloat16),
        grid=(1,),
        in_specs=[
            pl.BlockSpec((BS, H), lambda i: (0, 0)),
            pl.BlockSpec((BS, 1), lambda i: (0, 0)),
            pl.BlockSpec((H, H), lambda i: (0, 0)),
            pl.BlockSpec((1, H), lambda i: (0, 0)),
        ],
        out_specs=pl.BlockSpec((BS, H), lambda i: (0, 0)),
        compiler_params=pltpu.CompilerParams(dimension_semantics=("arbitrary",)),
    )(emb2d, mask2d, w, b)


# ----------------------------------------------------------------------------
# Kernel 2: fused downstream (gather + linear + ner concat + mapping bmm +
#           merged dual attention + distance concat + bilinear)
# ----------------------------------------------------------------------------

def _fused_kernel(sel_ref, pad_ref, bert_ref, ner_ref, maps_ref, amask_ref,
                  dish_ref, dist_ref, linw_ref, linb_ref,
                  wq_ref, wc_ref, bc_ref, wo_ref, bo_ref,
                  bw_ref, grp_ref, bb_ref, out_ref):
    nc = dish_ref.shape[1]          # n_cands
    nrel = grp_ref.shape[1]         # relation_num

    # word-start gather as a one-hot selection matmul (MXU), then the -1 / 0 sequence padding
    gathered = jnp.dot(sel_ref[0], bert_ref[0],
                       preferred_element_type=jnp.float32) + pad_ref[0]         # [S, 768]

    # linear projection (bf16 operands, f32 accumulate) + entity-type embedding concat
    lin = jnp.dot(gathered.astype(jnp.bfloat16), linw_ref[...],
                  preferred_element_type=jnp.float32) + linb_ref[...]           # [S, hidden]
    context = jnp.concatenate([lin, ner_ref[0]], axis=-1)                       # [S, C]

    # mapping bmm with both mappings stacked: [h_map ; t_map] @ context -> [start_re ; end_re]
    maps = maps_ref[0]                                                          # [2*NC, S]
    re_out = jnp.dot(maps, context, preferred_element_type=jnp.float32)         # [2*NC, C]

    # merged additive attention: rows 0..NC-1 -> (q=start_re, mask=t_map) => tail
    #                            rows NC..    -> (q=end_re,   mask=h_map) => head
    res_q = jnp.dot(re_out.astype(jnp.bfloat16), wq_ref[...],
                    preferred_element_type=jnp.float32)                         # [2*NC, C]
    res_c = jnp.dot(context.astype(jnp.bfloat16), wc_ref[...],
                    preferred_element_type=jnp.float32) + bc_ref[...]           # [S, C]
    tmp = jnp.tanh(res_c[None, :, :] + res_q[:, None, :])                       # [2*NC, S, C]
    logit = jnp.sum(tmp * wo_ref[...][None, :, :], axis=-1) + bo_ref[0, 0]      # [2*NC, S]

    # max-stabilized masked softmax; algebraically identical to mask*exp(l)/(sum(mask*exp(l))+1e-5)
    m = jnp.maximum(jnp.max(logit, axis=1, keepdims=True), 0.0)
    w_exp = amask_ref[0] * jnp.exp(logit - m)
    weights = w_exp / (jnp.sum(w_exp, axis=1, keepdims=True) + 1e-5 * jnp.exp(-m))
    attn = jnp.dot(weights, context, preferred_element_type=jnp.float32)        # [2*NC, C] = [tail ; head]

    # distance concat + bilinear head as two lane-dense matmuls (no per-relation loop)
    # TODO(synk): PredictionBiLinear source not provided; torch.nn.Bilinear semantics assumed.
    s_rep = jnp.concatenate([attn[nc:], dish_ref[0]], axis=-1)                  # head ++ dis(h->t)  [NC, V]
    t_rep = jnp.concatenate([attn[:nc], dist_ref[0]], axis=-1)                  # tail ++ dis(t->h)  [NC, V]
    sw = jnp.dot(s_rep, bw_ref[...], preferred_element_type=jnp.float32)        # [NC, R*V]
    prod = sw * jnp.tile(t_rep, (1, nrel))                                      # [NC, R*V]
    out_ref[0] = jnp.dot(prod, grp_ref[...],
                         preferred_element_type=jnp.float32) + bb_ref[...]      # [NC, R]


def fused_downstream_pallas(sel, pad, bert_out, ner_vec, maps, attn_mask,
                            dis_h_vec, dis_t_vec, lin_w, lin_b,
                            wq, wc, bc, wo, bo, bili_w_rs, grp, bili_b):
    B, S, Hbert = bert_out.shape
    NC2 = maps.shape[1]
    NC = NC2 // 2
    E = ner_vec.shape[-1]
    D = dis_h_vec.shape[-1]
    hidden = lin_w.shape[1]
    C = wq.shape[0]
    V = bili_w_rs.shape[0]
    R = bili_b.shape[-1]

    def batch_spec(*tail):
        return pl.BlockSpec((1,) + tail, lambda i, _t=tail: (i,) + (0,) * len(_t))

    def const_spec(*shape):
        return pl.BlockSpec(shape, lambda i, _s=shape: (0,) * len(_s))

    return pl.pallas_call(
        _fused_kernel,
        out_shape=jax.ShapeDtypeStruct((B, NC, R), jnp.float32),
        grid=(B,),
        in_specs=[
            batch_spec(S, S),                                   # sel (one-hot gather matrix)
            batch_spec(S, 1),                                   # pad (-1 / 0 row padding)
            batch_spec(S, Hbert),                               # encoder output (bf16)
            batch_spec(S, E),                                   # ner embedding vectors
            batch_spec(NC2, S),                                 # stacked mappings [h ; t]
            batch_spec(NC2, S),                                 # stacked attention masks [t ; h] > 0
            batch_spec(NC, D),                                  # dis_embed(dis_h_2_t)
            batch_spec(NC, D),                                  # dis_embed(dis_t_2_h)
            const_spec(Hbert, hidden),                          # lin_w (bf16)
            const_spec(1, hidden),                              # lin_b
            const_spec(C, C),                                   # attn wq (bf16)
            const_spec(C, C),                                   # attn wc (bf16)
            const_spec(1, C),                                   # attn bc
            const_spec(1, C),                                   # attn wo
            pl.BlockSpec(memory_space=pltpu.MemorySpace.SMEM),  # attn bo scalar
            const_spec(V, R * V),                               # bilinear weight reshaped [V, R*V]
            const_spec(R * V, R),                               # group-sum matrix
            const_spec(1, R),                                   # bilinear bias
        ],
        out_specs=batch_spec(NC, R),
        compiler_params=pltpu.CompilerParams(dimension_semantics=("parallel",)),
    )(sel, pad, bert_out, ner_vec, maps, attn_mask, dis_h_vec, dis_t_vec,
      lin_w, lin_b, wq, wc, bc, wo, bo, bili_w_rs, grp, bili_b)


# ----------------------------------------------------------------------------
# Plain-JAX glue
# ----------------------------------------------------------------------------

def build_word_start_gather(context_starts):
    """Express the torch word-start gather + pad_sequence(-1) + F.pad(0) as
    (a) a per-batch one-hot selection matrix (applied in-kernel on the MXU) and
    (b) an additive per-row pad vector (-1 up to max count in batch, then 0)."""
    B, S = context_starts.shape
    starts = context_starts > 0
    counts = jnp.sum(starts.astype(jnp.int32), axis=1)                   # [B]
    max_count = jnp.max(counts)
    pos = jnp.arange(S)
    key = jnp.where(starts, pos[None, :], pos[None, :] + S)
    order = jnp.argsort(key, axis=1)                                     # start rows first, in order
    sel = jax.nn.one_hot(order, S, dtype=jnp.bfloat16)                   # [B, S, S]
    valid = (pos[None, :] < counts[:, None]).astype(jnp.bfloat16)
    sel = sel * valid[:, :, None]
    pad = jnp.where((pos[None, :] >= counts[:, None]) & (pos[None, :] < max_count),
                    -1.0, 0.0).astype(jnp.float32)[..., None]            # [B, S, 1]
    return sel, pad


def init_params(key, *, vocab_size, bert_hidden, hidden_size, entity_type_size,
                dis_size, relation_num):
    ks = jax.random.split(key, 14)

    def normal(k, shape, scale=0.02, dtype=jnp.float32):
        return (scale * jax.random.normal(k, shape, dtype=jnp.float32)).astype(dtype)

    C = hidden_size + entity_type_size          # context_hidden_size
    V = C + dis_size                            # vect_size
    return dict(
        tok_emb=normal(ks[0], (vocab_size, bert_hidden), dtype=jnp.bfloat16),
        enc_w=normal(ks[1], (bert_hidden, bert_hidden), dtype=jnp.bfloat16),
        enc_b=normal(ks[2], (1, bert_hidden)),
        lin_w=normal(ks[3], (bert_hidden, hidden_size), dtype=jnp.bfloat16),
        lin_b=normal(ks[4], (1, hidden_size)),
        ner_emb=normal(ks[5], (7, entity_type_size)).at[0].set(0.0),      # padding_idx=0
        dis_emb=normal(ks[6], (20, dis_size)).at[10].set(0.0),            # padding_idx=10
        attn_wc=normal(ks[7], (C, C), dtype=jnp.bfloat16),
        attn_bc=normal(ks[8], (1, C)),
        attn_wq=normal(ks[9], (C, C), dtype=jnp.bfloat16),                # no bias
        attn_wo=normal(ks[10], (1, C)),                                   # linear_o.weight [1, H]
        attn_bo=normal(ks[11], (1, 1)),
        bili_w=normal(ks[12], (relation_num, V, V)),
        bili_b=normal(ks[13], (1, relation_num)),
    )


def bert_ext_forward(params, context_idxs, pos, context_ner, context_char_idxs,
                     context_lens, h_mapping, t_mapping, relation_mask,
                     dis_h_2_t, dis_t_2_h, sent_idxs, sent_lengths,
                     reverse_sent_idxs, context_masks, context_starts):
    # these inputs are unused by the torch forward as well
    del pos, context_char_idxs, context_lens, relation_mask
    del sent_idxs, sent_lengths, reverse_sent_idxs
    B, NC, S = h_mapping.shape
    bert_hidden = params["enc_w"].shape[0]
    relation_num = params["bili_b"].shape[-1]
    V = params["bili_w"].shape[-1]

    # "BERT" stand-in: token embedding lookup (glue) + one big bf16 dense/tanh kernel
    emb = jnp.take(params["tok_emb"], context_idxs, axis=0)               # [B, S, 768] bf16
    bert_out = encoder_pallas(emb.reshape(B * S, bert_hidden),
                              context_masks.reshape(B * S, 1).astype(jnp.float32),
                              params["enc_w"], params["enc_b"])
    bert_out = bert_out.reshape(B, S, bert_hidden)                        # bf16, only HBM intermediate

    # word-start gather (as selection matmul inside the fused kernel)
    sel, pad = build_word_start_gather(context_starts)

    # tiny embedding lookups stay as XLA gathers; everything else runs in one fused kernel
    ner_vec = jnp.take(params["ner_emb"], context_ner, axis=0)            # [B, S, E]
    dis_h_vec = jnp.take(params["dis_emb"], dis_h_2_t, axis=0)            # [B, NC, D]
    dis_t_vec = jnp.take(params["dis_emb"], dis_t_2_h, axis=0)            # [B, NC, D]
    maps = jnp.concatenate([h_mapping, t_mapping], axis=1).astype(jnp.float32)       # [B, 2NC, S]
    attn_mask = (jnp.concatenate([t_mapping, h_mapping], axis=1) > 0.0).astype(jnp.float32)

    # bilinear weight reshaped once so the kernel does a single [NC,V]@[V,R*V] matmul
    bili_w_rs = jnp.transpose(params["bili_w"], (1, 0, 2)).reshape(V, relation_num * V)
    grp = (jnp.arange(relation_num * V)[:, None] // V ==
           jnp.arange(relation_num)[None, :]).astype(jnp.float32)         # [R*V, R] group-sum

    logits = fused_downstream_pallas(
        sel, pad, bert_out, ner_vec, maps, attn_mask, dis_h_vec, dis_t_vec,
        params["lin_w"], params["lin_b"],
        params["attn_wq"], params["attn_wc"], params["attn_bc"],
        params["attn_wo"], params["attn_bo"],
        bili_w_rs, grp, params["bili_b"])
    return logits                                                         # [B, NC, relation_num]


if __name__ == "__main__":
    B, S, NC = 2, 16, 4
    bert_hidden = 768
    vocab_size = 100
    config = SimpleNamespace(num_output_module=1, use_ner_emb=True,
                             mu_activation_option="none", hidden_size=32,
                             twin_init=False, cross_encoder=True,
                             entity_type_size=8, train_bert=False,
                             dis_size=8, relation_num=5)

    key = jax.random.PRNGKey(0)
    pkey, dkey = jax.random.split(key)
    params = init_params(pkey, vocab_size=vocab_size, bert_hidden=bert_hidden,
                         hidden_size=config.hidden_size,
                         entity_type_size=config.entity_type_size,
                         dis_size=config.dis_size, relation_num=config.relation_num)

    dks = jax.random.split(dkey, 8)
    context_idxs = jax.random.randint(dks[0], (B, S), 0, vocab_size, dtype=jnp.int32)
    context_ner = jax.random.randint(dks[1], (B, S), 0, 7, dtype=jnp.int32)
    lens = jnp.array([S, S - 4], dtype=jnp.int32)
    context_masks = (jnp.arange(S)[None, :] < lens[:, None]).astype(jnp.float32)
    context_starts = (jax.random.uniform(dks[2], (B, S)) > 0.5).astype(jnp.int32)
    context_starts = context_starts * context_masks.astype(jnp.int32)
    context_starts = context_starts.at[:, 0].set(1)

    hm_mask = (jax.random.uniform(dks[3], (B, NC, S)) > 0.6).astype(jnp.float32)
    hm_mask = hm_mask.at[:, :, 0].set(1.0)
    h_mapping = hm_mask / jnp.sum(hm_mask, axis=-1, keepdims=True)
    tm_mask = (jax.random.uniform(dks[4], (B, NC, S)) > 0.6).astype(jnp.float32)
    tm_mask = tm_mask.at[:, :, 1].set(1.0)
    t_mapping = tm_mask / jnp.sum(tm_mask, axis=-1, keepdims=True)

    dis_h_2_t = jax.random.randint(dks[5], (B, NC), 0, 20, dtype=jnp.int32)
    dis_t_2_h = jax.random.randint(dks[6], (B, NC), 0, 20, dtype=jnp.int32)

    # inputs present in the torch signature but unused by forward
    pos = jnp.zeros((B, S), jnp.int32)
    context_char_idxs = jnp.zeros((B, S, 4), jnp.int32)
    context_lens = lens
    relation_mask = jnp.ones((B, NC), jnp.float32)
    sent_idxs = jnp.zeros((B, S), jnp.int32)
    sent_lengths = jnp.ones((B,), jnp.int32)
    reverse_sent_idxs = jnp.zeros((B, S), jnp.int32)

    fwd = jax.jit(bert_ext_forward)
    out = fwd(params, context_idxs, pos, context_ner, context_char_idxs,
              context_lens, h_mapping, t_mapping, relation_mask,
              dis_h_2_t, dis_t_2_h, sent_idxs, sent_lengths,
              reverse_sent_idxs, context_masks, context_starts)
    jax.block_until_ready(out)
    assert out.shape == (B, NC, config.relation_num)
    print("KERNEL_OK")
</pallas_src>

<mosaic_0001>
module attributes {stable_mosaic.version = 11 : i64} {
  func.func @_encoder_kernel(%arg0: i32, %arg1: memref<32x768xbf16, #tpu.memory_space<vmem>>, %arg2: memref<32x1xf32, #tpu.memory_space<vmem>>, %arg3: memref<768x768xbf16, #tpu.memory_space<vmem>>, %arg4: memref<1x768xf32, #tpu.memory_space<vmem>>, %arg5: memref<32x768xbf16, #tpu.memory_space<vmem>>) attributes {dimension_semantics = [#tpu.dimension_semantics<arbitrary>], iteration_bounds = array<i64: 1>, scalar_prefetch = 0 : i64, scratch_operands = 0 : i64, tpu.core_type = #tpu.core_type<tc>, window_params = [{pipeline_mode = #tpu.pipeline_mode<synchronous>, transform_indices = @transform_0, window_bounds = array<i64: 32, 768>}, {pipeline_mode = #tpu.pipeline_mode<synchronous>, transform_indices = @transform_1, window_bounds = array<i64: 32, 1>}, {pipeline_mode = #tpu.pipeline_mode<synchronous>, transform_indices = @transform_2, window_bounds = array<i64: 768, 768>}, {pipeline_mode = #tpu.pipeline_mode<synchronous>, transform_indices = @transform_3, window_bounds = array<i64: 1, 768>}, {pipeline_mode = #tpu.pipeline_mode<synchronous>, transform_indices = @transform_4, window_bounds = array<i64: 32, 768>}]} {
    %c0 = arith.constant 0 : index
    %c0_0 = arith.constant 0 : index
    %0 = vector.load %arg1[%c0, %c0_0] : memref<32x768xbf16, #tpu.memory_space<vmem>>, vector<32x768xbf16>
    %c0_1 = arith.constant 0 : index
    %c0_2 = arith.constant 0 : index
    %1 = vector.load %arg3[%c0_1, %c0_2] : memref<768x768xbf16, #tpu.memory_space<vmem>>, vector<768x768xbf16>
    %cst = arith.constant dense<0.000000e+00> : vector<32x768xf32>
    %2 = tpu.matmul %0, %1, %cst {dimension_numbers = #tpu.dot_dimension_numbers<[1], [0], [0], [1], [0, 0, 1, 1], [], []>} : vector<32x768xbf16>, vector<768x768xbf16>, vector<32x768xf32> -> vector<32x768xf32>
    %c0_3 = arith.constant 0 : index
    %c0_4 = arith.constant 0 : index
    %3 = vector.load %arg4[%c0_3, %c0_4] : memref<1x768xf32, #tpu.memory_space<vmem>>, vector<1x768xf32>
    %4 = vector.broadcast %3 : vector<1x768xf32> to vector<32x768xf32>
    %5 = arith.addf %2, %4 : vector<32x768xf32>
    %6 = math.tanh %5 : vector<32x768xf32>
    %c0_5 = arith.constant 0 : index
    %c0_6 = arith.constant 0 : index
    %7 = vector.load %arg2[%c0_5, %c0_6] : memref<32x1xf32, #tpu.memory_space<vmem>>, vector<32x1xf32>
    %8 = vector.broadcast %7 : vector<32x1xf32> to vector<32x768xf32>
    %9 = arith.mulf %6, %8 : vector<32x768xf32>
    %10 = arith.truncf %9 : vector<32x768xf32> to vector<32x768xbf16>
    %c0_7 = arith.constant 0 : index
    %c0_8 = arith.constant 0 : index
    %11 = vector.load %arg5[%c0_7, %c0_8] : memref<32x768xbf16, #tpu.memory_space<vmem>>, vector<32x768xbf16>
    tpu.vector_store %arg5[%c0_7, %c0_8], %10 {strides = array<i32>} : memref<32x768xbf16, #tpu.memory_space<vmem>>, vector<32x768xbf16>,
    return
  }
  func.func @transform_0(%arg0: i32) -> (i32, i32) {
    %c0_i32 = arith.constant 0 : i32
    %c0_i32_0 = arith.constant 0 : i32
    %c0_i32_1 = arith.constant 0 : i32
    return %c0_i32, %c0_i32_0 : i32, i32
  }
  func.func @transform_1(%arg0: i32) -> (i32, i32) {
    %c0_i32 = arith.constant 0 : i32
    %c0_i32_0 = arith.constant 0 : i32
    %c0_i32_1 = arith.constant 0 : i32
    return %c0_i32, %c0_i32_0 : i32, i32
  }
  func.func @transform_2(%arg0: i32) -> (i32, i32) {
    %c0_i32 = arith.constant 0 : i32
    %c0_i32_0 = arith.constant 0 : i32
    %c0_i32_1 = arith.constant 0 : i32
    return %c0_i32, %c0_i32_0 : i32, i32
  }
  func.func @transform_3(%arg0: i32) -> (i32, i32) {
    %c0_i32 = arith.constant 0 : i32
    %c0_i32_0 = arith.constant 0 : i32
    %c0_i32_1 = arith.constant 0 : i32
    return %c0_i32, %c0_i32_0 : i32, i32
  }
  func.func @transform_4(%arg0: i32) -> (i32, i32) {
    %c0_i32 = arith.constant 0 : i32
    %c0_i32_0 = arith.constant 0 : i32
    %c0_i32_1 = arith.constant 0 : i32
    return %c0_i32, %c0_i32_0 : i32, i32
  }
}

module attributes {stable_mosaic.version = 11 : i64} {
  func.func @_fused_kernel(%arg0: i32, %arg1: memref<1x16x16xbf16, #tpu.memory_space<vmem>>, %arg2: memref<1x16x1xf32, #tpu.memory_space<vmem>>, %arg3: memref<1x16x768xbf16, #tpu.memory_space<vmem>>, %arg4: memref<1x16x8xf32, #tpu.memory_space<vmem>>, %arg5: memref<1x8x16xf32, #tpu.memory_space<vmem>>, %arg6: memref<1x8x16xf32, #tpu.memory_space<vmem>>, %arg7: memref<1x4x8xf32, #tpu.memory_space<vmem>>, %arg8: memref<1x4x8xf32, #tpu.memory_space<vmem>>, %arg9: memref<768x32xbf16, #tpu.memory_space<vmem>>, %arg10: memref<1x32xf32, #tpu.memory_space<vmem>>, %arg11: memref<40x40xbf16, #tpu.memory_space<vmem>>, %arg12: memref<40x40xbf16, #tpu.memory_space<vmem>>, %arg13: memref<1x40xf32, #tpu.memory_space<vmem>>, %arg14: memref<1x40xf32, #tpu.memory_space<vmem>>, %arg15: memref<1x1xf32, #tpu.memory_space<smem>>, %arg16: memref<48x240xf32, #tpu.memory_space<vmem>>, %arg17: memref<240x5xf32, #tpu.memory_space<vmem>>, %arg18: memref<1x5xf32, #tpu.memory_space<vmem>>, %arg19: memref<1x4x5xf32, #tpu.memory_space<vmem>>) attributes {dimension_semantics = [#tpu.dimension_semantics<parallel>], iteration_bounds = array<i64: 2>, scalar_prefetch = 0 : i64, scratch_operands = 0 : i64, tpu.core_type = #tpu.core_type<tc>, window_params = [{transform_indices = @transform_0, window_bounds = array<i64: 1, 16, 16>}, {transform_indices = @transform_1, window_bounds = array<i64: 1, 16, 1>}, {transform_indices = @transform_2, window_bounds = array<i64: 1, 16, 768>}, {transform_indices = @transform_3, window_bounds = array<i64: 1, 16, 8>}, {transform_indices = @transform_4, window_bounds = array<i64: 1, 8, 16>}, {transform_indices = @transform_5, window_bounds = array<i64: 1, 8, 16>}, {transform_indices = @transform_6, window_bounds = array<i64: 1, 4, 8>}, {transform_indices = @transform_7, window_bounds = array<i64: 1, 4, 8>}, {pipeline_mode = #tpu.pipeline_mode<synchronous>, transform_indices = @transform_8, window_bounds = array<i64: 768, 32>}, {pipeline_mode = #tpu.pipeline_mode<synchronous>, transform_indices = @transform_9, window_bounds = array<i64: 1, 32>}, {pipeline_mode = #tpu.pipeline_mode<synchronous>, transform_indices = @transform_10, window_bounds = array<i64: 40, 40>}, {pipeline_mode = #tpu.pipeline_mode<synchronous>, transform_indices = @transform_11, window_bounds = array<i64: 40, 40>}, {pipeline_mode = #tpu.pipeline_mode<synchronous>, transform_indices = @transform_12, window_bounds = array<i64: 1, 40>}, {pipeline_mode = #tpu.pipeline_mode<synchronous>, transform_indices = @transform_13, window_bounds = array<i64: 1, 40>}, {transform_indices = @transform_14, window_bounds = array<i64: 1, 1>}, {pipeline_mode = #tpu.pipeline_mode<synchronous>, transform_indices = @transform_15, window_bounds = array<i64: 48, 240>}, {pipeline_mode = #tpu.pipeline_mode<synchronous>, transform_indices = @transform_16, window_bounds = array<i64: 240, 5>}, {pipeline_mode = #tpu.pipeline_mode<synchronous>, transform_indices = @transform_17, window_bounds = array<i64: 1, 5>}, {transform_indices = @transform_18, window_bounds = array<i64: 1, 4, 5>}]} {
    %c0 = arith.constant 0 : index
    %c0_0 = arith.constant 0 : index
    %c0_1 = arith.constant 0 : index
    %0 = vector.load %arg1[%c0, %c0_0, %c0_1] : memref<1x16x16xbf16, #tpu.memory_space<vmem>>, vector<1x16x16xbf16>
    %1 = vector.shape_cast %0 : vector<1x16x16xbf16> to vector<16x16xbf16>
    %c0_2 = arith.constant 0 : index
    %c0_3 = arith.constant 0 : index
    %c0_4 = arith.constant 0 : index
    %2 = vector.load %arg3[%c0_2, %c0_3, %c0_4] : memref<1x16x768xbf16, #tpu.memory_space<vmem>>, vector<1x16x768xbf16>
    %3 = vector.shape_cast %2 : vector<1x16x768xbf16> to vector<16x768xbf16>
    %cst = arith.constant dense<0.000000e+00> : vector<16x768xf32>
    %4 = tpu.matmul %1, %3, %cst {dimension_numbers = #tpu.dot_dimension_numbers<[1], [0], [0], [1], [0, 0, 1, 1], [], []>} : vector<16x16xbf16>, vector<16x768xbf16>, vector<16x768xf32> -> vector<16x768xf32>
    %c0_5 = arith.constant 0 : index
    %c0_6 = arith.constant 0 : index
    %c0_7 = arith.constant 0 : index
    %5 = vector.load %arg2[%c0_5, %c0_6, %c0_7] : memref<1x16x1xf32, #tpu.memory_space<vmem>>, vector<1x16x1xf32>
    %6 = vector.shape_cast %5 : vector<1x16x1xf32> to vector<16x1xf32>
    %7 = vector.broadcast %6 : vector<16x1xf32> to vector<16x768xf32>
    %8 = arith.addf %4, %7 : vector<16x768xf32>
    %9 = arith.truncf %8 : vector<16x768xf32> to vector<16x768xbf16>
    %c0_8 = arith.constant 0 : index
    %c0_9 = arith.constant 0 : index
    %10 = vector.load %arg9[%c0_8, %c0_9] : memref<768x32xbf16, #tpu.memory_space<vmem>>, vector<768x32xbf16>
    %cst_10 = arith.constant dense<0.000000e+00> : vector<16x32xf32>
    %11 = tpu.matmul %9, %10, %cst_10 {dimension_numbers = #tpu.dot_dimension_numbers<[1], [0], [0], [1], [0, 0, 1, 1], [], []>} : vector<16x768xbf16>, vector<768x32xbf16>, vector<16x32xf32> -> vector<16x32xf32>
    %c0_11 = arith.constant 0 : index
    %c0_12 = arith.constant 0 : index
    %12 = vector.load %arg10[%c0_11, %c0_12] : memref<1x32xf32, #tpu.memory_space<vmem>>, vector<1x32xf32>
    %13 = vector.broadcast %12 : vector<1x32xf32> to vector<16x32xf32>
    %14 = arith.addf %11, %13 : vector<16x32xf32>
    %c0_13 = arith.constant 0 : index
    %c0_14 = arith.constant 0 : index
    %c0_15 = arith.constant 0 : index
    %15 = vector.load %arg4[%c0_13, %c0_14, %c0_15] : memref<1x16x8xf32, #tpu.memory_space<vmem>>, vector<1x16x8xf32>
    %16 = vector.shape_cast %15 : vector<1x16x8xf32> to vector<16x8xf32>
    %17 = tpu.concatenate %14, %16 in 1 : vector<16x32xf32>, vector<16x8xf32> -> vector<16x40xf32>
    %c0_16 = arith.constant 0 : index
    %c0_17 = arith.constant 0 : index
    %c0_18 = arith.constant 0 : index
    %18 = vector.load %arg5[%c0_16, %c0_17, %c0_18] : memref<1x8x16xf32, #tpu.memory_space<vmem>>, vector<1x8x16xf32>
    %19 = vector.shape_cast %18 : vector<1x8x16xf32> to vector<8x16xf32>
    %cst_19 = arith.constant dense<0.000000e+00> : vector<8x40xf32>
    %20 = tpu.matmul %19, %17, %cst_19 {dimension_numbers = #tpu.dot_dimension_numbers<[1], [0], [0], [1], [0, 0, 1, 1], [], []>} : vector<8x16xf32>, vector<16x40xf32>, vector<8x40xf32> -> vector<8x40xf32>
    %21 = arith.truncf %20 : vector<8x40xf32> to vector<8x40xbf16>
    %c0_20 = arith.constant 0 : index
    %c0_21 = arith.constant 0 : index
    %22 = vector.load %arg11[%c0_20, %c0_21] : memref<40x40xbf16, #tpu.memory_space<vmem>>, vector<40x40xbf16>
    %cst_22 = arith.constant dense<0.000000e+00> : vector<8x40xf32>
    %23 = tpu.matmul %21, %22, %cst_22 {dimension_numbers = #tpu.dot_dimension_numbers<[1], [0], [0], [1], [0, 0, 1, 1], [], []>} : vector<8x40xbf16>, vector<40x40xbf16>, vector<8x40xf32> -> vector<8x40xf32>
    %24 = arith.truncf %17 : vector<16x40xf32> to vector<16x40xbf16>
    %c0_23 = arith.constant 0 : index
    %c0_24 = arith.constant 0 : index
    %25 = vector.load %arg12[%c0_23, %c0_24] : memref<40x40xbf16, #tpu.memory_space<vmem>>, vector<40x40xbf16>
    %cst_25 = arith.constant dense<0.000000e+00> : vector<16x40xf32>
    %26 = tpu.matmul %24, %25, %cst_25 {dimension_numbers = #tpu.dot_dimension_numbers<[1], [0], [0], [1], [0, 0, 1, 1], [], []>} : vector<16x40xbf16>, vector<40x40xbf16>, vector<16x40xf32> -> vector<16x40xf32>
    %c0_26 = arith.constant 0 : index
    %c0_27 = arith.constant 0 : index
    %27 = vector.load %arg13[%c0_26, %c0_27] : memref<1x40xf32, #tpu.memory_space<vmem>>, vector<1x40xf32>
    %28 = vector.broadcast %27 : vector<1x40xf32> to vector<16x40xf32>
    %29 = arith.addf %26, %28 : vector<16x40xf32>
    %30 = vector.shape_cast %29 : vector<16x40xf32> to vector<1x16x40xf32>
    %31 = vector.shape_cast %23 : vector<8x40xf32> to vector<8x1x40xf32>
    %32 = vector.broadcast %30 : vector<1x16x40xf32> to vector<8x16x40xf32>
    %33 = vector.broadcast %31 : vector<8x1x40xf32> to vector<8x16x40xf32>
    %34 = arith.addf %32, %33 : vector<8x16x40xf32>
    %35 = math.tanh %34 : vector<8x16x40xf32>
    %c0_28 = arith.constant 0 : index
    %c0_29 = arith.constant 0 : index
    %36 = vector.load %arg14[%c0_28, %c0_29] : memref<1x40xf32, #tpu.memory_space<vmem>>, vector<1x40xf32>
    %37 = vector.shape_cast %36 : vector<1x40xf32> to vector<1x1x40xf32>
    %38 = vector.broadcast %37 : vector<1x1x40xf32> to vector<8x16x40xf32>
    %39 = arith.mulf %35, %38 : vector<8x16x40xf32>
    %cst_30 = arith.constant dense<0.000000e+00> : vector<8x16xf32>
    %40 = vector.multi_reduction <add>, %39, %cst_30 [2] : vector<8x16x40xf32> to vector<8x16xf32>
    %c0_31 = arith.constant 0 : index
    %c0_32 = arith.constant 0 : index
    %41 = memref.load %arg15[%c0_31, %c0_32] : memref<1x1xf32, #tpu.memory_space<smem>>
    %42 = vector.broadcast %41 : f32 to vector<8x16xf32>
    %43 = arith.addf %40, %42 : vector<8x16xf32>
    %cst_33 = arith.constant dense<0xFF800000> : vector<8xf32>
    %44 = vector.multi_reduction <maximumf>, %43, %cst_33 [1] : vector<8x16xf32> to vector<8xf32>
    %45 = vector.shape_cast %44 : vector<8xf32> to vector<8x1xf32>
    %cst_34 = arith.constant 0.000000e+00 : f32
    %46 = vector.broadcast %cst_34 : f32 to vector<8x1xf32>
    %47 = arith.maximumf %45, %46 : vector<8x1xf32>
    %c0_35 = arith.constant 0 : index
    %c0_36 = arith.constant 0 : index
    %c0_37 = arith.constant 0 : index
    %48 = vector.load %arg6[%c0_35, %c0_36, %c0_37] : memref<1x8x16xf32, #tpu.memory_space<vmem>>, vector<1x8x16xf32>
    %49 = vector.shape_cast %48 : vector<1x8x16xf32> to vector<8x16xf32>
    %50 = vector.broadcast %47 : vector<8x1xf32> to vector<8x16xf32>
    %51 = arith.subf %43, %50 : vector<8x16xf32>
    %52 = math.exp %51 : vector<8x16xf32>
    %53 = arith.mulf %49, %52 : vector<8x16xf32>
    %cst_38 = arith.constant dense<0.000000e+00> : vector<8xf32>
    %54 = vector.multi_reduction <add>, %53, %cst_38 [1] : vector<8x16xf32> to vector<8xf32>
    %55 = vector.shape_cast %54 : vector<8xf32> to vector<8x1xf32>
    %cst_39 = arith.constant 0.000000e+00 : f32
    %56 = vector.broadcast %cst_39 : f32 to vector<8x1xf32>
    %57 = arith.subf %56, %47 : vector<8x1xf32>
    %58 = math.exp %57 : vector<8x1xf32>
    %cst_40 = arith.constant 9.99999974E-6 : f32
    %59 = vector.broadcast %cst_40 : f32 to vector<8x1xf32>
    %60 = arith.mulf %59, %58 : vector<8x1xf32>
    %61 = arith.addf %55, %60 : vector<8x1xf32>
    %62 = vector.broadcast %61 : vector<8x1xf32> to vector<8x16xf32>
    %63 = arith.divf %53, %62 : vector<8x16xf32>
    %cst_41 = arith.constant dense<0.000000e+00> : vector<8x40xf32>
    %64 = tpu.matmul %63, %17, %cst_41 {dimension_numbers = #tpu.dot_dimension_numbers<[1], [0], [0], [1], [0, 0, 1, 1], [], []>} : vector<8x16xf32>, vector<16x40xf32>, vector<8x40xf32> -> vector<8x40xf32>
    %65 = vector.extract_strided_slice %64 {offsets = [4, 0], sizes = [4, 40], strides = [1, 1]} : vector<8x40xf32> to vector<4x40xf32>
    %c0_42 = arith.constant 0 : index
    %c0_43 = arith.constant 0 : index
    %c0_44 = arith.constant 0 : index
    %66 = vector.load %arg7[%c0_42, %c0_43, %c0_44] : memref<1x4x8xf32, #tpu.memory_space<vmem>>, vector<1x4x8xf32>
    %67 = vector.shape_cast %66 : vector<1x4x8xf32> to vector<4x8xf32>
    %68 = tpu.concatenate %65, %67 in 1 : vector<4x40xf32>, vector<4x8xf32> -> vector<4x48xf32>
    %69 = vector.extract_strided_slice %64 {offsets = [0, 0], sizes = [4, 40], strides = [1, 1]} : vector<8x40xf32> to vector<4x40xf32>
    %c0_45 = arith.constant 0 : index
    %c0_46 = arith.constant 0 : index
    %c0_47 = arith.constant 0 : index
    %70 = vector.load %arg8[%c0_45, %c0_46, %c0_47] : memref<1x4x8xf32, #tpu.memory_space<vmem>>, vector<1x4x8xf32>
    %71 = vector.shape_cast %70 : vector<1x4x8xf32> to vector<4x8xf32>
    %72 = tpu.concatenate %69, %71 in 1 : vector<4x40xf32>, vector<4x8xf32> -> vector<4x48xf32>
    %c0_48 = arith.constant 0 : index
    %c0_49 = arith.constant 0 : index
    %73 = vector.load %arg16[%c0_48, %c0_49] : memref<48x240xf32, #tpu.memory_space<vmem>>, vector<48x240xf32>
    %cst_50 = arith.constant dense<0.000000e+00> : vector<4x240xf32>
    %74 = tpu.matmul %68, %73, %cst_50 {dimension_numbers = #tpu.dot_dimension_numbers<[1], [0], [0], [1], [0, 0, 1, 1], [], []>} : vector<4x48xf32>, vector<48x240xf32>, vector<4x240xf32> -> vector<4x240xf32>
    %75 = tpu.concatenate %72, %72, %72, %72, %72 in 1 : vector<4x48xf32>, vector<4x48xf32>, vector<4x48xf32>, vector<4x48xf32>, vector<4x48xf32> -> vector<4x240xf32>
    %76 = arith.mulf %74, %75 : vector<4x240xf32>
    %c0_51 = arith.constant 0 : index
    %c0_52 = arith.constant 0 : index
    %77 = vector.load %arg17[%c0_51, %c0_52] : memref<240x5xf32, #tpu.memory_space<vmem>>, vector<240x5xf32>
    %cst_53 = arith.constant dense<0.000000e+00> : vector<4x5xf32>
    %78 = tpu.matmul %76, %77, %cst_53 {dimension_numbers = #tpu.dot_dimension_numbers<[1], [0], [0], [1], [0, 0, 1, 1], [], []>} : vector<4x240xf32>, vector<240x5xf32>, vector<4x5xf32> -> vector<4x5xf32>
    %c0_54 = arith.constant 0 : index
    %c0_55 = arith.constant 0 : index
    %79 = vector.load %arg18[%c0_54, %c0_55] : memref<1x5xf32, #tpu.memory_space<vmem>>, vector<1x5xf32>
    %80 = vector.broadcast %79 : vector<1x5xf32> to vector<4x5xf32>
    %81 = arith.addf %78, %80 : vector<4x5xf32>
    %c0_56 = arith.constant 0 : index
    %c0_57 = arith.constant 0 : index
    %c0_58 = arith.constant 0 : index
    %82 = vector.load %arg19[%c0_56, %c0_57, %c0_58] : memref<1x4x5xf32, #tpu.memory_space<vmem>>, vector<1x4x5xf32>
    %83 = vector.shape_cast %82 : vector<1x4x5xf32> to vector<4x5xf32>
    %84 = vector.shape_cast %81 : vector<4x5xf32> to vector<1x4x5xf32>
    tpu.vector_store %arg19[%c0_56, %c0_57, %c0_58], %84 {strides = array<i32>} : memref<1x4x5xf32, #tpu.memory_space<vmem>>, vector<1x4x5xf32>,
    return
  }
  func.func @transform_0(%arg0: i32) -> (i32, i32, i32) {
    %c0_i32 = arith.constant 0 : i32
    %c0_i32_0 = arith.constant 0 : i32
    %c0_i32_1 = arith.constant 0 : i32
    return %arg0, %c0_i32, %c0_i32_0 : i32, i32, i32
  }
  func.func @transform_1(%arg0: i32) -> (i32, i32, i32) {
    %c0_i32 = arith.constant 0 : i32
    %c0_i32_0 = arith.constant 0 : i32
    %c0_i32_1 = arith.constant 0 : i32
    return %arg0, %c0_i32, %c0_i32_0 : i32, i32, i32
  }
  func.func @transform_2(%arg0: i32) -> (i32, i32, i32) {
    %c0_i32 = arith.constant 0 : i32
    %c0_i32_0 = arith.constant 0 : i32
    %c0_i32_1 = arith.constant 0 : i32
    return %arg0, %c0_i32, %c0_i32_0 : i32, i32, i32
  }
  func.func @transform_3(%arg0: i32) -> (i32, i32, i32) {
    %c0_i32 = arith.constant 0 : i32
    %c0_i32_0 = arith.constant 0 : i32
    %c0_i32_1 = arith.constant 0 : i32
    return %arg0, %c0_i32, %c0_i32_0 : i32, i32, i32
  }
  func.func @transform_4(%arg0: i32) -> (i32, i32, i32) {
    %c0_i32 = arith.constant 0 : i32
    %c0_i32_0 = arith.constant 0 : i32
    %c0_i32_1 = arith.constant 0 : i32
    return %arg0, %c0_i32, %c0_i32_0 : i32, i32, i32
  }
  func.func @transform_5(%arg0: i32) -> (i32, i32, i32) {
    %c0_i32 = arith.constant 0 : i32
    %c0_i32_0 = arith.constant 0 : i32
    %c0_i32_1 = arith.constant 0 : i32
    return %arg0, %c0_i32, %c0_i32_0 : i32, i32, i32
  }
  func.func @transform_6(%arg0: i32) -> (i32, i32, i32) {
    %c0_i32 = arith.constant 0 : i32
    %c0_i32_0 = arith.constant 0 : i32
    %c0_i32_1 = arith.constant 0 : i32
    return %arg0, %c0_i32, %c0_i32_0 : i32, i32, i32
  }
  func.func @transform_7(%arg0: i32) -> (i32, i32, i32) {
    %c0_i32 = arith.constant 0 : i32
    %c0_i32_0 = arith.constant 0 : i32
    %c0_i32_1 = arith.constant 0 : i32
    return %arg0, %c0_i32, %c0_i32_0 : i32, i32, i32
  }
  func.func @transform_8(%arg0: i32) -> (i32, i32) {
    %c0_i32 = arith.constant 0 : i32
    %c0_i32_0 = arith.constant 0 : i32
    %c0_i32_1 = arith.constant 0 : i32
    return %c0_i32, %c0_i32_0 : i32, i32
  }
  func.func @transform_9(%arg0: i32) -> (i32, i32) {
    %c0_i32 = arith.constant 0 : i32
    %c0_i32_0 = arith.constant 0 : i32
    %c0_i32_1 = arith.constant 0 : i32
    return %c0_i32, %c0_i32_0 : i32, i32
  }
  func.func @transform_10(%arg0: i32) -> (i32, i32) {
    %c0_i32 = arith.constant 0 : i32
    %c0_i32_0 = arith.constant 0 : i32
    %c0_i32_1 = arith.constant 0 : i32
    return %c0_i32, %c0_i32_0 : i32, i32
  }
  func.func @transform_11(%arg0: i32) -> (i32, i32) {
    %c0_i32 = arith.constant 0 : i32
    %c0_i32_0 = arith.constant 0 : i32
    %c0_i32_1 = arith.constant 0 : i32
    return %c0_i32, %c0_i32_0 : i32, i32
  }
  func.func @transform_12(%arg0: i32) -> (i32, i32) {
    %c0_i32 = arith.constant 0 : i32
    %c0_i32_0 = arith.constant 0 : i32
    %c0_i32_1 = arith.constant 0 : i32
    return %c0_i32, %c0_i32_0 : i32, i32
  }
  func.func @transform_13(%arg0: i32) -> (i32, i32) {
    %c0_i32 = arith.constant 0 : i32
    %c0_i32_0 = arith.constant 0 : i32
    %c0_i32_1 = arith.constant 0 : i32
    return %c0_i32, %c0_i32_0 : i32, i32
  }
  func.func @transform_14(%arg0: i32) -> (i32, i32) {
    %c0_i32 = arith.constant 0 : i32
    %c0_i32_0 = arith.constant 0 : i32
    %c0_i32_1 = arith.constant 0 : i32
    return %c0_i32, %c0_i32_0 : i32, i32
  }
  func.func @transform_15(%arg0: i32) -> (i32, i32) {
    %c0_i32 = arith.constant 0 : i32
    %c0_i32_0 = arith.constant 0 : i32
    %c0_i32_1 = arith.constant 0 : i32
    return %c0_i32, %c0_i32_0 : i32, i32
  }
  func.func @transform_16(%arg0: i32) -> (i32, i32) {
    %c0_i32 = arith.constant 0 : i32
    %c0_i32_0 = arith.constant 0 : i32
    %c0_i32_1 = arith.constant 0 : i32
    return %c0_i32, %c0_i32_0 : i32, i32
  }
  func.func @transform_17(%arg0: i32) -> (i32, i32) {
    %c0_i32 = arith.constant 0 : i32
    %c0_i32_0 = arith.constant 0 : i32
    %c0_i32_1 = arith.constant 0 : i32
    return %c0_i32, %c0_i32_0 : i32, i32
  }
  func.func @transform_18(%arg0: i32) -> (i32, i32, i32) {
    %c0_i32 = arith.constant 0 : i32
    %c0_i32_0 = arith.constant 0 : i32
    %c0_i32_1 = arith.constant 0 : i32
    return %arg0, %c0_i32, %c0_i32_0 : i32, i32, i32
  }
}

</mosaic_0001>

<bundles_post_ra>
// kernel: bert_ext_forward.3
= control target key start
LH: loop header
LB: loop body
LE: loop exit
PB: predicated region body
PF: predicated region fallthrough
CT: control target
= control target key end

     0   :  { %s4001_s0 = inlined_call_operand.vmem [shape: bf16[2,16,16], index: 0, kind: input, shape index: {}]   ;;  %s4002_s1 = inlined_call_operand.vmem [shape: f32[2,16,1], index: 1, kind: input, shape index: {}]   ;;  %s4003_s2 = inlined_call_operand.vmem [shape: bf16[2,16,768], index: 2, kind: input, shape index: {}]   ;;  %s4004_s3 = inlined_call_operand.vmem [shape: f32[2,16,8], index: 3, kind: input, shape index: {}]   ;;  %s4005_s4 = inlined_call_operand.vmem [shape: f32[2,8,16], index: 4, kind: input, shape index: {}]   ;;  %s4006_s5 = inlined_call_operand.vmem [shape: f32[2,8,16], index: 5, kind: input, shape index: {}]   ;;  %s4007_s6 = inlined_call_operand.vmem [shape: f32[2,4,8], index: 6, kind: input, shape index: {}]   ;;  %s4008_s7 = inlined_call_operand.vmem [shape: f32[2,4,8], index: 7, kind: input, shape index: {}]   ;;  %s4009_s8 = inlined_call_operand.vmem [shape: bf16[768,32], index: 8, kind: input, shape index: {}]   ;;  %s4010_s9 = inlined_call_operand.vmem [shape: f32[1,32], index: 9, kind: input, shape index: {}]   ;;  %s4011_s10 = inlined_call_operand.vmem [shape: bf16[40,40], index: 10, kind: input, shape index: {}]   ;;  %s4012_s11 = inlined_call_operand.vmem [shape: bf16[40,40], index: 11, kind: input, shape index: {}]   ;;  %s4013_s12 = inlined_call_operand.vmem [shape: f32[1,40], index: 12, kind: input, shape index: {}]   ;;  %s4014_s13 = inlined_call_operand.vmem [shape: f32[1,40], index: 13, kind: input, shape index: {}]   ;;  %s4015_s14 = inlined_call_operand.<no memory space> [shape: f32[1,1], index: 14, kind: input, shape index: {}]   ;;  %s4016_s15 = inlined_call_operand.vmem [shape: f32[48,240], index: 15, kind: input, shape index: {}]   ;;  %s4017_s16 = inlined_call_operand.vmem [shape: f32[240,5], index: 16, kind: input, shape index: {}]   ;;  %s4018_s17 = inlined_call_operand.vmem [shape: f32[1,5], index: 17, kind: input, shape index: {}]   ;;  %s4019_s18 = inlined_call_operand.hbm [shape: f32[2,4,5], index: 18, kind: output, shape index: {}]  }
   0x1   :  { %4031 = sst [smem:[#allocation15_spill]] %s4001_s0 }
   0x2   :  { %4032 = sst [smem:[#allocation16_spill]] %s4002_s1 }
   0x3   :  { %4033 = sst [smem:[#allocation17_spill]] %s4003_s2 }
   0x4   :  { %4034 = sst [smem:[#allocation18_spill]] %s4018_s17 }
   0x5   :  { %4035 = sst [smem:[#allocation19_spill]] %s4019_s18 }
   0x6   :  { %23 = sst [smem:[#allocation2]] %s4015_s14 }
   0x7   :  { %24 = vsyncpa [#allocation4], 0 }
   0x8   :  { %26 = vsyncpa [#allocation4 + $0x1], 0  ;;  %s3313_s29 = smov 0   ;;  %s3315_s30 = smov 0  }
   0x9   :  { %s3317_s0 = smov 0   ;;  %s3319_s19 = smov 0  }
   0xa LB: > { %4036 = sst [smem:[#allocation6_spill]] %s3189_s29  ;;  %s3334_s14 = sadd.s32 4294967295, %s3201_s19   ;;  %s3201_s19 = sphi %s3319_s19, %s4058_s19   ;;  %s3197_s0 = sphi %s3317_s0, %s4061_s0   ;;  %s3193_s30 = sphi %s3315_s30, %s4060_s30   ;;  %s3189_s29 = sphi %s3313_s29, %s4059_s29  }
   0xb   : > { %4037 = sst [smem:[#allocation7_spill]] %s3193_s30  ;;  %s2675_s1 = sadd.s32 4294967294, %s3201_s19  }
   0xc   : > { %4038 = sst [smem:[#allocation8_spill]] %s3197_s0  ;;  %s3338_s20 = sadd.s32 1, %s3201_s19  }
   0xd   : > { %4039 = sst [smem:[#allocation9_spill]] %s3201_s19  ;;  %s457_s21 = sadd.s32 1, %s3197_s0 }
   0xe   : > { %4040 = sst [smem:[#allocation10_spill]] %s3334_s14  ;;  %s454_s22 = ssub.s32 %s3201_s19, %s3338_s20 }
   0xf   : > { %4041 = sst [smem:[#allocation11_spill]] %s3338_s20  ;;  %p467_p0 = scmp.ne.s32.totalorder %s3197_s0, %s3193_s30 }
  0x10   : > { %p455_p1 = scmp.eq.s32.totalorder %s454_s22, 0  ;;  %p468_p2 = scmp.eq.s32.totalorder %s3334_s14, 1 }
  0x11   : > { %p473_p3 = scmp.ne.s32.totalorder %s3193_s30, %s3189_s29  ;;  %p474_p4 = scmp.eq.s32.totalorder %s2675_s1, 1 }
  0x12   : > { %s3349_s2 = scalar_select %p455_p1, %s3197_s0, %s457_s21  }
  0x13   : > { %p3351_p5 = por %p468_p2, %p467_p0  ;;  %p3355_p6 = por %p474_p4, %p473_p3 }
  0x14   : > { %4042 = sst [smem:[#allocation12_spill]] %s3349_s2  ;;  %p2678_p7 = scmp.ge.s32.totalorder %s3201_s19, 1 }
  0x15   : > { %s4043_s23 = scalar_select %p3351_p5, 1, 0 }
  0x16   : > { %s4045_s24 = scalar_select %p3355_p6, 1, 0 }
  0x17   : > { %4044 = sst [smem:[#allocation13_spill]] %s4043_s23  ;;  %p582_p8 = scmp.lt.s32.totalorder %s3201_s19, 3 }
  0x18   : > { %4046 = sst [smem:[#allocation14_spill]] %s4045_s24 }
  0x19   : > { %p583_p9 = pnand %p2678_p7, %p582_p8 }
  0x1a   : > { %p667_p10 = scmp.lt.s32.totalorder (!%p583_p9), %s3334_s14, 1  ;;  %v3203_v0 = vmov (!%p583_p9), 0   ;;  %s4047_s21 = sld [smem:[#allocation15_spill]] (!%p583_p9)  ;;  %v3017_v2 = vld [vmem:[%s4009_s8 + $0x40] sm:$0xff] (!%p583_p9)   ;;  %vm759_vm0 = vcmask (!%p583_p9), 130048   ;;  %v3021_v12 = vld [vmem:[%s4009_s8 + $0x48] sm:$0xff] (!%p583_p9)  }
  0x1b   : > { %586 = sbr.rel (%p583_p9) target bundleno = 2302 (0x8fe), region = 92  ;;  %795 = vmatprep.mubr.bf16.mxu1 (!%p583_p9), %v3203_v0  ;;  %881 = vmatprep.mubr.bf16.mxu0 (!%p583_p9), %v3203_v0  ;;  %s4048_s24 = sld [smem:[#allocation17_spill]] (!%p583_p9)  ;;  %v3018_v8 = vld [vmem:[%s4009_s8] sm:$0xff] (!%p583_p9)   ;;  %v3022_v14 = vld [vmem:[%s4009_s8 + $0x8] sm:$0xff] (!%p583_p9)   ;;  %v3025_v15 = vld [vmem:[%s4009_s8 + $0x50] sm:$0xff] (!%p583_p9)   ;;  %vm3206_vm1 = vmmov (!%p583_p9), 0  }
  0x1c   : > { %3000 = vset.pattern.permute.xlu0 (!%p583_p9), %v3203_v0  ;;  %3006 = vset.pattern.permute.xlu1 (!%p583_p9), %v3203_v0  ;;  %v3019_v11 = vld [vmem:[%s4009_s8 + $0x140] sm:$0xff] (!%p583_p9)   ;;  %v3023_v17 = vld [vmem:[%s4009_s8 + $0x148] sm:$0xff] (!%p583_p9)   ;;  %v3026_v18 = vld [vmem:[%s4009_s8 + $0x10] sm:$0xff] (!%p583_p9)   ;;  %s3204_s20 = smov (!%p583_p9), 32   ;;  %vm1422_vm2 = vcmask (!%p583_p9), 261120   ;;  %vm1524_vm3 = vcmask (!%p583_p9), 1043456  }
  0x1d   : > { %v3020_v16 = vld [vmem:[%s4009_s8 + $0x100] sm:$0xff] (!%p583_p9)   ;;  %v3029_v19 = vld [vmem:[%s4009_s8 + $0x58] sm:$0xff] (!%p583_p9)   ;;  %v3024_v20 = vld [vmem:[%s4009_s8 + $0x108] sm:$0xff] (!%p583_p9)   ;;  %vm1520_vm4 = vcmask (!%p583_p9), 326656   ;;  %vm1881_vm5 = vcmask (!%p583_p9), 130112   ;;  %vm1946_vm6 = vcmask (!%p583_p9), 1041409  }
  0x1e   : > { %v3027_v21 = vld [vmem:[%s4009_s8 + $0x150] sm:$0xff] (!%p583_p9)   ;;  %v3030_v22 = vld [vmem:[%s4009_s8 + $0x18] sm:$0xff] (!%p583_p9)   ;;  %v3033_v23 = vld [vmem:[%s4009_s8 + $0x60] sm:$0xff] (!%p583_p9)   ;;  %vm1948_vm7 = vcmask (!%p583_p9), 1042434   ;;  %vm1950_vm8 = vcmask (!%p583_p9), 1043459   ;;  %vm1952_vm9 = vcmask (!%p583_p9), 1044484  }
  0x1f   : > { %v3028_v24 = vld [vmem:[%s4009_s8 + $0x110] sm:$0xff] (!%p583_p9)   ;;  %v3031_v25 = vld [vmem:[%s4009_s8 + $0x158] sm:$0xff] (!%p583_p9)   ;;  %v3034_v26 = vld [vmem:[%s4009_s8 + $0x20] sm:$0xff] (!%p583_p9)   ;;  %vm1954_vm10 = vcmask (!%p583_p9), 1045509   ;;  %vm1956_vm11 = vcmask (!%p583_p9), 1046534   ;;  %vm1958_vm12 = vcmask (!%p583_p9), 1047559  }
  0x20   : > { %v3032_v27 = vld [vmem:[%s4009_s8 + $0x118] sm:$0xff] (!%p583_p9)   ;;  %v3037_v28 = vld [vmem:[%s4009_s8 + $0x68] sm:$0xff] (!%p583_p9)   ;;  %v3035_v29 = vld [vmem:[%s4009_s8 + $0x160] sm:$0xff] (!%p583_p9)   ;;  %s3209_s17 = smov (!%p583_p9), 40   ;;  %vm2310_vm13 = vcmask (!%p583_p9), 392192   ;;  %s3210_s19 = smov (!%p583_p9), 96  }
  0x21   : > { %v3038_v30 = vld [vmem:[%s4009_s8 + $0x28] sm:$0xff] (!%p583_p9)   ;;  %v3036_v31 = vld [vmem:[%s4009_s8 + $0x120] sm:$0xff] (!%p583_p9)   ;;  %v3041_v34 = vld [vmem:[%s4009_s8 + $0x70] sm:$0xff] (!%p583_p9)   ;;  %s3213_s28 = smov (!%p583_p9), 64   ;;  %vm2401_vm14 = vcmask (!%p583_p9), 523264   ;;  %vm2398_vm15 = vcmask (!%p583_p9), 785408  }
  0x22   : > { %s3363_s25 = scalar_select %p667_p10, %s3334_s14, 1  ;;  %v3039_v32 = vld [vmem:[%s4009_s8 + $0x168] sm:$0xff]   ;;  %v3042_v35 = vld [vmem:[%s4009_s8 + $0x30] sm:$0xff]   ;;  %v3045_v38 = vld [vmem:[%s4009_s8 + $0x78] sm:$0xff]  }
  0x23   : > { %s4049_s14 = sld [smem:[#allocation16_spill]]  ;;  %v3040_v33 = vld [vmem:[%s4009_s8 + $0x128] sm:$0xff]   ;;  %v3043_v36 = vld [vmem:[%s4009_s8 + $0x170] sm:$0xff]   ;;  %v3046_v39 = vld [vmem:[%s4009_s8 + $0x38] sm:$0xff]  }
  0x24   : > { %s2949_s26 = smul.u32 48, %s3363_s25  ;;  %s3367_s27 = sshll.u32 %s3363_s25, 3  ;;  %v3044_v37 = vld [vmem:[%s4009_s8 + $0x130] sm:$0xff]   ;;  %v3047_v40 = vld [vmem:[%s4009_s8 + $0x178] sm:$0xff]   ;;  %v3049_v42 = vld [vmem:[%s4009_s8 + $0xc0] sm:$0xff]  }
  0x25   : > { %s671_s22 = scalar_lea.vmem %s4047_s21, %s3367_s27  ;;  %s2770_s2 = sshll.u32 %s3363_s25, 4  ;;  %v3048_v41 = vld [vmem:[%s4009_s8 + $0x138] sm:$0xff]  }
  0x26   : > { %s681_s29 = scalar_lea.vmem %s4048_s24, %s2949_s26  ;;  %v3013_v6 = vld [vmem:[%s671_s22] sm:$0xff]   ;;  %s690_s24 = scalar_lea.vmem %s4005_s4, %s3367_s27 }
  0x27   : > { %v3007_v1 = vld [vmem:[%s681_s29 + $0x4] ss:$24 sps:$4 sm:$0xff]   ;;  %v3009_v3 = vld [vmem:[%s681_s29 + $0x14] ss:$24 sps:$4 sm:$0xff]   ;;  %v3011_v4 = vld [vmem:[%s681_s29] ss:$24 sps:$4 sm:$0xff]   ;;  %s694_s21 = scalar_lea.vmem %s4006_s5, %s3367_s27 }
  0x28   : > { %763 = vmatprep.subr.bf16.mxu1 %v3007_v1  ;;  %v3012_v5 = vld [vmem:[%s681_s29 + $0x10] ss:$24 sps:$4 sm:$0xff]   ;;  %849 = vmatprep.subr.bf16.mxu0 %v3009_v3  ;;  %v3016_v7 = vld [vmem:[%s681_s29 + $0xc] ss:$24 sps:$4 sm:$0xff]   ;;  %s2689_s27 = sshll.u32 %s3363_s25, 2 }
  0x29   : > { %s676_s30 = scalar_lea.vmem %s4049_s14, %s2770_s2  ;;  %764 = vmatpush1.bf16.msra.mxu1 %v3011_v4  ;;  %850 = vmatpush1.bf16.msra.mxu0 %v3012_v5  ;;  %v3014_v9 = vld [vmem:[%s681_s29 + $0x8] ss:$24 sps:$4 sm:$0xff]   ;;  %s686_s29 = scalar_lea.vmem %s4004_s3, %s2770_s2 }
  0x2a   : > { %v712_v10 = vld [vmem:[%s676_s30] sm:$0xff]  ;;  %806 = vmatprep.subr.bf16.mxu1 %v3016_v7  ;;  %v713_v13 = vld [vmem:[%s676_s30 + $0x8] sm:$0xff]  ;;  %2772 = vmatprep.subr.bf16.mxu0 %v3017_v2  ;;  %s1836_s30 = sld [smem:[#allocation2]]  ;;  %s702_s0 = scalar_lea.vmem %s4008_s7, %s2689_s27 }
  0x2b   : > { %716 = vperm.xlu0 %3000, %v712_v10   ;;  %v1412_v43 = vld [vmem:[%s686_s29] sm:$0xff]  ;;  %v1413_v44 = vld [vmem:[%s686_s29 + $0x8] sm:$0xff]  ;;  %s4051_s14 = sld [smem:[#allocation10_spill]] }
  0x2c   : > { %2698 = vmatmul.mubr.msk.bf16.vlgmr.msra.gmra.mrb[0].mxu1 %vm759_vm0, %v3013_v6  ;;  %2700 = vmatmul.mubr.msk.bf16.vlgmr.msra.gmra.mrb[0].mxu0 %vm759_vm0, %v3013_v6  ;;  %v3001_v45 = vpack.i.bf16 %v1413_v44, %v1412_v43  ;;  %v3050_v4 = vld [vmem:[%s4009_s8 + $0x80] sm:$0xff]   ;;  %v3051_v5 = vld [vmem:[%s4009_s8 + $0xc8] sm:$0xff]  }
  0x2d   : > { %807 = vmatpush1.bf16.msra.mxu1 %v3014_v9  ;;  %838 = vmatprep.mubr.bf16.mxu1 %v3203_v0  ;;  %v3052_v9 = vld [vmem:[%s4009_s8 + $0x88] sm:$0xff]   ;;  %v2701_v43 = vld [vmem:[%s4010_s9] ss:$0 sm:$0xff] }
  0x2e   : > { %2773 = vmatpush3.bf16.msra.mxu0 %v3018_v8  ;;  %2816 = vmatprep.subr.bf16.mxu1 %v3019_v11 }
  0x2f   : > { %721 = vperm.xlu0 %3000, %v713_v13   ;;  %2774 = vmatprep.subr.bf16.mxu0 %v3021_v12  ;;  %v3053_v13 = vld [vmem:[%s4009_s8 + $0xd0] sm:$0xff]  }
  0x30   : > { %3002 = vrot.lane.b32.xlu1 %v3001_v45, %s3204_s20  ;;  %s698_s20 = scalar_lea.vmem %s4007_s6, %s2689_s27  ;;  %s4050_s27 = sld [smem:[#allocation7_spill]] }
  0x32   : > { %2775 = vmatpush3.bf16.msra.mxu0 %v3022_v14 }
  0x33   : > { %2776 = vmatprep.subr.bf16.mxu0 %v3025_v15 }
  0x34   : > { %2699 = vmatmul.mubr.msk.bf16.vlgmr.msra.gmra.mrb[4].mxu1 %vm759_vm0, %v3013_v6 }
  0x35   : > { %2817 = vmatpush3.bf16.msra.mxu1 %v3020_v16 }
  0x36   : > { %2818 = vmatprep.subr.bf16.mxu1 %v3023_v17  ;;  %2777 = vmatpush3.bf16.msra.mxu0 %v3026_v18  ;;  %v3054_v18 = vld [vmem:[%s4009_s8 + $0x90] sm:$0xff]   ;;  %s664_s29 = sand.u32 1, %s4050_s27  }
  0x37   : > { %2778 = vmatprep.subr.bf16.mxu0 %v3029_v19  ;;  %v3055_v19 = vld [vmem:[%s4009_s8 + $0xd8] sm:$0xff]   ;;  %s2679_s2 = sshll.u32 %s664_s29, 2  ;;  %s2519_s18 = scalar_lea.sflag [#allocation4], %s664_s29 }
  0x38   : > { %s666_s26 = scalar_lea.vmem [#allocation3], %s2679_s2 }
  0x39   : > { %2819 = vmatpush3.bf16.msra.mxu1 %v3024_v20  ;;  %v3056_v20 = vld [vmem:[%s4009_s8 + $0x98] sm:$0xff]   ;;  %s2532_s1 = sshll.u32 %s666_s26, 4  ;;  %s3961_s1 = int_to_ptr.vmem [resolvable:$true] %s2532_s1 }
  0x3a   : > { %2820 = vmatprep.subr.bf16.mxu1 %v3027_v21  ;;  %2779 = vmatpush3.bf16.msra.mxu0 %v3030_v22  ;;  %v3057_v21 = vld [vmem:[%s4009_s8 + $0xe0] sm:$0xff]  }
  0x3b   : > { %2780 = vmatprep.subr.bf16.mxu0 %v3033_v23  ;;  %v3058_v22 = vld [vmem:[%s4009_s8 + $0xa0] sm:$0xff]   ;;  %v3059_v23 = vld [vmem:[%s4009_s8 + $0xe8] sm:$0xff]  }
  0x3d   : > { %2821 = vmatpush3.bf16.msra.mxu1 %v3028_v24  ;;  %v3060_v24 = vld [vmem:[%s4009_s8 + $0xa8] sm:$0xff]  }
  0x3e   : > { %2822 = vmatprep.subr.bf16.mxu1 %v3031_v25  ;;  %2781 = vmatpush3.bf16.msra.mxu0 %v3034_v26  ;;  %v3061_v25 = vld [vmem:[%s4009_s8 + $0xf0] sm:$0xff]  }
  0x3f   : > { %2782 = vmatprep.subr.bf16.mxu0 %v3037_v28  ;;  %v3062_v26 = vld [vmem:[%s4009_s8 + $0xb0] sm:$0xff]   ;;  %v3064_v28 = vld [vmem:[%s4009_s8 + $0xb8] sm:$0xff]  }
  0x41   : > { %2823 = vmatpush3.bf16.msra.mxu1 %v3032_v27  ;;  %v3063_v27 = vld [vmem:[%s4009_s8 + $0xf8] sm:$0xff]  }
  0x42   : > { %2824 = vmatprep.subr.bf16.mxu1 %v3035_v29  ;;  %2783 = vmatpush3.bf16.msra.mxu0 %v3038_v30  ;;  %v3205_v29 = vmov 0.0|0.0   ;;  %v3207_v30 = vmov 0.0  }
  0x43   : > { %2784 = vmatprep.subr.bf16.mxu0 %v3041_v34 }
  0x45   : > { %2825 = vmatpush3.bf16.msra.mxu1 %v3036_v31 }
  0x46   : > { %2826 = vmatprep.subr.bf16.mxu1 %v3039_v32  ;;  %2785 = vmatpush3.bf16.msra.mxu0 %v3042_v35 }
  0x47   : > { %2786 = vmatprep.subr.bf16.mxu0 %v3045_v38 }
  0x49   : > { %2827 = vmatpush3.bf16.msra.mxu1 %v3040_v33 }
  0x4a   : > { %2828 = vmatprep.subr.bf16.mxu1 %v3043_v36  ;;  %2787 = vmatpush3.bf16.msra.mxu0 %v3046_v39 }
  0x4b   : > { %2794 = vmatprep.subr.bf16.mxu0 %v3049_v42 }
  0x4d   : > { %2829 = vmatpush3.bf16.msra.mxu1 %v3044_v37 }
  0x4e   : > { %2830 = vmatprep.subr.bf16.mxu1 %v3047_v40 }
  0x51   : > { %2831 = vmatpush3.bf16.msra.mxu1 %v3048_v41 }
  0x52   : > { %2889 = vmatprep.subr.bf16.mxu1 %v3205_v29 }
  0xaa   : > { %v717_v46 = vpop.permute.xlu0 %716 }
  0xae   : > { %v722_v47 = vpop.permute.xlu0 %721 }
  0xff   : > { %v797_v48 = vpop.f32.mrb[0].mxu1  ;;  %v883_v49 = vpop.f32.mrb[0].mxu0 }
 0x100   : > { %v799_v50 = vpop.f32.mrb[1].mxu1  ;;  %v885_v51 = vpop.f32.mrb[1].mxu0  ;;  %v798_v54 = vadd.f32 %v797_v48, %v717_v46  ;;  %v884_v55 = vadd.f32 %v883_v49, %v717_v46 }
 0x101   : > { %v801_v52 = vpop.f32.mrb[2].mxu1  ;;  %v887_v53 = vpop.f32.mrb[2].mxu0  ;;  %v800_v60 = vadd.f32 %v799_v50, %v717_v46  ;;  %v886_v61 = vadd.f32 %v885_v51, %v717_v46 }
 0x102   : > { %v802_v56 = vadd.f32 %v801_v52, %v722_v47  ;;  %v888_v57 = vadd.f32 %v887_v53, %v722_v47  ;;  %v803_v58 = vpop.f32.mrb[3].mxu1  ;;  %v889_v59 = vpop.f32.mrb[3].mxu0 }
 0x103   : > { %v804_v62 = vadd.f32 %v803_v58, %v722_v47  ;;  %v890_v63 = vadd.f32 %v889_v59, %v722_v47  ;;  %v3003_v50 = vpop.permute.xlu1 %3002 }
 0x104   : > { %v892_v0 = vpack.c.bf16 %v802_v56, %v798_v54  ;;  %v896_v1 = vpack.c.bf16 %v888_v57, %v884_v55  ;;  %v3005_v56 = vunpack.i.h.bf16 %v3003_v50  ;;  %v3004_v57 = vunpack.i.l.bf16 %v3003_v50 }
 0x105   : > { %v893_v2 = vpack.c.bf16 %v804_v62, %v800_v60  ;;  %v897_v3 = vpack.c.bf16 %v890_v63, %v886_v61  ;;  %v1425_v62 = vld [vmem:[%s690_s24] sm:$0xff]  ;;  %s4053_s24 = sld [smem:[#allocation18_spill]] }
 0x106   : > { %v3065_v63 = vld [vmem:[%s4011_s10] sm:$0xff]  }
 0x107   : > { %v840_v6 = vpop.f32.mrb[4].mxu1  ;;  %1321 = vmatprep.mubr.bf16.mxu0 %v893_v2  ;;  %1403 = vmatprep.mubr.bf16.mxu1 %v897_v3 }
 0x108   : > { %v842_v7 = vpop.f32.mrb[5].mxu1  ;;  %1322 = vmatmul.mubr.bf16.vlgmr.msra.gmra.mrb[4].mxu0 %v892_v0  ;;  %1404 = vmatmul.mubr.bf16.vlgmr.msra.gmra.mrb[8].mxu1 %v896_v1  ;;  %v841_v10 = vadd.f32 %v840_v6, %v717_v46  ;;  %v3066_v0 = vld [vmem:[%s4011_s10 + $0x8] sm:$0xff]   ;;  %v3067_v1 = vld [vmem:[%s4011_s10 + $0x10] ss:$0 sps:$4 sm:$0xff]  }
 0x109   : > { %2795 = vmatpush3.bf16.msra.mxu0 %v3050_v4  ;;  %v844_v8 = vpop.f32.mrb[6].mxu1  ;;  %v843_v14 = vadd.f32 %v842_v7, %v717_v46  ;;  %2883 = vmatprep.mubr.msk.f32.mxu1 %vm3206_vm1, %v3207_v30  ;;  %v1526_v2 = vsel %vm1524_vm3, %v3067_v1, 0  ;;  %v3068_v4 = vld [vmem:[%s4012_s11] sm:$0xff]   ;;  %v3069_v7 = vld [vmem:[%s4012_s11 + $0x8] sm:$0xff]  }
 0x10a   : > { %v845_v11 = vadd.f32 %v844_v8, %v722_v47  ;;  %v846_v12 = vpop.f32.mrb[7].mxu1  ;;  %2796 = vmatprep.subr.bf16.mxu0 %v3051_v5  ;;  %v3070_v8 = vld [vmem:[%s4012_s11 + $0x10] ss:$0 sps:$4 sm:$0xff]  }
 0x10b   : > { %v847_v15 = vadd.f32 %v846_v12, %v722_v47  ;;  %v1648_v12 = vlaneseq }
 0x10c   : > { %v894_v16 = vpack.c.bf16 %v845_v11, %v841_v10  ;;  %v3208_v10 = vmov 1966171168  }
 0x10d   : > { %v895_v17 = vpack.c.bf16 %v847_v15, %v843_v14  ;;  %2797 = vmatpush3.bf16.msra.mxu0 %v3052_v9  ;;  %v1600_v9 = vsel %vm1524_vm3, %v3070_v8, 0  ;;  %v1646_v11 = vunpack.c.l.s4 %v3208_v10  ;;  %v3583_v14 = vshrl.u32 %v1648_v12, 7 }
 0x10e   : > { %2798 = vmatprep.subr.bf16.mxu0 %v3053_v13 }
 0x10f   : > { %1362 = vmatprep.mubr.bf16.mxu0 %v895_v17  ;;  %v1647_v13 = vunpack.c.0.s8 %v1646_v11 }
 0x111   : > { %2799 = vmatpush3.bf16.msra.mxu0 %v3054_v18  ;;  %v1650_v15 = vsub.s32 %v1647_v13, %v3583_v14 }
 0x112   : > { %2800 = vmatprep.subr.bf16.mxu0 %v3055_v19 }
 0x115   : > { %2801 = vmatpush3.bf16.msra.mxu0 %v3056_v20 }
 0x116   : > { %2802 = vmatprep.subr.bf16.mxu0 %v3057_v21 }
 0x119   : > { %2803 = vmatpush3.bf16.msra.mxu0 %v3058_v22 }
 0x11a   : > { %2804 = vmatprep.subr.bf16.mxu0 %v3059_v23 }
 0x11d   : > { %2805 = vmatpush3.bf16.msra.mxu0 %v3060_v24 }
 0x11e   : > { %2806 = vmatprep.subr.bf16.mxu0 %v3061_v25 }
 0x121   : > { %2807 = vmatpush3.bf16.msra.mxu0 %v3062_v26 }
 0x122   : > { %2808 = vmatprep.subr.bf16.mxu0 %v3063_v27 }
 0x125   : > { %2809 = vmatpush3.bf16.msra.mxu0 %v3064_v28 }
 0x126   : > { %2886 = vmatprep.subr.bf16.mxu0 %v3205_v29 }
 0x128   : > { %1363 = vmatmul.mubr.bf16.vlgmr.msra.gmra.mrb[8].mxu0 %v894_v16 }
 0x129   : > { %2856 = vmatprep.mubr.msk.f32.mxu0 %vm3206_vm1, %v3207_v30 }
 0x1db   : > { %v2788_v31 = vpop.f32.mrb[4].mxu0  ;;  %v2832_v32 = vpop.f32.mrb[8].mxu1 }
 0x1dc   : > { %v2789_v33 = vpop.f32.mrb[5].mxu0  ;;  %v2833_v34 = vpop.f32.mrb[9].mxu1 }
 0x1dd   : > { %v2790_v35 = vadd.f32 %v2789_v33, %v2788_v31  ;;  %v2834_v36 = vadd.f32 %v2833_v34, %v2832_v32  ;;  %v2791_v37 = vpop.f32.mrb[6].mxu0  ;;  %v2835_v38 = vpop.f32.mrb[10].mxu1 }
 0x1de   : > { %v2792_v39 = vpop.f32.mrb[7].mxu0  ;;  %v2836_v40 = vpop.f32.mrb[11].mxu1 }
 0x1df   : > { %v2793_v41 = vadd.f32 %v2792_v39, %v2791_v37  ;;  %v2837_v42 = vadd.f32 %v2836_v40, %v2835_v38  ;;  %v1324_v46 = vadd.f32 %v2790_v35, %v2701_v43  ;;  %v2755_v35 = vld [vmem:[%s4013_s12] ss:$0 sm:$0xff] }
 0x1e1   : > { %v1327_v51 = vadd.f32 %v2793_v41, %v2701_v43 }
 0x1fb   : > { %v2810_v44 = vpop.f32.mrb[8].mxu0 }
 0x1fc   : > { %v2811_v45 = vpop.f32.mrb[9].mxu0 }
 0x1fd   : > { %v2812_v47 = vadd.f32 %v2811_v45, %v2810_v44  ;;  %v2813_v48 = vpop.f32.mrb[10].mxu0 }
 0x1fe   : > { %v2814_v49 = vpop.f32.mrb[11].mxu0 }
 0x1ff   : > { %v1365_v52 = vadd.f32 %v2812_v47, %v1324_v46  ;;  %v2815_v53 = vadd.f32 %v2814_v49, %v2813_v48 }
 0x201   : > { %v1406_v54 = vadd.f32 %v2834_v36, %v1365_v52  ;;  %v1368_v55 = vadd.f32 %v2815_v53, %v1327_v51 }
 0x203   : > { %v1409_v58 = vadd.f32 %v2837_v42, %v1368_v55  ;;  %v1423_v59 = vsel %vm1422_vm2, %v1406_v54, %v3004_v57 }
 0x205   : > { %v1424_v60 = vsel %vm1422_vm2, %v1409_v58, %v3005_v56 }
 0x206   : > { %v2887_v61 = vpack.c.bf16 %v1424_v60, %v1423_v59 }
 0x208   : > { %2888 = vmatpush3.bf16.msra.mxu0 %v2887_v61  ;;  %2891 = vmatpush3.bf16.msra.mxu1 %v2887_v61 }
 0x209   : > { %2859 = vmatprep.subr.bf16.mxu0 %v3207_v30  ;;  %2904 = vmatprep.subr.bf16.mxu1 %v3205_v29 }
 0x20b   : > { %2857 = vmatmul.mubr.msk.f32.vlgmr.msra.gmra.mrb[12].mxu0 %vm759_vm0, %v1425_v62 }
 0x20c   : > { %2860 = vmatpush3.bf16.msra.mxu0 %v3065_v63  ;;  %2865 = vmatprep.mubr.msk.bf16.mxu0 %vm3206_vm1, %v3207_v30 }
 0x20d   : > { %2861 = vmatprep.subr.bf16.mxu0 %v3207_v30 }
 0x210   : > { %2862 = vmatpush3.bf16.msra.mxu0 %v3066_v0 }
 0x211   : > { %2863 = vmatprep.subr.bf16.mxu0 %v3207_v30 }
 0x214   : > { %2864 = vmatpush3.bf16.msra.mxu0 %v1526_v2  ;;  %v3603_v2 = vld [vmem:[%s4014_s13] ss:$0 sm:$0xff] }
 0x215   : > { %2869 = vmatprep.subr.bf16.mxu0 %v3207_v30 }
 0x2de   : > { %v1495_v3 = vpop.f32.mrb[12].mxu0 }
 0x2df   : > { %v1499_v5 = vpack.c.bf16 %v1495_v3, %v1495_v3  ;;  %v2858_v6 = vpop.f32.mrb[13].mxu0 }
 0x2e1   : > { %2866 = vmatmul.mubr.msk.bf16.vlgmr.msra.gmra.mrb[16].mxu0 %vm1520_vm4, %v1499_v5 }
 0x2e2   : > { %2870 = vmatpush3.bf16.msra.mxu0 %v3068_v4  ;;  %2875 = vmatprep.mubr.msk.bf16.mxu0 %vm3206_vm1, %v3207_v30  ;;  %vm2442_vm1 = vcmask 916480  }
 0x2e3   : > { %2871 = vmatprep.subr.bf16.mxu0 %v3207_v30 }
 0x2e6   : > { %2872 = vmatpush3.bf16.msra.mxu0 %v3069_v7 }
 0x2e7   : > { %2873 = vmatprep.subr.bf16.mxu0 %v3207_v30 }
 0x2ea   : > { %2874 = vmatpush3.bf16.msra.mxu0 %v1600_v9 }
 0x2ed   : > { %2876 = vmatmul.mubr.msk.bf16.vlgmr.msra.gmra.mrb[20].mxu0 %vm1520_vm4, %v2887_v61 }
 0x2ee   : > { %2377 = vmatprep.mubr.f32.mxu0 %v3207_v30  ;;  %v3587_v30 = vsub.s32 0, %v3583_v14 }
 0x3b4   : > { %v1562_v16 = vpop.f32.mrb[16].mxu0 }
 0x3b5   : > { %v1644_v17 = vcombine.high %v1562_v16, %v1562_v16  ;;  %v1651_v18 = vrot.slane %v1562_v16, %v1650_v15  ;;  %v2867_v19 = vpop.f32.mrb[17].mxu0 }
 0x3b6   : > { %v1565_v20 = vpop.f32.mrb[18].mxu0 }
 0x3b7   : > { %v1658_v21 = vrot.slane %v1644_v17, %v1650_v15  ;;  %v1659_v22 = vcombine.high %v1651_v18, %v1651_v18  ;;  %v2868_v23 = vpop.f32.mrb[19].mxu0  ;;  %v1667_v25 = vrot.slane %v1651_v18, %v1650_v15 }
 0x3b9   : > { %v1660_v24 = vcombine.high %v1658_v21, %v1658_v21  ;;  %v1674_v26 = vrot.slane %v1658_v21, %v1650_v15  ;;  %v1681_v27 = vrot.slane %v1659_v22, %v1650_v15  ;;  %v1689_v31 = vcombine.high %v1667_v25, %v1667_v25 }
 0x3ba   : > { %v1696_v36 = vrot.slane %v1667_v25, %v3587_v30 }
 0x3bb   : > { %v1688_v28 = vrot.slane %v1660_v24, %v1650_v15  ;;  %v1690_v32 = vcombine.high %v1674_v26, %v1674_v26  ;;  %v1691_v33 = vcombine.high %v1681_v27, %v1681_v27  ;;  %v1700_v38 = vrot.slane %v1681_v27, %v3587_v30 }
 0x3bc   : > { %v1704_v39 = vrot.slane %v1689_v31, %v3587_v30  ;;  %v1712_v40 = vrot.slane %v1674_v26, %v3587_v30 }
 0x3bd   : > { %v1692_v34 = vcombine.high %v1688_v28, %v1688_v28  ;;  %v1708_v43 = vrot.slane %v1691_v33, %v3587_v30  ;;  %v1716_v44 = vrot.slane %v1688_v28, %v3587_v30  ;;  %v1720_v45 = vrot.slane %v1690_v32, %v3587_v30 }
 0x3bf   : > { %v1724_v46 = vrot.slane %v1692_v34, %v3587_v30 }
 0x3c0   : > { %v1636_v37 = vpop.f32.mrb[20].mxu0 }
 0x3c1   : > { %v1637_v41 = vadd.f32 %v2755_v35, %v1636_v37  ;;  %v2877_v42 = vpop.f32.mrb[21].mxu0 }
 0x3c2   : > { %v1639_v47 = vpop.f32.mrb[22].mxu0 }
 0x3c3   : > { %v1640_v48 = vadd.f32 %v2755_v35, %v1639_v47  ;;  %v2878_v49 = vpop.f32.mrb[23].mxu0  ;;  %v1735_v50 = vadd.f32 %v1700_v38, %v1637_v41  ;;  %v1733_v51 = vadd.f32 %v1696_v36, %v1637_v41  ;;  %v1737_v52 = vadd.f32 %v1704_v39, %v1637_v41 }
 0x3c4   : > { %v1739_v53 = vadd.f32 %v1708_v43, %v1637_v41  ;;  %v1741_v54 = vadd.f32 %v1712_v40, %v1637_v41  ;;  %v1743_v55 = vadd.f32 %v1716_v44, %v1637_v41  ;;  %v1745_v56 = vadd.f32 %v1720_v45, %v1637_v41 }
 0x3c5   : > { %3071 = vtanh.f32 %v1735_v50  ;;  %v1736_v57 = vadd.f32 %v1700_v38, %v1640_v48  ;;  %v1738_v58 = vadd.f32 %v1704_v39, %v1640_v48  ;;  %v1740_v59 = vadd.f32 %v1708_v43, %v1640_v48 }
 0x3c6   : > { %3073 = vtanh.f32 %v1733_v51  ;;  %v1742_v60 = vadd.f32 %v1712_v40, %v1640_v48  ;;  %v1744_v61 = vadd.f32 %v1716_v44, %v1640_v48  ;;  %v1734_v62 = vadd.f32 %v1696_v36, %v1640_v48 }
 0x3c7   : > { %3075 = vtanh.f32 %v1737_v52  ;;  %v1746_v63 = vadd.f32 %v1720_v45, %v1640_v48  ;;  %v1748_v0 = vadd.f32 %v1724_v46, %v1640_v48  ;;  %v1747_v1 = vadd.f32 %v1724_v46, %v1637_v41 }
 0x3c8   : > { %3077 = vtanh.f32 %v1736_v57 }
 0x3c9   : > { %3079 = vtanh.f32 %v1739_v53 }
 0x3ca   : > { %3081 = vtanh.f32 %v1738_v58 }
 0x3cb   : > { %3083 = vtanh.f32 %v1741_v54 }
 0x3cc   : > { %3085 = vtanh.f32 %v1740_v59 }
 0x3cd   : > { %3087 = vtanh.f32 %v1743_v55 }
 0x3ce   : > { %3089 = vtanh.f32 %v1742_v60 }
 0x3cf   : > { %v3072_v3 = vpop.eup %3071  ;;  %3091 = vtanh.f32 %v1734_v62 }
 0x3d0   : > { %v3074_v4 = vpop.eup %3073  ;;  %v1774_v5 = vmul.f32 %v3072_v3, %v3603_v2  ;;  %3093 = vtanh.f32 %v1744_v61  ;;  %v1871_v61 = vand.u32 127, %v1648_v12 }
 0x3d1   : > { %v3076_v6 = vpop.eup %3075  ;;  %v1772_v7 = vmul.f32 %v3074_v4, %v3603_v2  ;;  %3095 = vtanh.f32 %v1745_v56 }
 0x3d2   : > { %v3078_v8 = vpop.eup %3077  ;;  %v1794_v9 = vsel %vm1520_vm4, %v1774_v5, 0.0  ;;  %v1776_v10 = vmul.f32 %v3076_v6, %v3603_v2  ;;  %3097 = vtanh.f32 %v1746_v63  ;;  %v1876_v62 = vadd.s32 4294967288, %v1871_v61 }
 0x3d3   : > { %v3080_v11 = vpop.eup %3079  ;;  %1795 = vadd.xlane.f32.xlu0 %v1794_v9  ;;  %v1788_v13 = vsel %vm1520_vm4, %v1772_v7, 0.0  ;;  %v1775_v15 = vmul.f32 %v3078_v8, %v3603_v2  ;;  %3099 = vtanh.f32 %v1747_v1  ;;  %v1837_v1 = vstv %s1836_s30  ;;  %s3212_s30 = smov 48  }
 0x3d4   : > { %v3082_v16 = vpop.eup %3081  ;;  %1789 = vadd.xlane.f32.xlu1 %v1788_v13  ;;  %v1800_v17 = vsel %vm1520_vm4, %v1776_v10, 0.0  ;;  %v1778_v18 = vmul.f32 %v3080_v11, %v3603_v2  ;;  %3101 = vtanh.f32 %v1748_v0  ;;  %v3646_v7 = vsub.s32 %v1871_v61, %v3583_v14 }
 0x3d5   : > { %v3084_v19 = vpop.eup %3083  ;;  %v1797_v20 = vsel %vm1520_vm4, %v1775_v15, 0.0  ;;  %v1777_v21 = vmul.f32 %v3082_v16, %v3603_v2 }
 0x3d6   : > { %v3086_v22 = vpop.eup %3085  ;;  %v1806_v23 = vsel %vm1520_vm4, %v1778_v18, 0.0  ;;  %v1780_v24 = vmul.f32 %v3084_v19, %v3603_v2 }
 0x3d7   : > { %1801 = vadd.xlane.f32.xlu0 %v1800_v17  ;;  %v3088_v25 = vpop.eup %3087  ;;  %v1803_v26 = vsel %vm1520_vm4, %v1777_v21, 0.0  ;;  %v1779_v27 = vmul.f32 %v3086_v22, %v3603_v2 }
 0x3d8   : > { %1798 = vadd.xlane.f32.xlu1 %v1797_v20  ;;  %v3090_v28 = vpop.eup %3089  ;;  %v1812_v31 = vsel %vm1520_vm4, %v1780_v24, 0.0  ;;  %v1782_v32 = vmul.f32 %v3088_v25, %v3603_v2 }
 0x3d9   : > { %v3092_v33 = vpop.eup %3091  ;;  %v1809_v34 = vsel %vm1520_vm4, %v1779_v27, 0.0  ;;  %v1781_v35 = vmul.f32 %v3090_v28, %v3603_v2 }
 0x3da   : > { %v3094_v36 = vpop.eup %3093  ;;  %v1818_v37 = vsel %vm1520_vm4, %v1782_v32, 0.0  ;;  %v1773_v38 = vmul.f32 %v3092_v33, %v3603_v2 }
 0x3db   : > { %1807 = vadd.xlane.f32.xlu0 %v1806_v23  ;;  %v3096_v39 = vpop.eup %3095  ;;  %v1815_v40 = vsel %vm1520_vm4, %v1781_v35, 0.0  ;;  %v1783_v41 = vmul.f32 %v3094_v36, %v3603_v2 }
 0x3dc   : > { %1804 = vadd.xlane.f32.xlu1 %v1803_v26  ;;  %v3098_v42 = vpop.eup %3097  ;;  %v1791_v43 = vsel %vm1520_vm4, %v1773_v38, 0.0  ;;  %v1784_v44 = vmul.f32 %v3096_v39, %v3603_v2 }
 0x3dd   : > { %v3100_v45 = vpop.eup %3099  ;;  %v1821_v46 = vsel %vm1520_vm4, %v1783_v41, 0.0  ;;  %v1785_v47 = vmul.f32 %v3098_v42, %v3603_v2 }
 0x3de   : > { %v3102_v48 = vpop.eup %3101  ;;  %v1824_v49 = vsel %vm1520_vm4, %v1784_v44, 0.0  ;;  %v1786_v50 = vmul.f32 %v3100_v45, %v3603_v2 }
 0x3df   : > { %1813 = vadd.xlane.f32.xlu0 %v1812_v31  ;;  %v1827_v51 = vsel %vm1520_vm4, %v1785_v47, 0.0  ;;  %v1787_v52 = vmul.f32 %v3102_v48, %v3603_v2  ;;  %v3639_v2 = vsub.s32 %v1876_v62, %v3583_v14 }
 0x3e0   : > { %1810 = vadd.xlane.f32.xlu1 %v1809_v34  ;;  %v1830_v53 = vsel %vm1520_vm4, %v1786_v50, 0.0 }
 0x3e1   : > { %v1833_v54 = vsel %vm1520_vm4, %v1787_v52, 0.0 }
 0x3e3   : > { %1819 = vadd.xlane.f32.xlu0 %v1818_v37 }
 0x3e4   : > { %1816 = vadd.xlane.f32.xlu1 %v1815_v40 }
 0x3e7   : > { %1792 = vadd.xlane.f32.xlu0 %v1791_v43 }
 0x3e8   : > { %1822 = vadd.xlane.f32.xlu1 %v1821_v46 }
 0x3eb   : > { %1825 = vadd.xlane.f32.xlu0 %v1824_v49 }
 0x3ec   : > { %1828 = vadd.xlane.f32.xlu1 %v1827_v51 }
 0x3ef   : > { %1831 = vadd.xlane.f32.xlu0 %v1830_v53 }
 0x3f0   : > { %1834 = vadd.xlane.f32.xlu1 %v1833_v54 }
 0x460   : > { %v1796_v55 = vpop.xlane.xlu0 %1795 }
 0x461   : > { %v1790_v56 = vpop.xlane.xlu1 %1789  ;;  %v3648_v8 = vadd.f32 %v1837_v1, %v1796_v55 }
 0x462   : > { %v3650_v9 = vadd.f32 %v1837_v1, %v1790_v56 }
 0x463   : > { %v1886_v20 = vrot.slane %v3648_v8, %v3646_v7 }
 0x464   : > { %v1802_v57 = vpop.xlane.xlu0 %1801  ;;  %v1875_v23 = vrot.slane %v3650_v9, %v3646_v7 }
 0x465   : > { %v1799_v58 = vpop.xlane.xlu1 %1798  ;;  %v3652_v12 = vadd.f32 %v1837_v1, %v1802_v57 }
 0x466   : > { %v3641_v3 = vadd.f32 %v1837_v1, %v1799_v58 }
 0x467   : > { %v1895_v24 = vrot.slane %v3652_v12, %v3646_v7 }
 0x468   : > { %v1808_v59 = vpop.xlane.xlu0 %1807  ;;  %v1890_v11 = vrot.slane %v3641_v3, %v3639_v2 }
 0x469   : > { %v1805_v60 = vpop.xlane.xlu1 %1804  ;;  %v3660_v16 = vadd.f32 %v1837_v1, %v1808_v59 }
 0x46a   : > { %v3643_v5 = vadd.f32 %v1837_v1, %v1805_v60  ;;  %v1891_v27 = vsel %vm1881_vm5, %v1890_v11, %v1886_v20 }
 0x46b   : > { %v1904_v33 = vrot.slane %v3660_v16, %v3646_v7 }
 0x46c   : > { %v1814_v63 = vpop.xlane.xlu0 %1813  ;;  %v1899_v17 = vrot.slane %v3643_v5, %v3639_v2 }
 0x46d   : > { %v1811_v0 = vpop.xlane.xlu1 %1810  ;;  %v3666_v21 = vadd.f32 %v1837_v1, %v1814_v63  ;;  %v1977_v63 = vsub.s32 2, %v3583_v14 }
 0x46e   : > { %v3654_v10 = vadd.f32 %v1837_v1, %v1811_v0  ;;  %v1900_v34 = vsel %vm1881_vm5, %v1899_v17, %v1895_v24  ;;  %v1973_v0 = vsub.s32 1, %v3583_v14 }
 0x46f   : > { %v1913_v38 = vrot.slane %v3666_v21, %v3646_v7 }
 0x470   : > { %v1820_v4 = vpop.xlane.xlu0 %1819  ;;  %v1908_v25 = vrot.slane %v3654_v10, %v3639_v2 }
 0x471   : > { %v1817_v6 = vpop.xlane.xlu1 %1816  ;;  %v3678_v28 = vadd.f32 %v1837_v1, %v1820_v4 }
 0x472   : > { %v3658_v13 = vadd.f32 %v1837_v1, %v1817_v6  ;;  %v1909_v42 = vsel %vm1881_vm5, %v1908_v25, %v1904_v33  ;;  %v1981_v6 = vsub.s32 3, %v3583_v14 }
 0x473   : > { %v1922_v45 = vrot.slane %v3678_v28, %v3646_v7 }
 0x474   : > { %v1793_v15 = vpop.xlane.xlu0 %1792  ;;  %v1917_v31 = vrot.slane %v3658_v13, %v3639_v2 }
 0x475   : > { %v1823_v18 = vpop.xlane.xlu1 %1822  ;;  %v1839_v19 = vadd.f32 %v1837_v1, %v1793_v15 }
 0x476   : > { %v3668_v22 = vadd.f32 %v1837_v1, %v1823_v18  ;;  %v1918_v46 = vsel %vm1881_vm5, %v1917_v31, %v1913_v38  ;;  %v1985_v18 = vsub.s32 4, %v3583_v14 }
 0x477   : > { %v1880_v26 = vrot.slane %v1839_v19, %v3639_v2 }
 0x478   : > { %v1826_v32 = vpop.xlane.xlu0 %1825  ;;  %v1926_v39 = vrot.slane %v3668_v22, %v3639_v2 }
 0x479   : > { %v1882_v35 = vsel %vm1881_vm5, %v1880_v26, %v1875_v23  ;;  %v1829_v36 = vpop.xlane.xlu1 %1828  ;;  %v3686_v37 = vadd.f32 %v1837_v1, %v1826_v32  ;;  %v1989_v32 = vsub.s32 5, %v3583_v14 }
 0x47a   : > { %v1947_v40 = vsel %vm1946_vm6, %v1891_v27, %v1882_v35  ;;  %v3693_v41 = vadd.f32 %v1837_v1, %v1829_v36  ;;  %v1927_v53 = vsel %vm1881_vm5, %v1926_v39, %v1922_v45 }
 0x47b   : > { %v1949_v43 = vsel %vm1948_vm7, %v1900_v34, %v1947_v40  ;;  %v1931_v44 = vrot.slane %v3686_v37, %v3646_v7 }
 0x47c   : > { %v1935_v47 = vrot.slane %v3693_v41, %v3639_v2  ;;  %v1832_v48 = vpop.xlane.xlu0 %1831  ;;  %v1951_v49 = vsel %vm1950_vm8, %v1909_v42, %v1949_v43 }
 0x47d   : > { %v1835_v50 = vpop.xlane.xlu1 %1834  ;;  %v3705_v51 = vadd.f32 %v1837_v1, %v1832_v48  ;;  %v1953_v52 = vsel %vm1952_vm9, %v1918_v46, %v1951_v49 }
 0x47e   : > { %v3709_v54 = vadd.f32 %v1837_v1, %v1835_v50  ;;  %v1936_v56 = vsel %vm1881_vm5, %v1935_v47, %v1931_v44  ;;  %v1955_v57 = vsel %vm1954_vm10, %v1927_v53, %v1953_v52 }
 0x47f   : > { %v1940_v55 = vrot.slane %v3705_v51, %v3646_v7  ;;  %v1957_v60 = vsel %vm1956_vm11, %v1936_v56, %v1955_v57 }
 0x480   : > { %v1944_v58 = vrot.slane %v3709_v54, %v3639_v2 }
 0x482   : > { %v1945_v59 = vsel %vm1881_vm5, %v1944_v58, %v1940_v55 }
 0x483   : > { %v1959_v61 = vsel %vm1958_vm12, %v1945_v59, %v1957_v60 }
 0x484   : > { %v1961_v62 = vsel %vm759_vm0, %v1959_v61, -inf }
 0x485   : > { %1962 = vmax.xlane.f32.xlu0 %v1961_v62 }
 0x512   : > { %v1963_v1 = vpop.xlane.xlu0 %1962 }
 0x513   : > { %v3723_v4 = vmax.f32 %v1963_v1, 0.0 }
 0x515   : > { %v1970_v11 = vrot.slane %v3723_v4, %v3587_v30  ;;  %v1978_v15 = vrot.slane %v3723_v4, %v1977_v63  ;;  %v1974_v17 = vrot.slane %v3723_v4, %v1973_v0  ;;  %v1982_v25 = vrot.slane %v3723_v4, %v1981_v6 }
 0x516   : > { %v1986_v34 = vrot.slane %v3723_v4, %v1985_v18  ;;  %v1990_v36 = vrot.slane %v3723_v4, %v1989_v32 }
 0x517   : > { %v2008_v20 = vsub.f32 %v1839_v19, %v1970_v11  ;;  %v2007_v23 = vsub.f32 %v3650_v9, %v1970_v11  ;;  %v2011_v24 = vsub.f32 %v3652_v12, %v1978_v15  ;;  %v2009_v26 = vsub.f32 %v3648_v8, %v1974_v17 }
 0x518   : > { %v2013_v33 = vsub.f32 %v3660_v16, %v1982_v25  ;;  %v2010_v9 = vsub.f32 %v3641_v3, %v1974_v17  ;;  %v1993_v12 = vsub.s32 6, %v3583_v14  ;;  %v2015_v8 = vsub.f32 %v3666_v21, %v1986_v34 }
 0x519   : > { %v2025_v27 = vmul.f32 1.442695, %v2008_v20  ;;  %v2023_v31 = vmul.f32 1.442695, %v2007_v23  ;;  %v2031_v30 = vmul.f32 1.442695, %v2011_v24  ;;  %v2012_v39 = vsub.f32 %v3643_v5, %v1978_v15 }
 0x51a   : > { %v2027_v19 = vmul.f32 1.442695, %v2009_v26  ;;  %v2035_v35 = vmul.f32 1.442695, %v2013_v33  ;;  %v2029_v38 = vmul.f32 1.442695, %v2010_v9  ;;  %v2017_v42 = vsub.f32 %v3678_v28, %v1990_v36 }
 0x51b   : > { %3103 = vpow2.f32 %v2025_v27  ;;  %v1997_v16 = vsub.s32 7, %v3583_v14  ;;  %v2039_v40 = vmul.f32 1.442695, %v2015_v8  ;;  %v1994_v3 = vrot.slane %v3723_v4, %v1993_v12 }
 0x51c   : > { %3105 = vpow2.f32 %v2023_v31  ;;  %v2033_v43 = vmul.f32 1.442695, %v2012_v39  ;;  %v2014_v44 = vsub.f32 %v3654_v10, %v1982_v25  ;;  %v2043_v46 = vmul.f32 1.442695, %v2017_v42 }
 0x51d   : > { %3107 = vpow2.f32 %v2031_v30  ;;  %v2019_v5 = vsub.f32 %v3686_v37, %v1994_v3  ;;  %v1998_v14 = vrot.slane %v3723_v4, %v1997_v16  ;;  %v2016_v28 = vsub.f32 %v3658_v13, %v1986_v34 }
 0x51e   : > { %3109 = vpow2.f32 %v2027_v19  ;;  %v2037_v47 = vmul.f32 1.442695, %v2014_v44  ;;  %v2018_v53 = vsub.f32 %v3668_v22, %v1990_v36  ;;  %v2020_v57 = vsub.f32 %v3693_v41, %v1994_v3 }
 0x51f   : > { %3111 = vpow2.f32 %v2035_v35  ;;  %v2047_v10 = vmul.f32 1.442695, %v2019_v5  ;;  %v2021_v50 = vsub.f32 %v3705_v51, %v1998_v14  ;;  %v2041_v52 = vmul.f32 1.442695, %v2016_v28 }
 0x520   : > { %3113 = vpow2.f32 %v2029_v38  ;;  %v2045_v13 = vmul.f32 1.442695, %v2018_v53  ;;  %v2049_v51 = vmul.f32 1.442695, %v2020_v57  ;;  %v2022_v60 = vsub.f32 %v3709_v54, %v1998_v14 }
 0x521   : > { %3115 = vpow2.f32 %v2039_v40  ;;  %v2051_v56 = vmul.f32 1.442695, %v2021_v50 }
 0x522   : > { %3117 = vpow2.f32 %v2033_v43  ;;  %v2053_v62 = vmul.f32 1.442695, %v2022_v60  ;;  %v2296_v60 = vld [vmem:[%s4016_s15] sm:$0xff] }
 0x523   : > { %3119 = vpow2.f32 %v2043_v46 }
 0x524   : > { %3121 = vpow2.f32 %v2037_v47 }
 0x525   : > { %v3104_v45 = vpop.eup %3103  ;;  %3123 = vpow2.f32 %v2047_v10 }
 0x526   : > { %v3106_v21 = vpop.eup %3105  ;;  %2075 = vperm.xlu0 %3000, %v3104_v45   ;;  %3125 = vpow2.f32 %v2041_v52 }
 0x527   : > { %2072 = vperm.xlu1 %3006, %v3106_v21   ;;  %v3108_v48 = vpop.eup %3107  ;;  %3127 = vpow2.f32 %v2051_v56  ;;  %v1965_v56 = vld [vmem:[%s694_s21] sm:$0xff] }
 0x528   : > { %v3110_v49 = vpop.eup %3109  ;;  %3129 = vpow2.f32 %v2045_v13 }
 0x529   : > { %v3112_v55 = vpop.eup %3111  ;;  %3131 = vpow2.f32 %v2049_v51 }
 0x52a   : > { %2084 = vperm.xlu0 %3000, %v3108_v48   ;;  %v3114_v37 = vpop.eup %3113  ;;  %3133 = vpow2.f32 %v2053_v62  ;;  %v2301_v62 = vld [vmem:[%s4016_s15 + $0x28] sm:$0xff] }
 0x52b   : > { %2078 = vperm.xlu1 %3006, %v3110_v49   ;;  %v3116_v58 = vpop.eup %3115 }
 0x52c   : > { %v3118_v59 = vpop.eup %3117 }
 0x52d   : > { %v3120_v22 = vpop.eup %3119 }
 0x52e   : > { %2090 = vperm.xlu0 %3000, %v3112_v55   ;;  %v3122_v61 = vpop.eup %3121 }
 0x52f   : > { %2081 = vperm.xlu1 %3006, %v3114_v37   ;;  %v3124_v63 = vpop.eup %3123 }
 0x530   : > { %v3126_v0 = vpop.eup %3125 }
 0x531   : > { %v3128_v41 = vpop.eup %3127 }
 0x532   : > { %2096 = vperm.xlu0 %3000, %v3116_v58   ;;  %v3130_v1 = vpop.eup %3129 }
 0x533   : > { %2087 = vperm.xlu1 %3006, %v3118_v59   ;;  %v3132_v6 = vpop.eup %3131 }
 0x534   : > { %v3134_v11 = vpop.eup %3133 }
 0x536   : > { %2102 = vperm.xlu0 %3000, %v3120_v22  }
 0x537   : > { %2093 = vperm.xlu1 %3006, %v3122_v61   ;;  %v2298_v61 = vld [vmem:[%s4016_s15 + $0x10] sm:$0xff] }
 0x53a   : > { %2108 = vperm.xlu0 %3000, %v3124_v63   ;;  %v2303_v63 = vld [vmem:[%s4016_s15 + $0x38] sm:$0xff] }
 0x53b   : > { %2099 = vperm.xlu1 %3006, %v3126_v0   ;;  %v2283_v0 = vld [vmem:[%s698_s20] sm:$0xf]  ;;  %s3211_s20 = smov 16  }
 0x53e   : > { %2114 = vperm.xlu0 %3000, %v3128_v41   ;;  %v2894_v41 = vpack.c.bf16 %v2298_v61, %v2296_v60  ;;  %v2426_v61 = vld [vmem:[%s4017_s16 + $0xa8] sm:$0xff] }
 0x53f   : > { %2105 = vperm.xlu1 %3006, %v3130_v1   ;;  %v2896_v1 = vpack.c.bf16 %v2303_v63, %v2301_v62  ;;  %v2427_v63 = vld [vmem:[%s4017_s16 + $0xb0] sm:$0xff] }
 0x543   : > { %2111 = vperm.xlu1 %3006, %v3132_v6   ;;  %v2300_v6 = vld [vmem:[%s4016_s15 + $0x20] sm:$0xff] }
 0x547   : > { %2117 = vperm.xlu1 %3006, %v3134_v11   ;;  %v2285_v11 = vrot.slane %v2283_v0, 4  ;;  %v2428_v0 = vld [vmem:[%s4017_s16 + $0xb8] sm:$0xff] }
 0x54b   : > { %2286 = vrot.lane.b32.xlu1 %v2285_v11, %s3209_s17 }
 0x5a5   : > { %v2076_v54 = vpop.permute.xlu0 %2075 }
 0x5a6   : > { %v2073_v15 = vpop.permute.xlu1 %2072  ;;  %v2126_v19 = vrot.slane %v2076_v54, %v3639_v2  ;;  %v2302_v54 = vld [vmem:[%s4016_s15 + $0x30] sm:$0xff] }
 0x5a7   : > { %v2122_v9 = vrot.slane %v2073_v15, %v3646_v7  ;;  %v2898_v15 = vpack.c.bf16 %v2302_v54, %v2300_v6  ;;  %v2430_v6 = vld [vmem:[%s4017_s16 + $0xc8] sm:$0xff]  ;;  %v2431_v54 = vld [vmem:[%s4017_s16 + $0xd0] sm:$0xff] }
 0x5a9   : > { %v2085_v17 = vpop.permute.xlu0 %2084  ;;  %v2127_v43 = vsel %vm1881_vm5, %v2126_v19, %v2122_v9 }
 0x5aa   : > { %v2079_v18 = vpop.permute.xlu1 %2078  ;;  %v2140_v8 = vrot.slane %v2085_v17, %v3646_v7  ;;  %v2290_v17 = vld [vmem:[%s702_s0] sm:$0xf] }
 0x5ab   : > { %v2131_v12 = vrot.slane %v2079_v18, %v3646_v7  ;;  %2292 = vrot.lane.b32.xlu1 %v2290_v17, %s3209_s17  ;;  %v2203_v18 = vsub.f32 0.0, %v3723_v4  ;;  %v2304_v4 = vld [vmem:[%s4016_s15 + $0x40] sm:$0xff]  ;;  %s3214_s17 = smov [#allocation3]  }
 0x5ac   : > { %s3143_s27 = sshll.u32 %s3214_s17, 4  ;;  %s3144_s27 = int_to_ptr.vmem [resolvable:$false] %s3143_s27 }
 0x5ad   : > { %v2091_v20 = vpop.permute.xlu0 %2090  ;;  %p3146_p0 = scmp.lt.s32.totalorder %s3961_s1, %s3144_s27 }
 0x5ae   : > { %v2082_v23 = vpop.permute.xlu1 %2081  ;;  %v2149_v38 = vrot.slane %v2091_v20, %v3646_v7  ;;  %v2204_v20 = vmul.f32 1.442695, %v2203_v18  ;;  %v2433_v18 = vld [vmem:[%s4017_s16 + $0xe0] sm:$0xff] }
 0x5af   : > { %v2135_v32 = vrot.slane %v2082_v23, %v3639_v2 }
 0x5b0   : > { %3135 = vpow2.f32 %v2204_v20  ;;  %v2434_v20 = vld [vmem:[%s4017_s16 + $0xe8] sm:$0xff] }
 0x5b1   : > { %v2097_v24 = vpop.permute.xlu0 %2096  ;;  %v2136_v39 = vsel %vm1881_vm5, %v2135_v32, %v2131_v12  ;;  %v2305_v32 = vld [vmem:[%s4016_s15 + $0x48] sm:$0xff] }
 0x5b2   : > { %v2088_v25 = vpop.permute.xlu1 %2087  ;;  %v2158_v40 = vrot.slane %v2097_v24, %v3646_v7  ;;  %v2191_v46 = vsel %vm1946_vm6, %v2136_v39, %v2127_v43 }
 0x5b3   : > { %v2144_v30 = vrot.slane %v2088_v25, %v3639_v2 }
 0x5b5   : > { %v2103_v27 = vpop.permute.xlu0 %2102  ;;  %v2145_v42 = vsel %vm1881_vm5, %v2144_v30, %v2140_v8  ;;  %v2307_v30 = vld [vmem:[%s4016_s15 + $0x58] sm:$0xff]  ;;  %v2405_v8 = vld [vmem:[%s4017_s16] sm:$0xff] }
 0x5b6   : > { %v2094_v26 = vpop.permute.xlu1 %2093  ;;  %v2167_v44 = vrot.slane %v2103_v27, %v3646_v7  ;;  %v2192_v28 = vsel %vm1948_vm7, %v2145_v42, %v2191_v46 }
 0x5b7   : > { %v2153_v35 = vrot.slane %v2094_v26, %v3639_v2 }
 0x5b9   : > { %v2109_v33 = vpop.permute.xlu0 %2108  ;;  %v2154_v45 = vsel %vm1881_vm5, %v2153_v35, %v2149_v38  ;;  %v2407_v38 = vld [vmem:[%s4017_s16 + $0x10] sm:$0xff] }
 0x5ba   : > { %v2100_v31 = vpop.permute.xlu1 %2099  ;;  %v2176_v5 = vrot.slane %v2109_v33, %v3646_v7  ;;  %v2193_v49 = vsel %vm1950_vm8, %v2154_v45, %v2192_v28  ;;  %v3136_v23 = vpop.eup %3135  ;;  %v2900_v33 = vpack.c.bf16 %v2307_v30, %v2305_v32  ;;  %v2409_v45 = vld [vmem:[%s4017_s16 + $0x20] sm:$0xff] }
 0x5bb   : > { %v2162_v36 = vrot.slane %v2100_v31, %v3639_v2  ;;  %v2206_v24 = vmul.f32 1e-05, %v3136_v23  ;;  %v2413_v28 = vld [vmem:[%s4017_s16 + $0x40] sm:$0xff]  ;;  %v2947_v23 = vpack.c.bf16 %v2434_v20, %v2433_v18 }
 0x5bd   : > { %v2163_v14 = vsel %vm1881_vm5, %v2162_v36, %v2158_v40  ;;  %v2115_v47 = vpop.permute.xlu0 %2114  ;;  %v2406_v36 = vld [vmem:[%s4017_s16 + $0x8] sm:$0xff] }
 0x5be   : > { %v2106_v34 = vpop.permute.xlu1 %2105  ;;  %v2194_v52 = vsel %vm1952_vm9, %v2163_v14, %v2193_v49  ;;  %v2185_v53 = vrot.slane %v2115_v47, %v3646_v7  ;;  %v2297_v7 = vld [vmem:[%s4016_s15 + $0x8] sm:$0xff]  ;;  %v2905_v42 = vpack.c.bf16 %v2406_v36, %v2405_v8  ;;  %v2412_v14 = vld [vmem:[%s4017_s16 + $0x38] sm:$0xff] }
 0x5bf   : > { %v2171_v16 = vrot.slane %v2106_v34, %v3639_v2  ;;  %v2306_v34 = vld [vmem:[%s4016_s15 + $0x50] sm:$0xff] }
 0x5c0   : > { %v2902_v19 = vpack.c.bf16 %v2306_v34, %v2304_v4 }
 0x5c1   : > { %v2172_v48 = vsel %vm1881_vm5, %v2171_v16, %v2167_v44 }
 0x5c2   : > { %v2112_v3 = vpop.permute.xlu1 %2111  ;;  %v2195_v37 = vsel %vm1954_vm10, %v2172_v48, %v2194_v52  ;;  %v2414_v48 = vld [vmem:[%s4017_s16 + $0x48] sm:$0xff] }
 0x5c3   : > { %v2180_v21 = vrot.slane %v2112_v3, %v3639_v2  ;;  %v2408_v3 = vld [vmem:[%s4017_s16 + $0x18] sm:$0xff]  ;;  %v2917_v49 = vpack.c.bf16 %v2414_v48, %v2413_v28 }
 0x5c4   : > { %v2908_v44 = vpack.c.bf16 %v2408_v3, %v2407_v38 }
 0x5c5   : > { %v2181_v10 = vsel %vm1881_vm5, %v2180_v21, %v2176_v5  ;;  %v2410_v21 = vld [vmem:[%s4017_s16 + $0x28] sm:$0xff]  ;;  %v2411_v5 = vld [vmem:[%s4017_s16 + $0x30] sm:$0xff] }
 0x5c6   : > { %v2118_v50 = vpop.permute.xlu1 %2117  ;;  %v2196_v57 = vsel %vm1956_vm11, %v2181_v10, %v2195_v37  ;;  %v2911_v46 = vpack.c.bf16 %v2410_v21, %v2409_v45  ;;  %v2914_v47 = vpack.c.bf16 %v2412_v14, %v2411_v5  ;;  %v2415_v10 = vld [vmem:[%s4017_s16 + $0x50] sm:$0xff] }
 0x5c7   : > { %v2189_v55 = vrot.slane %v2118_v50, %v3639_v2  ;;  %v2299_v2 = vld [vmem:[%s4016_s15 + $0x18] sm:$0xff] }
 0x5c8   : > { %v2892_v22 = vpack.c.bf16 %v2299_v2, %v2297_v7  ;;  %v2416_v50 = vld [vmem:[%s4017_s16 + $0x58] sm:$0xff]  ;;  %v2423_v7 = vld [vmem:[%s4017_s16 + $0x90] sm:$0xff] }
 0x5c9   : > { %v2190_v13 = vsel %vm1881_vm5, %v2189_v55, %v2185_v53  ;;  %v2920_v52 = vpack.c.bf16 %v2416_v50, %v2415_v10  ;;  %v2417_v53 = vld [vmem:[%s4017_s16 + $0x60] sm:$0xff]  ;;  %v2418_v55 = vld [vmem:[%s4017_s16 + $0x68] sm:$0xff]  ;;  %v2424_v2 = vld [vmem:[%s4017_s16 + $0x98] sm:$0xff] }
 0x5ca   : > { %v2197_v58 = vsel %vm1958_vm12, %v2190_v13, %v2196_v57  ;;  %2893 = vmatprep.subr.bf16.mxu0 %v2892_v22  ;;  %v2287_v9 = vpop.permute.xlu1 %2286  ;;  %v2923_v37 = vpack.c.bf16 %v2418_v55, %v2417_v53  ;;  %v2420_v13 = vld [vmem:[%s4017_s16 + $0x78] sm:$0xff]  ;;  %v2932_v60 = vpack.c.bf16 %v2424_v2, %v2423_v7  ;;  %v2425_v22 = vld [vmem:[%s4017_s16 + $0xa0] sm:$0xff] }
 0x5cb   : > { %v2199_v59 = vmul.f32 %v2197_v58, %v1965_v56  ;;  %2895 = vmatpush1.bf16.msra.mxu0 %v2894_v41  ;;  %v2419_v56 = vld [vmem:[%s4017_s16 + $0x70] sm:$0xff]  ;;  %v2421_v58 = vld [vmem:[%s4017_s16 + $0x80] sm:$0xff]  ;;  %v2935_v62 = vpack.c.bf16 %v2426_v61, %v2425_v22  ;;  %v2938_v41 = vpack.c.bf16 %v2428_v0, %v2427_v63 }
 0x5cc   : > { %2897 = vmatprep.subr.bf16.mxu0 %v2896_v1  ;;  %v2926_v57 = vpack.c.bf16 %v2420_v13, %v2419_v56  ;;  %v2429_v1 = vld [vmem:[%s4017_s16 + $0xc0] sm:$0xff] }
 0x5cd   : > { %v2200_v51 = vsel %vm759_vm0, %v2199_v59, 0.0  ;;  %v2941_v11 = vpack.c.bf16 %v2430_v6, %v2429_v1 }
 0x5ce   : > { %2201 = vadd.xlane.f32.xlu0 %v2200_v51 }
 0x5cf   : > { %2899 = vmatpush1.bf16.msra.mxu0 %v2898_v15  ;;  %v2432_v15 = vld [vmem:[%s4017_s16 + $0xd8] sm:$0xff] }
 0x5d0   : > { %2901 = vmatprep.subr.bf16.mxu0 %v2900_v33  ;;  %v2944_v17 = vpack.c.bf16 %v2432_v15, %v2431_v54 }
 0x5d3   : > { %2903 = vmatpush1.bf16.msra.mxu0 %v2902_v19 }
 0x61d   : > { %v2293_v12 = vpop.permute.xlu1 %2292 }
 0x65b   : > { %v2202_v25 = vpop.xlane.xlu0 %2201 }
 0x65c   : > { %v2207_v26 = vadd.f32 %v2206_v24, %v2202_v25 }
 0x65e   : > { %3137 = vrcp.f32 %v2207_v26 }
 0x668   : > { %v3138_v27 = vpop.eup %3137 }
 0x669   : > { %v2209_v31 = vmul.f32 %v3138_v27, %v2199_v59  ;;  %v2422_v59 = vld [vmem:[%s4017_s16 + $0x88] sm:$0xff] }
 0x66a   : > { %v2929_v51 = vpack.c.bf16 %v2422_v59, %v2421_v58 }
 0x66b   : > { %2884 = vmatmul.mubr.msk.f32.vlgmr.msra.gmra.mrb[12].mxu1 %vm759_vm0, %v2209_v31 }
 0x66c   : > { %2906 = vmatpush1.bf16.msra.mxu1 %v2905_v42 }
 0x66d   : > { %2907 = vmatprep.subr.bf16.mxu1 %v3205_v29 }
 0x670   : > { %2909 = vmatpush1.bf16.msra.mxu1 %v2908_v44 }
 0x671   : > { %2910 = vmatprep.subr.bf16.mxu1 %v3205_v29 }
 0x674   : > { %2912 = vmatpush1.bf16.msra.mxu1 %v2911_v46 }
 0x675   : > { %2913 = vmatprep.subr.bf16.mxu1 %v3205_v29 }
 0x678   : > { %2915 = vmatpush1.bf16.msra.mxu1 %v2914_v47 }
 0x679   : > { %2916 = vmatprep.subr.bf16.mxu1 %v3205_v29 }
 0x67c   : > { %2918 = vmatpush1.bf16.msra.mxu1 %v2917_v49 }
 0x67d   : > { %2919 = vmatprep.subr.bf16.mxu1 %v3205_v29 }
 0x680   : > { %2921 = vmatpush1.bf16.msra.mxu1 %v2920_v52 }
 0x681   : > { %2922 = vmatprep.subr.bf16.mxu1 %v3205_v29 }
 0x684   : > { %2924 = vmatpush1.bf16.msra.mxu1 %v2923_v37 }
 0x685   : > { %2925 = vmatprep.subr.bf16.mxu1 %v3205_v29 }
 0x688   : > { %2927 = vmatpush1.bf16.msra.mxu1 %v2926_v57 }
 0x689   : > { %2928 = vmatprep.subr.bf16.mxu1 %v3205_v29 }
 0x68c   : > { %2930 = vmatpush1.bf16.msra.mxu1 %v2929_v51 }
 0x68d   : > { %2931 = vmatprep.subr.bf16.mxu1 %v3205_v29 }
 0x690   : > { %2933 = vmatpush1.bf16.msra.mxu1 %v2932_v60 }
 0x691   : > { %2934 = vmatprep.subr.bf16.mxu1 %v3205_v29 }
 0x694   : > { %2936 = vmatpush1.bf16.msra.mxu1 %v2935_v62 }
 0x695   : > { %2937 = vmatprep.subr.bf16.mxu1 %v3205_v29 }
 0x698   : > { %2939 = vmatpush1.bf16.msra.mxu1 %v2938_v41 }
 0x699   : > { %2940 = vmatprep.subr.bf16.mxu1 %v3205_v29 }
 0x69c   : > { %2942 = vmatpush1.bf16.msra.mxu1 %v2941_v11 }
 0x69d   : > { %2943 = vmatprep.subr.bf16.mxu1 %v3205_v29 }
 0x6a0   : > { %2945 = vmatpush1.bf16.msra.mxu1 %v2944_v17 }
 0x6a1   : > { %2946 = vmatprep.subr.bf16.mxu1 %v3205_v29 }
 0x6a4   : > { %2948 = vmatpush1.bf16.msra.mxu1 %v2947_v23 }
 0x73e   : > { %v2279_v35 = vpop.f32.mrb[12].mxu1 }
 0x73f   : > { %v2289_v39 = vsel %vm1520_vm4, %v2279_v35, %v2287_v9  ;;  %v3846_v16 = vsel %vm1520_vm4, %v2279_v35, %v2293_v12  ;;  %v2885_v40 = vpop.f32.mrb[13].mxu1  ;;  %v2763_v9 = vld [vmem:[%s4053_s24] ss:$0 sm:$0xff] }
 0x740   : > { %v2309_v43 = vrot.slane %v2289_v39, 4  ;;  %2388 = vrot.lane.b32.xlu1 %v3846_v16, %s3210_s19  ;;  %s3139_s19 = scalar_lea.vmem %s3961_s1, 64 }
 0x741   : > { %p3140_p11 = scmp.ne.s32.totalorder %s3961_s1, %s3139_s19 }
 0x742   : > { %2762 = vmatmul.mubr.msk.f32.vlgmr.msra.gmra.mrb[14].mxu0 %vm2310_vm13, %v2309_v43 }
 0x743   : > { %p3141_p12 = pnand %p3140_p11, %p3351_p5 }
 0x744   : > { %2391 = vrot.lane.b32.xlu1 %v3846_v16, %s3211_s20 }
 0x745   : > { %p3142_p13 = pneg %p3141_p12 }
 0x748   : > { %2385 = vrot.lane.b32.xlu1 %v3846_v16, %s3212_s30  ;;  %s2766_s30 = sshll.u32 %s4051_s14, 6  ;;  %s3145_s14 = scalar_lea.vmem %s3144_s27, 128 }
 0x749   : > { %p3147_p1 = scmp.lt.s32.totalorder %s3145_s14, %s3139_s19 }
 0x74b   : > { %p3148_p2 = por %p3147_p1, %p3146_p0 }
 0x74c   : > { %2394 = vrot.lane.b32.xlu1 %v3846_v16, %s3213_s28  ;;  %s4054_s28 = sld [smem:[#allocation19_spill]] }
 0x74d   : > { %p3149_p3 = pnand %p3148_p2, %p3142_p13 }
 0x752   : > { %s3959_s0 = scalar_lea.hbm %s4054_s28, %s2766_s30 }
 0x7b2   : > { %v2389_v24 = vpop.permute.xlu1 %2388 }
 0x7b6   : > { %v2392_v25 = vpop.permute.xlu1 %2391 }
 0x7b7   : > { %v2400_v31 = vsel %vm759_vm0, %v2389_v24, %v2392_v25  ;;  %vm2516_vm0 = vcmask 35840  }
 0x7ba   : > { %v2386_v26 = vpop.permute.xlu1 %2385 }
 0x7bb   : > { %v2397_v29 = vsel %vm2310_vm13, %v3846_v16, %v2386_v26 }
 0x7bc   : > { %v2399_v33 = vsel %vm2398_vm15, %v2397_v29, %v2389_v24 }
 0x7be   : > { %v2395_v27 = vpop.permute.xlu1 %2394 }
 0x7bf   : > { %v2402_v4 = vsel %vm2401_vm14, %v2400_v31, %v2395_v27 }
 0x815   : > { %v2379_v32 = vpop.f32.mrb[14].mxu0 }
 0x816   : > { %v2381_v30 = vpop.f32.mrb[15].mxu0  ;;  %v2403_v19 = vmul.f32 %v2399_v33, %v2379_v32 }
 0x817   : > { %v2404_v34 = vmul.f32 %v2402_v4, %v2381_v30 }
 0x819   : > { %2764 = vmatprep.mubr.msk.f32.mxu1 %vm2442_vm1, %v2404_v34 }
 0x81a   : > { %2511 = vmatmul.mubr.f32.vlgmr.msra.gmra.mrb[14].mxu1 %v2403_v19 }
 0x8ed   : > { %v2512_v12 = vpop.f32.mrb[14].mxu1 }
 0x8ee   : > { %v2513_v35 = vadd.f32 %v2763_v9, %v2512_v12  ;;  %v2514_v8 = vpop.f32.mrb[15].mxu1 }
 0x8f0   : > { %2517 = vst.msk [vmem:[%s666_s26] sm:$0xf] %vm2516_vm0, %v2513_v35 }
 0x8f1   : > { %3152 = shalt.err (!%p3149_p3)
}
 0x8f2   : > { %s3153_s29 = scalar_lea.hbm %s3959_s0, 64  ;;  %s3157_s25 = scalar_lea.hbm %s4054_s28, 128 }
 0x8f3   : > { %p3154_p4 = scmp.ne.s32.totalorder %s3959_s0, %s3153_s29  ;;  %p3158_p9 = scmp.lt.u32.totalorder %s3959_s0, %s4054_s28 }
 0x8f4   : > { %p3159_p10 = scmp.lt.u32.totalorder %s3157_s25, %s3153_s29  ;;  %p3161_p12 = scmp.lt.u32.totalorder %s3153_s29, %s3959_s0 }
 0x8f5   : > { %p3155_p7 = pnand %p3154_p4, %p3351_p5 }
 0x8f6   : > { %p3160_p11 = por %p3159_p10, %p3158_p9 }
 0x8f7   : > { %p3156_p8 = pneg %p3155_p7 }
 0x8f8   : > { %p3162_p13 = por %p3161_p12, %p3160_p11 }
 0x8fa   : > { %p3163_p0 = pnand %p3162_p13, %p3156_p8 }
 0x8fc   : > { %3166 = shalt.err (!%p3163_p0)
}
 0x8fd   : > { %2950 = dma.vmem_to_hbm [thread:$0]  (%p3351_p5), %s3961_s1, 64, %s3959_s0, %s2519_s18  }
 0x8fe PF: > { %s4055_s26 = sld [smem:[#allocation9_spill]]  ;;  %s4056_s21 = sld [smem:[#allocation6_spill]] }
 0x904   : > { %p2956_p1 = scmp.ge.s32.totalorder %s4055_s26, 2  ;;  %s2544_s19 = sand.u32 1, %s4056_s21  }
 0x905   : > { %s2545_s17 = scalar_lea.sflag [#allocation4], %s2544_s19 }
 0x906   : > { %p2953_p2 = pnand %p2956_p1, %p3355_p6 }
 0x908   : > { %3184 = dma.done.wait (!%p2953_p2), %s2545_s17, 64  }
 0x909   : > { %3186 = vsyncadd (!%p2953_p2), %s2545_s17, 4294967232  ;;  %s4058_s19 = sld [smem:[#allocation11_spill]]  ;;  %s4059_s29 = sld [smem:[#allocation7_spill]] }
 0x90a   : > { %s4060_s30 = sld [smem:[#allocation8_spill]]  ;;  %s4061_s0 = sld [smem:[#allocation12_spill]] }
 0x90f   : > { %p29_p3 = scmp.ge.s32.totalorder %s4058_s19, 4  }
 0x911   :  { %31 = sbr.rel (!%p29_p3) target bundleno = 10 (0xa), region = 148 }
 0x918   :  { %2550 = vsyncpa [#allocation4], 1 }
 0x919   :  { %2552 = vsyncpa [#allocation4 + $0x1], 1 }

// kernel: bert_ext_forward.2
= control target key start
LH: loop header
LB: loop body
LE: loop exit
PB: predicated region body
PF: predicated region fallthrough
CT: control target
= control target key end

     0   :  { %9 = vsyncpa [#allocation3], 0  ;;  %s3768_s0 = inlined_call_operand.vmem [shape: bf16[32,768], index: 0, kind: input, shape index: {}]   ;;  %s3769_s1 = inlined_call_operand.vmem [shape: f32[32,1], index: 1, kind: input, shape index: {}]   ;;  %s3770_s2 = inlined_call_operand.hbm [shape: bf16[768,768], index: 2, kind: input, shape index: {}]   ;;  %s3771_s3 = inlined_call_operand.hbm [shape: f32[1,768], index: 3, kind: input, shape index: {}]   ;;  %s3772_s4 = inlined_call_operand.vmem [shape: bf16[32,768], index: 4, kind: output, shape index: {}]  }
   0x1   :  { %10 = vsyncpa [#allocation5], 0  ;;  %s3500_s15 = smov [#allocation2]   ;;  %s3452_s19 = scalar_lea.hbm %s3770_s2, 36864 }
   0x2   :  { %s20_s16 = sshll.u32 %s3500_s15, 4  ;;  %p3453_p0 = scmp.ne.s32.totalorder %s3770_s2, %s3452_s19  ;;  %s21_s16 = int_to_ptr.vmem [resolvable:$true] %s20_s16 }
   0x3   :  { %p3456_p1 = scmp.lt.u32.totalorder %s3452_s19, %s3770_s2 }
   0x5   :  { %p3458_p2 = pnand %p3456_p1, %p3453_p0 }
   0x7   :  { %3461 = shalt.err (!%p3458_p2)
}
   0x8   :  { %s3462_s24 = scalar_lea.vmem %s21_s16, 36864  ;;  %p3467_p4 = scmp.lt.s32.totalorder %s21_s16, %s21_s16 }
   0x9   :  { %p3463_p3 = scmp.ne.s32.totalorder %s21_s16, %s3462_s24  ;;  %p3468_p5 = scmp.lt.s32.totalorder %s3462_s24, %s3462_s24 }
   0xb   :  { %p3469_p6 = por %p3468_p5, %p3467_p4 }
   0xd   :  { %p3470_p7 = pnand %p3469_p6, %p3463_p3 }
   0xf   :  { %3473 = shalt.err (!%p3470_p7)
}
  0x10   :  { %s3501_s25 = smov 384   ;;  %s3502_s26 = smov 24  }
  0x11   :  { %26 = dma.hbm_to_vmem [thread:$0]  %s3770_s2, 36864, %s21_s16, [#allocation3], %s3501_s25, %s3501_s25, %s3502_s26  }
  0x12   :  { %s3503_s29 = smov [#allocation4]   ;;  %s3474_s7 = scalar_lea.hbm %s3771_s3, 96 }
  0x13   :  { %s33_s30 = sshll.u32 %s3503_s29, 4  ;;  %p3475_p8 = scmp.ne.s32.totalorder %s3771_s3, %s3474_s7  ;;  %s34_s30 = int_to_ptr.vmem [resolvable:$true] %s33_s30 }
  0x14   :  { %p3478_p9 = scmp.lt.u32.totalorder %s3474_s7, %s3771_s3 }
  0x16   :  { %p3480_p10 = pnand %p3478_p9, %p3475_p8 }
  0x18   :  { %3483 = shalt.err (!%p3480_p10)
}
  0x19   :  { %s3484_s12 = scalar_lea.vmem %s34_s30, 96  ;;  %p3489_p12 = scmp.lt.s32.totalorder %s34_s30, %s34_s30 }
  0x1a   :  { %p3485_p11 = scmp.ne.s32.totalorder %s34_s30, %s3484_s12  ;;  %p3490_p13 = scmp.lt.s32.totalorder %s3484_s12, %s3484_s12 }
  0x1c   :  { %p3491_p0 = por %p3490_p13, %p3489_p12 }
  0x1e   :  { %p3492_p1 = pnand %p3491_p0, %p3485_p11 }
  0x20   :  { %3495 = shalt.err (!%p3492_p1)
}
  0x21   :  { %36 = dma.hbm_to_vmem [thread:$0]  %s3771_s3, 96, %s34_s30, [#allocation5]  }
  0x22   :  { %3496 = dma.done.wait [#allocation3], 36864  }
  0x23   :  { %3497 = vsyncadd [#allocation3], 4294930432 }
  0x24   :  { %3498 = dma.done.wait [#allocation5], 96  }
  0x25   :  { %3499 = vsyncadd [#allocation5], 4294967200  ;;  %v2949_v0 = vld [vmem:[#allocation2 + $0x4] ss:$24 sps:$4 sm:$0xff]   ;;  %v2953_v2 = vld [vmem:[#allocation2] ss:$24 sps:$4 sm:$0xff]  }
  0x26   :  { %v2951_v1 = vld [vmem:[#allocation2 + $0x304] ss:$24 sps:$4 sm:$0xff]   ;;  %1875 = vmatprep.subr.bf16.mxu1 %v2949_v0  ;;  %v2954_v3 = vld [vmem:[#allocation2 + $0x300] ss:$24 sps:$4 sm:$0xff]   ;;  %v2955_v4 = vld [vmem:[#allocation2 + $0x34] ss:$24 sps:$4 sm:$0xff]  }
  0x27   :  { %1928 = vmatprep.subr.bf16.mxu0 %v2951_v1  ;;  %1876 = vmatpush1.bf16.msra.mxu1 %v2953_v2  ;;  %v2957_v5 = vld [vmem:[#allocation2 + $0x334] ss:$24 sps:$4 sm:$0xff]   ;;  %v2959_v6 = vld [vmem:[#allocation2 + $0x30] ss:$24 sps:$4 sm:$0xff]   ;;  %v2961_v8 = vld [vmem:[#allocation2 + $0x64] ss:$24 sps:$4 sm:$0xff]  }
  0x28   :  { %1929 = vmatpush1.bf16.msra.mxu0 %v2954_v3  ;;  %1877 = vmatprep.subr.bf16.mxu1 %v2955_v4  ;;  %v2960_v7 = vld [vmem:[#allocation2 + $0x330] ss:$24 sps:$4 sm:$0xff]   ;;  %v2963_v9 = vld [vmem:[#allocation2 + $0x364] ss:$24 sps:$4 sm:$0xff]   ;;  %v2965_v10 = vld [vmem:[#allocation2 + $0x60] ss:$24 sps:$4 sm:$0xff]  }
  0x29   :  { %1930 = vmatprep.subr.bf16.mxu0 %v2957_v5  ;;  %v2966_v11 = vld [vmem:[#allocation2 + $0x360] ss:$24 sps:$4 sm:$0xff]   ;;  %v2967_v12 = vld [vmem:[#allocation2 + $0x94] ss:$24 sps:$4 sm:$0xff]   ;;  %v2971_v14 = vld [vmem:[#allocation2 + $0x90] ss:$24 sps:$4 sm:$0xff]  }
  0x2a   :  { %v2969_v13 = vld [vmem:[#allocation2 + $0x394] ss:$24 sps:$4 sm:$0xff]   ;;  %v2972_v15 = vld [vmem:[#allocation2 + $0x390] ss:$24 sps:$4 sm:$0xff]   ;;  %v2973_v16 = vld [vmem:[#allocation2 + $0xc4] ss:$24 sps:$4 sm:$0xff]  }
  0x2b   :  { %1878 = vmatpush1.bf16.msra.mxu1 %v2959_v6  ;;  %v2975_v17 = vld [vmem:[#allocation2 + $0x3c4] ss:$24 sps:$4 sm:$0xff]   ;;  %v2977_v18 = vld [vmem:[#allocation2 + $0xc0] ss:$24 sps:$4 sm:$0xff]   ;;  %v2979_v20 = vld [vmem:[#allocation2 + $0xf4] ss:$24 sps:$4 sm:$0xff]  }
  0x2c   :  { %1931 = vmatpush1.bf16.msra.mxu0 %v2960_v7  ;;  %1879 = vmatprep.subr.bf16.mxu1 %v2961_v8  ;;  %v2978_v19 = vld [vmem:[#allocation2 + $0x3c0] ss:$24 sps:$4 sm:$0xff]   ;;  %v2981_v21 = vld [vmem:[#allocation2 + $0x3f4] ss:$24 sps:$4 sm:$0xff]   ;;  %v2983_v22 = vld [vmem:[#allocation2 + $0xf0] ss:$24 sps:$4 sm:$0xff]  }
  0x2d   :  { %1932 = vmatprep.subr.bf16.mxu0 %v2963_v9  ;;  %v2984_v23 = vld [vmem:[#allocation2 + $0x3f0] ss:$24 sps:$4 sm:$0xff]   ;;  %v2985_v24 = vld [vmem:[#allocation2 + $0x124] ss:$24 sps:$4 sm:$0xff]   ;;  %v2989_v26 = vld [vmem:[#allocation2 + $0x120] ss:$24 sps:$4 sm:$0xff]  }
  0x2e   :  { %v2987_v25 = vld [vmem:[#allocation2 + $0x424] ss:$24 sps:$4 sm:$0xff]   ;;  %v2990_v27 = vld [vmem:[#allocation2 + $0x420] ss:$24 sps:$4 sm:$0xff]   ;;  %v2991_v28 = vld [vmem:[#allocation2 + $0x154] ss:$24 sps:$4 sm:$0xff]  }
  0x2f   :  { %1880 = vmatpush1.bf16.msra.mxu1 %v2965_v10  ;;  %v2993_v29 = vld [vmem:[#allocation2 + $0x454] ss:$24 sps:$4 sm:$0xff]   ;;  %v2995_v30 = vld [vmem:[#allocation2 + $0x150] ss:$24 sps:$4 sm:$0xff]   ;;  %v2997_v32 = vld [vmem:[#allocation2 + $0x184] ss:$24 sps:$4 sm:$0xff]  }
  0x30   :  { %1933 = vmatpush1.bf16.msra.mxu0 %v2966_v11  ;;  %1881 = vmatprep.subr.bf16.mxu1 %v2967_v12  ;;  %v2996_v31 = vld [vmem:[#allocation2 + $0x450] ss:$24 sps:$4 sm:$0xff]   ;;  %v2999_v33 = vld [vmem:[#allocation2 + $0x484] ss:$24 sps:$4 sm:$0xff]   ;;  %v3001_v34 = vld [vmem:[#allocation2 + $0x180] ss:$24 sps:$4 sm:$0xff]  }
  0x31   :  { %1934 = vmatprep.subr.bf16.mxu0 %v2969_v13  ;;  %v3002_v35 = vld [vmem:[#allocation2 + $0x480] ss:$24 sps:$4 sm:$0xff]   ;;  %v3003_v36 = vld [vmem:[#allocation2 + $0x1b4] ss:$24 sps:$4 sm:$0xff]   ;;  %v3007_v38 = vld [vmem:[#allocation2 + $0x1b0] ss:$24 sps:$4 sm:$0xff]  }
  0x32   :  { %v3005_v37 = vld [vmem:[#allocation2 + $0x4b4] ss:$24 sps:$4 sm:$0xff]   ;;  %v3008_v39 = vld [vmem:[#allocation2 + $0x4b0] ss:$24 sps:$4 sm:$0xff]   ;;  %v3009_v40 = vld [vmem:[#allocation2 + $0x1e4] ss:$24 sps:$4 sm:$0xff]  }
  0x33   :  { %1882 = vmatpush1.bf16.msra.mxu1 %v2971_v14  ;;  %v3011_v41 = vld [vmem:[#allocation2 + $0x4e4] ss:$24 sps:$4 sm:$0xff]   ;;  %v3013_v42 = vld [vmem:[#allocation2 + $0x1e0] ss:$24 sps:$4 sm:$0xff]   ;;  %v3015_v44 = vld [vmem:[#allocation2 + $0x214] ss:$24 sps:$4 sm:$0xff]  }
  0x34   :  { %1935 = vmatpush1.bf16.msra.mxu0 %v2972_v15  ;;  %1883 = vmatprep.subr.bf16.mxu1 %v2973_v16  ;;  %v3014_v43 = vld [vmem:[#allocation2 + $0x4e0] ss:$24 sps:$4 sm:$0xff]   ;;  %v3017_v45 = vld [vmem:[#allocation2 + $0x514] ss:$24 sps:$4 sm:$0xff]   ;;  %v3019_v46 = vld [vmem:[#allocation2 + $0x210] ss:$24 sps:$4 sm:$0xff]  }
  0x35   :  { %1936 = vmatprep.subr.bf16.mxu0 %v2975_v17  ;;  %v3020_v47 = vld [vmem:[#allocation2 + $0x510] ss:$24 sps:$4 sm:$0xff]   ;;  %v3021_v48 = vld [vmem:[#allocation2 + $0x244] ss:$24 sps:$4 sm:$0xff]   ;;  %v3025_v52 = vld [vmem:[#allocation2 + $0x240] ss:$24 sps:$4 sm:$0xff]  }
  0x36   :  { %v3557_v49 = vld [vmem:[%s3768_s0 + $0x4] ss:$24 sps:$4 sm:$0xff]   ;;  %v3026_v53 = vld [vmem:[#allocation2 + $0x540] ss:$24 sps:$4 sm:$0xff]   ;;  %v3027_v54 = vld [vmem:[#allocation2 + $0x274] ss:$24 sps:$4 sm:$0xff]  }
  0x37   :  { %1884 = vmatpush1.bf16.msra.mxu1 %v2977_v18  ;;  %v3562_v50 = vld [vmem:[%s3768_s0 + $0xc] ss:$24 sps:$4 sm:$0xff]   ;;  %1907 = vmatprep.mubr.bf16.mxu1 %v3557_v49  ;;  %v3031_v56 = vld [vmem:[#allocation2 + $0x270] ss:$24 sps:$4 sm:$0xff]   ;;  %v3037_v60 = vld [vmem:[#allocation2 + $0x2a0] ss:$24 sps:$4 sm:$0xff]  }
  0x38   :  { %1937 = vmatpush1.bf16.msra.mxu0 %v2978_v19  ;;  %1885 = vmatprep.subr.bf16.mxu1 %v2979_v20  ;;  %v3023_v51 = vld [vmem:[#allocation2 + $0x544] ss:$24 sps:$4 sm:$0xff]   ;;  %v3029_v55 = vld [vmem:[#allocation2 + $0x574] ss:$24 sps:$4 sm:$0xff]   ;;  %v3032_v57 = vld [vmem:[#allocation2 + $0x570] ss:$24 sps:$4 sm:$0xff]  }
  0x39   :  { %1938 = vmatprep.subr.bf16.mxu0 %v2981_v21  ;;  %1960 = vmatprep.mubr.bf16.mxu0 %v3562_v50  ;;  %v3033_v58 = vld [vmem:[#allocation2 + $0x2a4] ss:$24 sps:$4 sm:$0xff]   ;;  %v3038_v61 = vld [vmem:[#allocation2 + $0x5a0] ss:$24 sps:$4 sm:$0xff]   ;;  %v3039_v62 = vld [vmem:[#allocation2 + $0x2d4] ss:$24 sps:$4 sm:$0xff]  }
  0x3a   :  { %v3035_v59 = vld [vmem:[#allocation2 + $0x5a4] ss:$24 sps:$4 sm:$0xff]   ;;  %v3041_v63 = vld [vmem:[#allocation2 + $0x5d4] ss:$24 sps:$4 sm:$0xff]   ;;  %v3043_v0 = vld [vmem:[#allocation2 + $0x2d0] ss:$24 sps:$4 sm:$0xff]  }
  0x3b   :  { %1886 = vmatpush1.bf16.msra.mxu1 %v2983_v22  ;;  %v3044_v1 = vld [vmem:[#allocation2 + $0x5d0] ss:$24 sps:$4 sm:$0xff]   ;;  %v3052_v2 = vld [vmem:[#allocation2 + $0x604] ss:$24 sps:$4 sm:$0xff]   ;;  %v3569_v4 = vld [vmem:[%s3768_s0] ss:$24 sps:$4 sm:$0xff]  }
  0x3c   :  { %1939 = vmatpush1.bf16.msra.mxu0 %v2984_v23  ;;  %1887 = vmatprep.subr.bf16.mxu1 %v2985_v24  ;;  %v3055_v3 = vld [vmem:[#allocation2 + $0xc] ss:$24 sps:$4 sm:$0xff]   ;;  %v3050_v5 = vld [vmem:[#allocation2 + $0x600] ss:$24 sps:$4 sm:$0xff]   ;;  %v3062_v9 = vld [vmem:[#allocation2 + $0x3c] ss:$24 sps:$4 sm:$0xff]  }
  0x3d   :  { %1940 = vmatprep.subr.bf16.mxu0 %v2987_v25  ;;  %v3053_v6 = vld [vmem:[#allocation2 + $0x8] ss:$24 sps:$4 sm:$0xff]   ;;  %v3059_v8 = vld [vmem:[#allocation2 + $0x634] ss:$24 sps:$4 sm:$0xff]   ;;  %v3060_v11 = vld [vmem:[#allocation2 + $0x38] ss:$24 sps:$4 sm:$0xff]  }
  0x3e   :  { %v3574_v7 = vld [vmem:[%s3768_s0 + $0x8] ss:$24 sps:$4 sm:$0xff]   ;;  %v3065_v12 = vld [vmem:[#allocation2 + $0x664] ss:$24 sps:$4 sm:$0xff]   ;;  %v3071_v16 = vld [vmem:[#allocation2 + $0x694] ss:$24 sps:$4 sm:$0xff]  }
  0x3f   :  { %1888 = vmatpush1.bf16.msra.mxu1 %v2989_v26  ;;  %v3057_v10 = vld [vmem:[#allocation2 + $0x630] ss:$24 sps:$4 sm:$0xff]   ;;  %v3068_v13 = vld [vmem:[#allocation2 + $0x6c] ss:$24 sps:$4 sm:$0xff]   ;;  %v3063_v14 = vld [vmem:[#allocation2 + $0x660] ss:$24 sps:$4 sm:$0xff]  }
  0x40   :  { %1941 = vmatpush1.bf16.msra.mxu0 %v2990_v27  ;;  %1889 = vmatprep.subr.bf16.mxu1 %v2991_v28  ;;  %v3066_v15 = vld [vmem:[#allocation2 + $0x68] ss:$24 sps:$4 sm:$0xff]   ;;  %v3074_v17 = vld [vmem:[#allocation2 + $0x9c] ss:$24 sps:$4 sm:$0xff]   ;;  %v3072_v19 = vld [vmem:[#allocation2 + $0x98] ss:$24 sps:$4 sm:$0xff]  }
  0x41   :  { %1942 = vmatprep.subr.bf16.mxu0 %v2993_v29  ;;  %v3069_v18 = vld [vmem:[#allocation2 + $0x690] ss:$24 sps:$4 sm:$0xff]   ;;  %v3077_v20 = vld [vmem:[#allocation2 + $0x6c4] ss:$24 sps:$4 sm:$0xff]   ;;  %v3075_v22 = vld [vmem:[#allocation2 + $0x6c0] ss:$24 sps:$4 sm:$0xff]  }
  0x42   :  { %v3080_v21 = vld [vmem:[#allocation2 + $0xcc] ss:$24 sps:$4 sm:$0xff]   ;;  %v3078_v23 = vld [vmem:[#allocation2 + $0xc8] ss:$24 sps:$4 sm:$0xff]   ;;  %v3086_v25 = vld [vmem:[#allocation2 + $0xfc] ss:$24 sps:$4 sm:$0xff]  }
  0x43   :  { %1890 = vmatpush1.bf16.msra.mxu1 %v2995_v30  ;;  %v3083_v24 = vld [vmem:[#allocation2 + $0x6f4] ss:$24 sps:$4 sm:$0xff]   ;;  %v3081_v26 = vld [vmem:[#allocation2 + $0x6f0] ss:$24 sps:$4 sm:$0xff]   ;;  %v3089_v28 = vld [vmem:[#allocation2 + $0x724] ss:$24 sps:$4 sm:$0xff]  }
  0x44   :  { %1943 = vmatpush1.bf16.msra.mxu0 %v2996_v31  ;;  %1891 = vmatprep.subr.bf16.mxu1 %v2997_v32  ;;  %v3084_v27 = vld [vmem:[#allocation2 + $0xf8] ss:$24 sps:$4 sm:$0xff]   ;;  %v3092_v29 = vld [vmem:[#allocation2 + $0x12c] ss:$24 sps:$4 sm:$0xff]   ;;  %v3591_v32 = vld [vmem:[%s3768_s0 + $0x3c] ss:$24 sps:$4 sm:$0xff]  }
  0x45   :  { %1944 = vmatprep.subr.bf16.mxu0 %v2999_v33  ;;  %v3581_v30 = vld [vmem:[%s3768_s0 + $0x34] ss:$24 sps:$4 sm:$0xff]   ;;  %v3586_v31 = vld [vmem:[%s3768_s0 + $0x30] ss:$24 sps:$4 sm:$0xff]  }
  0x46   :  { %v3596_v33 = vld [vmem:[%s3768_s0 + $0x38] ss:$24 sps:$4 sm:$0xff]  }
  0x47   :  { %1892 = vmatpush1.bf16.msra.mxu1 %v3001_v34  ;;  %v3087_v34 = vld [vmem:[#allocation2 + $0x720] ss:$24 sps:$4 sm:$0xff]  }
  0x48   :  { %1945 = vmatpush1.bf16.msra.mxu0 %v3002_v35  ;;  %1893 = vmatprep.subr.bf16.mxu1 %v3003_v36  ;;  %v3090_v35 = vld [vmem:[#allocation2 + $0x128] ss:$24 sps:$4 sm:$0xff]   ;;  %v3095_v36 = vld [vmem:[#allocation2 + $0x754] ss:$24 sps:$4 sm:$0xff]  }
  0x49   :  { %1946 = vmatprep.subr.bf16.mxu0 %v3005_v37  ;;  %v3098_v37 = vld [vmem:[#allocation2 + $0x15c] ss:$24 sps:$4 sm:$0xff]  }
  0x4b   :  { %1894 = vmatpush1.bf16.msra.mxu1 %v3007_v38  ;;  %v3093_v38 = vld [vmem:[#allocation2 + $0x750] ss:$24 sps:$4 sm:$0xff]  }
  0x4c   :  { %1947 = vmatpush1.bf16.msra.mxu0 %v3008_v39  ;;  %1895 = vmatprep.subr.bf16.mxu1 %v3009_v40  ;;  %v3096_v39 = vld [vmem:[#allocation2 + $0x158] ss:$24 sps:$4 sm:$0xff]   ;;  %v3606_v40 = vld [vmem:[%s3768_s0 + $0x14] ss:$24 sps:$4 sm:$0xff]  }
  0x4d   :  { %1948 = vmatprep.subr.bf16.mxu0 %v3011_v41  ;;  %v3101_v41 = vld [vmem:[#allocation2 + $0x784] ss:$24 sps:$4 sm:$0xff]  }
  0x4f   :  { %1896 = vmatpush1.bf16.msra.mxu1 %v3013_v42  ;;  %v3104_v42 = vld [vmem:[#allocation2 + $0x18c] ss:$24 sps:$4 sm:$0xff]  }
  0x50   :  { %1949 = vmatpush1.bf16.msra.mxu0 %v3014_v43  ;;  %1897 = vmatprep.subr.bf16.mxu1 %v3015_v44  ;;  %v3099_v43 = vld [vmem:[#allocation2 + $0x780] ss:$24 sps:$4 sm:$0xff]  }
  0x51   :  { %1950 = vmatprep.subr.bf16.mxu0 %v3017_v45  ;;  %v3102_v44 = vld [vmem:[#allocation2 + $0x188] ss:$24 sps:$4 sm:$0xff]   ;;  %v3107_v45 = vld [vmem:[#allocation2 + $0x7b4] ss:$24 sps:$4 sm:$0xff]  }
  0x53   :  { %1898 = vmatpush1.bf16.msra.mxu1 %v3019_v46  ;;  %v3110_v46 = vld [vmem:[#allocation2 + $0x1bc] ss:$24 sps:$4 sm:$0xff]  }
  0x54   :  { %1951 = vmatpush1.bf16.msra.mxu0 %v3020_v47  ;;  %1899 = vmatprep.subr.bf16.mxu1 %v3021_v48  ;;  %v3504_v47 = vmov 0   ;;  %v3105_v48 = vld [vmem:[#allocation2 + $0x7b0] ss:$24 sps:$4 sm:$0xff]  }
  0x55   :  { %1952 = vmatprep.subr.bf16.mxu0 %v3023_v51  ;;  %2947 = vset.pattern.permute.xlu0 %v3504_v47  ;;  %v3108_v51 = vld [vmem:[#allocation2 + $0x1b8] ss:$24 sps:$4 sm:$0xff]  }
  0x56   :  { %2948 = vset.pattern.permute.xlu1 %v3504_v47  ;;  %v3200_v47 = vld [vmem:[#allocation2 + $0x134] ss:$24 sps:$4 sm:$0xff]  }
  0x57   :  { %1900 = vmatpush1.bf16.msra.mxu1 %v3025_v52  ;;  %v3113_v52 = vld [vmem:[#allocation2 + $0x7e4] ss:$24 sps:$4 sm:$0xff]  }
  0x58   :  { %1953 = vmatpush1.bf16.msra.mxu0 %v3026_v53  ;;  %1901 = vmatprep.subr.bf16.mxu1 %v3027_v54  ;;  %v3116_v53 = vld [vmem:[#allocation2 + $0x1ec] ss:$24 sps:$4 sm:$0xff]   ;;  %v3111_v54 = vld [vmem:[#allocation2 + $0x7e0] ss:$24 sps:$4 sm:$0xff]  }
  0x59   :  { %1954 = vmatprep.subr.bf16.mxu0 %v3029_v55  ;;  %v3114_v55 = vld [vmem:[#allocation2 + $0x1e8] ss:$24 sps:$4 sm:$0xff]  }
  0x5b   :  { %1902 = vmatpush1.bf16.msra.mxu1 %v3031_v56  ;;  %v3119_v56 = vld [vmem:[#allocation2 + $0x814] ss:$24 sps:$4 sm:$0xff]  }
  0x5c   :  { %1955 = vmatpush1.bf16.msra.mxu0 %v3032_v57  ;;  %1903 = vmatprep.subr.bf16.mxu1 %v3033_v58  ;;  %v3122_v57 = vld [vmem:[#allocation2 + $0x21c] ss:$24 sps:$4 sm:$0xff]   ;;  %v3117_v58 = vld [vmem:[#allocation2 + $0x810] ss:$24 sps:$4 sm:$0xff]  }
  0x5d   :  { %1956 = vmatprep.subr.bf16.mxu0 %v3035_v59  ;;  %v3120_v59 = vld [vmem:[#allocation2 + $0x218] ss:$24 sps:$4 sm:$0xff]  }
  0x5f   :  { %1904 = vmatpush1.bf16.msra.mxu1 %v3037_v60  ;;  %v3125_v60 = vld [vmem:[#allocation2 + $0x844] ss:$24 sps:$4 sm:$0xff]  }
  0x60   :  { %1957 = vmatpush1.bf16.msra.mxu0 %v3038_v61  ;;  %1905 = vmatprep.subr.bf16.mxu1 %v3039_v62  ;;  %v3128_v61 = vld [vmem:[#allocation2 + $0x24c] ss:$24 sps:$4 sm:$0xff]   ;;  %v3123_v62 = vld [vmem:[#allocation2 + $0x840] ss:$24 sps:$4 sm:$0xff]  }
  0x61   :  { %1958 = vmatprep.subr.bf16.mxu0 %v3041_v63  ;;  %v3126_v63 = vld [vmem:[#allocation2 + $0x248] ss:$24 sps:$4 sm:$0xff]  }
  0x63   :  { %1906 = vmatpush1.bf16.msra.mxu1 %v3043_v0  ;;  %v3131_v0 = vld [vmem:[#allocation2 + $0x874] ss:$24 sps:$4 sm:$0xff]  }
  0x64   :  { %1959 = vmatpush1.bf16.msra.mxu0 %v3044_v1  ;;  %2034 = vmatprep.subr.bf16.mxu1 %v3055_v3  ;;  %v3134_v1 = vld [vmem:[#allocation2 + $0x27c] ss:$24 sps:$4 sm:$0xff]   ;;  %v3132_v3 = vld [vmem:[#allocation2 + $0x278] ss:$24 sps:$4 sm:$0xff]  }
  0x65   :  { %1981 = vmatprep.subr.bf16.mxu0 %v3052_v2  ;;  %v3129_v2 = vld [vmem:[#allocation2 + $0x870] ss:$24 sps:$4 sm:$0xff]  }
  0x66   :  { %1908 = vmatmul.mubr.bf16.vlgmr.msra.gmra.mrb[0].mxu1 %v3569_v4 }
  0x67   :  { %1961 = vmatmul.mubr.bf16.vlgmr.msra.gmra.mrb[0].mxu0 %v3574_v7  ;;  %2035 = vmatpush1.bf16.msra.mxu1 %v3053_v6  ;;  %v3146_v6 = vld [vmem:[#allocation2 + $0x2ac] ss:$24 sps:$4 sm:$0xff]  }
  0x68   :  { %1982 = vmatpush1.bf16.msra.mxu0 %v3050_v5  ;;  %2036 = vmatprep.subr.bf16.mxu1 %v3062_v9  ;;  %v3143_v5 = vld [vmem:[#allocation2 + $0x8a4] ss:$24 sps:$4 sm:$0xff]   ;;  %v3144_v9 = vld [vmem:[#allocation2 + $0x2a8] ss:$24 sps:$4 sm:$0xff]  }
  0x69   :  { %1983 = vmatprep.subr.bf16.mxu0 %v3059_v8  ;;  %1917 = vmatprep.mubr.bf16.mxu1 %v3581_v30  ;;  %v3141_v8 = vld [vmem:[#allocation2 + $0x8a0] ss:$24 sps:$4 sm:$0xff]  }
  0x6a   :  { %1970 = vmatprep.mubr.bf16.mxu0 %v3591_v32 }
  0x6b   :  { %2037 = vmatpush1.bf16.msra.mxu1 %v3060_v11  ;;  %v3152_v11 = vld [vmem:[#allocation2 + $0x2dc] ss:$24 sps:$4 sm:$0xff]  }
  0x6c   :  { %1984 = vmatpush1.bf16.msra.mxu0 %v3057_v10  ;;  %2038 = vmatprep.subr.bf16.mxu1 %v3068_v13  ;;  %v3149_v10 = vld [vmem:[#allocation2 + $0x8d4] ss:$24 sps:$4 sm:$0xff]   ;;  %v3150_v13 = vld [vmem:[#allocation2 + $0x2d8] ss:$24 sps:$4 sm:$0xff]  }
  0x6d   :  { %1985 = vmatprep.subr.bf16.mxu0 %v3065_v12  ;;  %v3147_v12 = vld [vmem:[#allocation2 + $0x8d0] ss:$24 sps:$4 sm:$0xff]  }
  0x6e   :  { %1918 = vmatmul.mubr.bf16.gmra.mrb[4].mxu1 %v3586_v31 }
  0x6f   :  { %2039 = vmatpush1.bf16.msra.mxu1 %v3066_v15  ;;  %1971 = vmatmul.mubr.bf16.gmra.mrb[4].mxu0 %v3596_v33  ;;  %v3161_v15 = vld [vmem:[#allocation2 + $0x14] ss:$24 sps:$4 sm:$0xff]  }
  0x70   :  { %1986 = vmatpush1.bf16.msra.mxu0 %v3063_v14  ;;  %2040 = vmatprep.subr.bf16.mxu1 %v3074_v17  ;;  %v3158_v14 = vld [vmem:[#allocation2 + $0x30c] ss:$24 sps:$4 sm:$0xff]   ;;  %v3156_v17 = vld [vmem:[#allocation2 + $0x308] ss:$24 sps:$4 sm:$0xff]  }
  0x71   :  { %1987 = vmatprep.subr.bf16.mxu0 %v3071_v16  ;;  %2066 = vmatprep.mubr.bf16.mxu1 %v3557_v49  ;;  %v3612_v16 = vld [vmem:[%s3768_s0 + $0x10] ss:$24 sps:$4 sm:$0xff]  }
  0x72   :  { %2013 = vmatprep.mubr.bf16.mxu0 %v3606_v40 }
  0x73   :  { %2041 = vmatpush1.bf16.msra.mxu1 %v3072_v19  ;;  %v3164_v19 = vld [vmem:[#allocation2 + $0x33c] ss:$24 sps:$4 sm:$0xff]  }
  0x74   :  { %1988 = vmatpush1.bf16.msra.mxu0 %v3069_v18  ;;  %2042 = vmatprep.subr.bf16.mxu1 %v3080_v21  ;;  %v3159_v18 = vld [vmem:[#allocation2 + $0x10] ss:$24 sps:$4 sm:$0xff]   ;;  %v3617_v21 = vld [vmem:[%s3768_s0 + $0x44] ss:$24 sps:$4 sm:$0xff]  }
  0x75   :  { %1989 = vmatprep.subr.bf16.mxu0 %v3077_v20  ;;  %v3167_v20 = vld [vmem:[#allocation2 + $0x44] ss:$24 sps:$4 sm:$0xff]  }
  0x77   :  { %2043 = vmatpush1.bf16.msra.mxu1 %v3078_v23  ;;  %v3165_v23 = vld [vmem:[#allocation2 + $0x40] ss:$24 sps:$4 sm:$0xff]  }
  0x78   :  { %1990 = vmatpush1.bf16.msra.mxu0 %v3075_v22  ;;  %2044 = vmatprep.subr.bf16.mxu1 %v3086_v25  ;;  %v3162_v22 = vld [vmem:[#allocation2 + $0x338] ss:$24 sps:$4 sm:$0xff]   ;;  %v3176_v25 = vld [vmem:[#allocation2 + $0x74] ss:$24 sps:$4 sm:$0xff]  }
  0x79   :  { %1991 = vmatprep.subr.bf16.mxu0 %v3083_v24  ;;  %v3173_v24 = vld [vmem:[#allocation2 + $0x36c] ss:$24 sps:$4 sm:$0xff]  }
  0x7b   :  { %2045 = vmatpush1.bf16.msra.mxu1 %v3084_v27  ;;  %v3171_v27 = vld [vmem:[#allocation2 + $0x368] ss:$24 sps:$4 sm:$0xff]  }
  0x7c   :  { %1992 = vmatpush1.bf16.msra.mxu0 %v3081_v26  ;;  %2046 = vmatprep.subr.bf16.mxu1 %v3092_v29  ;;  %v3625_v26 = vld [vmem:[%s3768_s0 + $0x40] ss:$24 sps:$4 sm:$0xff]   ;;  %v3179_v29 = vld [vmem:[#allocation2 + $0x39c] ss:$24 sps:$4 sm:$0xff]  }
  0x7d   :  { %1993 = vmatprep.subr.bf16.mxu0 %v3089_v28  ;;  %v3174_v28 = vld [vmem:[#allocation2 + $0x70] ss:$24 sps:$4 sm:$0xff]  }
  0x7f   :  { %2047 = vmatpush1.bf16.msra.mxu1 %v3090_v35  ;;  %v3177_v35 = vld [vmem:[#allocation2 + $0x398] ss:$24 sps:$4 sm:$0xff]  }
  0x80   :  { %1994 = vmatpush1.bf16.msra.mxu0 %v3087_v34  ;;  %2048 = vmatprep.subr.bf16.mxu1 %v3098_v37  ;;  %v3182_v34 = vld [vmem:[#allocation2 + $0xa4] ss:$24 sps:$4 sm:$0xff]  }
  0x81   :  { %1995 = vmatprep.subr.bf16.mxu0 %v3095_v36  ;;  %v3180_v36 = vld [vmem:[#allocation2 + $0xa0] ss:$24 sps:$4 sm:$0xff]   ;;  %v3185_v37 = vld [vmem:[#allocation2 + $0x3cc] ss:$24 sps:$4 sm:$0xff]  }
  0x83   :  { %2049 = vmatpush1.bf16.msra.mxu1 %v3096_v39  ;;  %v3183_v39 = vld [vmem:[#allocation2 + $0x3c8] ss:$24 sps:$4 sm:$0xff]  }
  0x84   :  { %1996 = vmatpush1.bf16.msra.mxu0 %v3093_v38  ;;  %2050 = vmatprep.subr.bf16.mxu1 %v3104_v42  ;;  %v3188_v38 = vld [vmem:[#allocation2 + $0xd4] ss:$24 sps:$4 sm:$0xff]  }
  0x85   :  { %1997 = vmatprep.subr.bf16.mxu0 %v3101_v41  ;;  %v3186_v41 = vld [vmem:[#allocation2 + $0xd0] ss:$24 sps:$4 sm:$0xff]   ;;  %v3191_v42 = vld [vmem:[#allocation2 + $0x3fc] ss:$24 sps:$4 sm:$0xff]  }
  0x87   :  { %2051 = vmatpush1.bf16.msra.mxu1 %v3102_v44  ;;  %v3189_v44 = vld [vmem:[#allocation2 + $0x3f8] ss:$24 sps:$4 sm:$0xff]  }
  0x88   :  { %1998 = vmatpush1.bf16.msra.mxu0 %v3099_v43  ;;  %2052 = vmatprep.subr.bf16.mxu1 %v3110_v46  ;;  %v3194_v43 = vld [vmem:[#allocation2 + $0x104] ss:$24 sps:$4 sm:$0xff]  }
  0x89   :  { %1999 = vmatprep.subr.bf16.mxu0 %v3107_v45  ;;  %v3192_v45 = vld [vmem:[#allocation2 + $0x100] ss:$24 sps:$4 sm:$0xff]   ;;  %v3197_v46 = vld [vmem:[#allocation2 + $0x42c] ss:$24 sps:$4 sm:$0xff]  }
  0x8b   :  { %2053 = vmatpush1.bf16.msra.mxu1 %v3108_v51  ;;  %v3206_v51 = vld [vmem:[#allocation2 + $0x164] ss:$24 sps:$4 sm:$0xff]  }
  0x8c   :  { %2000 = vmatpush1.bf16.msra.mxu0 %v3105_v48  ;;  %2054 = vmatprep.subr.bf16.mxu1 %v3116_v53  ;;  %v3195_v48 = vld [vmem:[#allocation2 + $0x428] ss:$24 sps:$4 sm:$0xff]  }
  0x8d   :  { %2001 = vmatprep.subr.bf16.mxu0 %v3113_v52  ;;  %v3201_v52 = vld [vmem:[#allocation2 + $0x458] ss:$24 sps:$4 sm:$0xff]  }
  0x8e   :  { %v3204_v53 = vld [vmem:[#allocation2 + $0x160] ss:$24 sps:$4 sm:$0xff]  }
  0x8f   :  { %2055 = vmatpush1.bf16.msra.mxu1 %v3114_v55  ;;  %v3212_v55 = vld [vmem:[#allocation2 + $0x194] ss:$24 sps:$4 sm:$0xff]  }
  0x90   :  { %2002 = vmatpush1.bf16.msra.mxu0 %v3111_v54  ;;  %2056 = vmatprep.subr.bf16.mxu1 %v3122_v57  ;;  %v3209_v54 = vld [vmem:[#allocation2 + $0x48c] ss:$24 sps:$4 sm:$0xff]   ;;  %v3207_v57 = vld [vmem:[#allocation2 + $0x488] ss:$24 sps:$4 sm:$0xff]  }
  0x91   :  { %2003 = vmatprep.subr.bf16.mxu0 %v3119_v56  ;;  %v2376_v56 = vld [vmem:[%s3769_s1] sm:$0xff] }
  0x92   :  { %2382 = vperm.xlu0 %2947, %v2376_v56   ;;  %v3291_v56 = vld [vmem:[#allocation2 + $0x728] ss:$24 sps:$4 sm:$0xff]  }
  0x93   :  { %2057 = vmatpush1.bf16.msra.mxu1 %v3120_v59  ;;  %v2377_v59 = vld [vmem:[%s3769_s1 + $0x8] sm:$0xff] }
  0x94   :  { %2004 = vmatpush1.bf16.msra.mxu0 %v3117_v58  ;;  %2058 = vmatprep.subr.bf16.mxu1 %v3128_v61  ;;  %v3210_v58 = vld [vmem:[#allocation2 + $0x190] ss:$24 sps:$4 sm:$0xff]   ;;  %v3218_v61 = vld [vmem:[#allocation2 + $0x1c4] ss:$24 sps:$4 sm:$0xff]  }
  0x95   :  { %2005 = vmatprep.subr.bf16.mxu0 %v3125_v60  ;;  %v3215_v60 = vld [vmem:[#allocation2 + $0x4bc] ss:$24 sps:$4 sm:$0xff]  }
  0x96   :  { %2387 = vperm.xlu0 %2947, %v2377_v59   ;;  %v3302_v59 = vld [vmem:[#allocation2 + $0x464] ss:$24 sps:$4 sm:$0xff]  }
  0x97   :  { %2059 = vmatpush1.bf16.msra.mxu1 %v3126_v63  ;;  %v2378_v63 = vld [vmem:[%s3769_s1 + $0x10] sm:$0xff] }
  0x98   :  { %2006 = vmatpush1.bf16.msra.mxu0 %v3123_v62  ;;  %2060 = vmatprep.subr.bf16.mxu1 %v3134_v1  ;;  %v3213_v62 = vld [vmem:[#allocation2 + $0x4b8] ss:$24 sps:$4 sm:$0xff]   ;;  %v3221_v1 = vld [vmem:[#allocation2 + $0x4ec] ss:$24 sps:$4 sm:$0xff]  }
  0x99   :  { %2007 = vmatprep.subr.bf16.mxu0 %v3131_v0  ;;  %v3216_v0 = vld [vmem:[#allocation2 + $0x1c0] ss:$24 sps:$4 sm:$0xff]   ;;  %2392 = vperm.xlu1 %2948, %v2378_v63   ;;  %v3308_v63 = vld [vmem:[#allocation2 + $0x494] ss:$24 sps:$4 sm:$0xff]  }
  0x9b   :  { %2061 = vmatpush1.bf16.msra.mxu1 %v3132_v3  ;;  %v3219_v3 = vld [vmem:[#allocation2 + $0x4e8] ss:$24 sps:$4 sm:$0xff]  }
  0x9c   :  { %2008 = vmatpush1.bf16.msra.mxu0 %v3129_v2  ;;  %2062 = vmatprep.subr.bf16.mxu1 %v3146_v6  ;;  %v3224_v2 = vld [vmem:[#allocation2 + $0x1f4] ss:$24 sps:$4 sm:$0xff]   ;;  %v2379_v6 = vld [vmem:[%s3769_s1 + $0x18] sm:$0xff] }
  0x9d   :  { %2009 = vmatprep.subr.bf16.mxu0 %v3143_v5  ;;  %v3222_v5 = vld [vmem:[#allocation2 + $0x1f0] ss:$24 sps:$4 sm:$0xff]   ;;  %2397 = vperm.xlu1 %2948, %v2379_v6   ;;  %v3312_v6 = vld [vmem:[#allocation2 + $0x4c0] ss:$24 sps:$4 sm:$0xff]  }
  0x9f   :  { %2063 = vmatpush1.bf16.msra.mxu1 %v3144_v9  ;;  %v3230_v9 = vld [vmem:[#allocation2 + $0x224] ss:$24 sps:$4 sm:$0xff]  }
  0xa0   :  { %2010 = vmatpush1.bf16.msra.mxu0 %v3141_v8  ;;  %2064 = vmatprep.subr.bf16.mxu1 %v3152_v11  ;;  %v3227_v8 = vld [vmem:[#allocation2 + $0x51c] ss:$24 sps:$4 sm:$0xff]   ;;  %v3228_v11 = vld [vmem:[#allocation2 + $0x220] ss:$24 sps:$4 sm:$0xff]  }
  0xa1   :  { %2011 = vmatprep.subr.bf16.mxu0 %v3149_v10  ;;  %v3225_v10 = vld [vmem:[#allocation2 + $0x518] ss:$24 sps:$4 sm:$0xff]  }
  0xa3   :  { %2065 = vmatpush1.bf16.msra.mxu1 %v3150_v13  ;;  %v3236_v13 = vld [vmem:[#allocation2 + $0x254] ss:$24 sps:$4 sm:$0xff]  }
  0xa4   :  { %2012 = vmatpush1.bf16.msra.mxu0 %v3147_v12  ;;  %2087 = vmatprep.subr.bf16.mxu1 %v3158_v14  ;;  %v3233_v12 = vld [vmem:[#allocation2 + $0x54c] ss:$24 sps:$4 sm:$0xff]   ;;  %v3231_v14 = vld [vmem:[#allocation2 + $0x548] ss:$24 sps:$4 sm:$0xff]  }
  0xa5   :  { %2193 = vmatprep.subr.bf16.mxu0 %v3161_v15  ;;  %v3234_v15 = vld [vmem:[#allocation2 + $0x250] ss:$24 sps:$4 sm:$0xff]  }
  0xa6   :  { %2067 = vmatmul.mubr.bf16.vlgmr.msra.gmra.mrb[8].mxu1 %v3569_v4 }
  0xa7   :  { %2014 = vmatmul.mubr.bf16.vlgmr.msra.gmra.mrb[0].mxu0 %v3612_v16  ;;  %2088 = vmatpush1.bf16.msra.mxu1 %v3156_v17  ;;  %v3239_v17 = vld [vmem:[#allocation2 + $0x57c] ss:$24 sps:$4 sm:$0xff]  }
  0xa8   :  { %2194 = vmatpush1.bf16.msra.mxu0 %v3159_v18  ;;  %2089 = vmatprep.subr.bf16.mxu1 %v3164_v19  ;;  %v3242_v18 = vld [vmem:[#allocation2 + $0x284] ss:$24 sps:$4 sm:$0xff]   ;;  %v3237_v19 = vld [vmem:[#allocation2 + $0x578] ss:$24 sps:$4 sm:$0xff]  }
  0xa9   :  { %2195 = vmatprep.subr.bf16.mxu0 %v3167_v20  ;;  %2023 = vmatprep.mubr.bf16.mxu0 %v3617_v21  ;;  %v3240_v20 = vld [vmem:[#allocation2 + $0x280] ss:$24 sps:$4 sm:$0xff]  }
  0xaa   :  { %2076 = vmatprep.mubr.bf16.mxu1 %v3581_v30 }
  0xab   :  { %2090 = vmatpush1.bf16.msra.mxu1 %v3162_v22  ;;  %v3245_v22 = vld [vmem:[#allocation2 + $0x5ac] ss:$24 sps:$4 sm:$0xff]  }
  0xac   :  { %2196 = vmatpush1.bf16.msra.mxu0 %v3165_v23  ;;  %2091 = vmatprep.subr.bf16.mxu1 %v3173_v24  ;;  %v3248_v23 = vld [vmem:[#allocation2 + $0x2b4] ss:$24 sps:$4 sm:$0xff]   ;;  %v3243_v24 = vld [vmem:[#allocation2 + $0x5a8] ss:$24 sps:$4 sm:$0xff]  }
  0xad   :  { %2197 = vmatprep.subr.bf16.mxu0 %v3176_v25  ;;  %v3246_v25 = vld [vmem:[#allocation2 + $0x2b0] ss:$24 sps:$4 sm:$0xff]  }
  0xae   :  { %2077 = vmatmul.mubr.bf16.gmra.mrb[12].mxu1 %v3586_v31 }
  0xaf   :  { %2024 = vmatmul.mubr.bf16.gmra.mrb[4].mxu0 %v3625_v26  ;;  %2092 = vmatpush1.bf16.msra.mxu1 %v3171_v27  ;;  %v3251_v27 = vld [vmem:[#allocation2 + $0x5dc] ss:$24 sps:$4 sm:$0xff]  }
  0xb0   :  { %2198 = vmatpush1.bf16.msra.mxu0 %v3174_v28  ;;  %2093 = vmatprep.subr.bf16.mxu1 %v3179_v29  ;;  %v3254_v28 = vld [vmem:[#allocation2 + $0x2e4] ss:$24 sps:$4 sm:$0xff]   ;;  %v3249_v29 = vld [vmem:[#allocation2 + $0x5d8] ss:$24 sps:$4 sm:$0xff]  }
  0xb1   :  { %2199 = vmatprep.subr.bf16.mxu0 %v3182_v34  ;;  %2119 = vmatprep.mubr.bf16.mxu1 %v3562_v50  ;;  %v3198_v50 = vld [vmem:[#allocation2 + $0x130] ss:$24 sps:$4 sm:$0xff]   ;;  %v3252_v34 = vld [vmem:[#allocation2 + $0x2e0] ss:$24 sps:$4 sm:$0xff]  }
  0xb2   :  { %2225 = vmatprep.mubr.bf16.mxu0 %v3557_v49  ;;  %v3203_v49 = vld [vmem:[#allocation2 + $0x45c] ss:$24 sps:$4 sm:$0xff]  }
  0xb3   :  { %2094 = vmatpush1.bf16.msra.mxu1 %v3177_v35  ;;  %v3257_v35 = vld [vmem:[#allocation2 + $0x60c] ss:$24 sps:$4 sm:$0xff]  }
  0xb4   :  { %2200 = vmatpush1.bf16.msra.mxu0 %v3180_v36  ;;  %2095 = vmatprep.subr.bf16.mxu1 %v3185_v37  ;;  %v3260_v36 = vld [vmem:[#allocation2 + $0x314] ss:$24 sps:$4 sm:$0xff]   ;;  %v3255_v37 = vld [vmem:[#allocation2 + $0x608] ss:$24 sps:$4 sm:$0xff]  }
  0xb5   :  { %2201 = vmatprep.subr.bf16.mxu0 %v3188_v38  ;;  %v3258_v38 = vld [vmem:[#allocation2 + $0x310] ss:$24 sps:$4 sm:$0xff]  }
  0xb7   :  { %2096 = vmatpush1.bf16.msra.mxu1 %v3183_v39  ;;  %v3263_v39 = vld [vmem:[#allocation2 + $0x63c] ss:$24 sps:$4 sm:$0xff]  }
  0xb8   :  { %2202 = vmatpush1.bf16.msra.mxu0 %v3186_v41  ;;  %2097 = vmatprep.subr.bf16.mxu1 %v3191_v42  ;;  %v3266_v41 = vld [vmem:[#allocation2 + $0x344] ss:$24 sps:$4 sm:$0xff]   ;;  %v3261_v42 = vld [vmem:[#allocation2 + $0x638] ss:$24 sps:$4 sm:$0xff]  }
  0xb9   :  { %2203 = vmatprep.subr.bf16.mxu0 %v3194_v43  ;;  %v3264_v43 = vld [vmem:[#allocation2 + $0x340] ss:$24 sps:$4 sm:$0xff]  }
  0xbb   :  { %2098 = vmatpush1.bf16.msra.mxu1 %v3189_v44  ;;  %v3269_v44 = vld [vmem:[#allocation2 + $0x66c] ss:$24 sps:$4 sm:$0xff]  }
  0xbc   :  { %2204 = vmatpush1.bf16.msra.mxu0 %v3192_v45  ;;  %2099 = vmatprep.subr.bf16.mxu1 %v3197_v46  ;;  %v3272_v45 = vld [vmem:[#allocation2 + $0x374] ss:$24 sps:$4 sm:$0xff]   ;;  %v3267_v46 = vld [vmem:[#allocation2 + $0x668] ss:$24 sps:$4 sm:$0xff]  }
  0xbd   :  { %2205 = vmatprep.subr.bf16.mxu0 %v3200_v47  ;;  %v3270_v47 = vld [vmem:[#allocation2 + $0x370] ss:$24 sps:$4 sm:$0xff]  }
  0xbf   :  { %2100 = vmatpush1.bf16.msra.mxu1 %v3195_v48  ;;  %v3273_v48 = vld [vmem:[#allocation2 + $0x698] ss:$24 sps:$4 sm:$0xff]  }
  0xc0   :  { %2206 = vmatpush1.bf16.msra.mxu0 %v3198_v50  ;;  %2101 = vmatprep.subr.bf16.mxu1 %v3203_v49  ;;  %v3276_v50 = vld [vmem:[#allocation2 + $0x3a0] ss:$24 sps:$4 sm:$0xff]   ;;  %v3447_v49 = vld [vmem:[%s3768_s0 + $0xc] ss:$24 sps:$4 sm:$0xff]  }
  0xc1   :  { %2207 = vmatprep.subr.bf16.mxu0 %v3206_v51  ;;  %v3282_v51 = vld [vmem:[#allocation2 + $0x3d0] ss:$24 sps:$4 sm:$0xff]  }
  0xc3   :  { %2102 = vmatpush1.bf16.msra.mxu1 %v3201_v52  ;;  %v3290_v52 = vld [vmem:[#allocation2 + $0x404] ss:$24 sps:$4 sm:$0xff]  }
  0xc4   :  { %2208 = vmatpush1.bf16.msra.mxu0 %v3204_v53  ;;  %2103 = vmatprep.subr.bf16.mxu1 %v3209_v54  ;;  %v3285_v53 = vld [vmem:[#allocation2 + $0x6f8] ss:$24 sps:$4 sm:$0xff]  }
  0xc5   :  { %2209 = vmatprep.subr.bf16.mxu0 %v3212_v55  ;;  %v3288_v54 = vld [vmem:[#allocation2 + $0x400] ss:$24 sps:$4 sm:$0xff]   ;;  %v3296_v55 = vld [vmem:[#allocation2 + $0x434] ss:$24 sps:$4 sm:$0xff]  }
  0xc7   :  { %2104 = vmatpush1.bf16.msra.mxu1 %v3207_v57  ;;  %v3294_v57 = vld [vmem:[#allocation2 + $0x430] ss:$24 sps:$4 sm:$0xff]  }
  0xc8   :  { %2210 = vmatpush1.bf16.msra.mxu0 %v3210_v58  ;;  %2105 = vmatprep.subr.bf16.mxu1 %v3215_v60  ;;  %v3299_v58 = vld [vmem:[#allocation2 + $0x75c] ss:$24 sps:$4 sm:$0xff]   ;;  %v3297_v60 = vld [vmem:[#allocation2 + $0x758] ss:$24 sps:$4 sm:$0xff]  }
  0xc9   :  { %2211 = vmatprep.subr.bf16.mxu0 %v3218_v61  ;;  %v3300_v61 = vld [vmem:[#allocation2 + $0x460] ss:$24 sps:$4 sm:$0xff]  }
  0xcb   :  { %2106 = vmatpush1.bf16.msra.mxu1 %v3213_v62  ;;  %v3305_v62 = vld [vmem:[#allocation2 + $0x78c] ss:$24 sps:$4 sm:$0xff]  }
  0xcc   :  { %2212 = vmatpush1.bf16.msra.mxu0 %v3216_v0  ;;  %2107 = vmatprep.subr.bf16.mxu1 %v3221_v1  ;;  %v3303_v0 = vld [vmem:[#allocation2 + $0x788] ss:$24 sps:$4 sm:$0xff]  }
  0xcd   :  { %2213 = vmatprep.subr.bf16.mxu0 %v3224_v2  ;;  %v3306_v1 = vld [vmem:[#allocation2 + $0x490] ss:$24 sps:$4 sm:$0xff]   ;;  %v3311_v2 = vld [vmem:[#allocation2 + $0x7bc] ss:$24 sps:$4 sm:$0xff]  }
  0xcf   :  { %2108 = vmatpush1.bf16.msra.mxu1 %v3219_v3  ;;  %v3314_v3 = vld [vmem:[#allocation2 + $0x4c4] ss:$24 sps:$4 sm:$0xff]  }
  0xd0   :  { %2214 = vmatpush1.bf16.msra.mxu0 %v3222_v5  ;;  %2109 = vmatprep.subr.bf16.mxu1 %v3227_v8  ;;  %v3309_v5 = vld [vmem:[#allocation2 + $0x7b8] ss:$24 sps:$4 sm:$0xff]   ;;  %v3317_v8 = vld [vmem:[#allocation2 + $0x7ec] ss:$24 sps:$4 sm:$0xff]  }
  0xd1   :  { %2215 = vmatprep.subr.bf16.mxu0 %v3230_v9  ;;  %v3320_v9 = vld [vmem:[#allocation2 + $0x4f4] ss:$24 sps:$4 sm:$0xff]  }
  0xd3   :  { %2110 = vmatpush1.bf16.msra.mxu1 %v3225_v10  ;;  %v3315_v10 = vld [vmem:[#allocation2 + $0x7e8] ss:$24 sps:$4 sm:$0xff]  }
  0xd4   :  { %2216 = vmatpush1.bf16.msra.mxu0 %v3228_v11  ;;  %2111 = vmatprep.subr.bf16.mxu1 %v3233_v12  ;;  %v3318_v11 = vld [vmem:[#allocation2 + $0x4f0] ss:$24 sps:$4 sm:$0xff]   ;;  %v3323_v12 = vld [vmem:[#allocation2 + $0x81c] ss:$24 sps:$4 sm:$0xff]  }
  0xd5   :  { %2217 = vmatprep.subr.bf16.mxu0 %v3236_v13  ;;  %v3326_v13 = vld [vmem:[#allocation2 + $0x524] ss:$24 sps:$4 sm:$0xff]  }
  0xd7   :  { %2112 = vmatpush1.bf16.msra.mxu1 %v3231_v14  ;;  %v3321_v14 = vld [vmem:[#allocation2 + $0x818] ss:$24 sps:$4 sm:$0xff]  }
  0xd8   :  { %2218 = vmatpush1.bf16.msra.mxu0 %v3234_v15  ;;  %2113 = vmatprep.subr.bf16.mxu1 %v3239_v17  ;;  %v3324_v15 = vld [vmem:[#allocation2 + $0x520] ss:$24 sps:$4 sm:$0xff]   ;;  %v3329_v17 = vld [vmem:[#allocation2 + $0x84c] ss:$24 sps:$4 sm:$0xff]  }
  0xd9   :  { %2219 = vmatprep.subr.bf16.mxu0 %v3242_v18  ;;  %v3332_v18 = vld [vmem:[#allocation2 + $0x554] ss:$24 sps:$4 sm:$0xff]  }
  0xdb   :  { %2114 = vmatpush1.bf16.msra.mxu1 %v3237_v19  ;;  %v3327_v19 = vld [vmem:[#allocation2 + $0x848] ss:$24 sps:$4 sm:$0xff]  }
  0xdc   :  { %2220 = vmatpush1.bf16.msra.mxu0 %v3240_v20  ;;  %2115 = vmatprep.subr.bf16.mxu1 %v3245_v22  ;;  %v3330_v20 = vld [vmem:[#allocation2 + $0x550] ss:$24 sps:$4 sm:$0xff]   ;;  %v3335_v22 = vld [vmem:[#allocation2 + $0x87c] ss:$24 sps:$4 sm:$0xff]  }
  0xdd   :  { %2221 = vmatprep.subr.bf16.mxu0 %v3248_v23  ;;  %v3338_v23 = vld [vmem:[#allocation2 + $0x584] ss:$24 sps:$4 sm:$0xff]  }
  0xdf   :  { %2116 = vmatpush1.bf16.msra.mxu1 %v3243_v24  ;;  %v3333_v24 = vld [vmem:[#allocation2 + $0x878] ss:$24 sps:$4 sm:$0xff]  }
  0xe0   :  { %2222 = vmatpush1.bf16.msra.mxu0 %v3246_v25  ;;  %2117 = vmatprep.subr.bf16.mxu1 %v3251_v27  ;;  %v3336_v25 = vld [vmem:[#allocation2 + $0x580] ss:$24 sps:$4 sm:$0xff]   ;;  %v3341_v27 = vld [vmem:[#allocation2 + $0x8ac] ss:$24 sps:$4 sm:$0xff]  }
  0xe1   :  { %2223 = vmatprep.subr.bf16.mxu0 %v3254_v28  ;;  %v3344_v28 = vld [vmem:[#allocation2 + $0x5b4] ss:$24 sps:$4 sm:$0xff]  }
  0xe3   :  { %2118 = vmatpush1.bf16.msra.mxu1 %v3249_v29  ;;  %v3339_v29 = vld [vmem:[#allocation2 + $0x8a8] ss:$24 sps:$4 sm:$0xff]  }
  0xe4   :  { %2224 = vmatpush1.bf16.msra.mxu0 %v3252_v34  ;;  %2140 = vmatprep.subr.bf16.mxu1 %v3257_v35  ;;  %v3342_v34 = vld [vmem:[#allocation2 + $0x5b0] ss:$24 sps:$4 sm:$0xff]   ;;  %v3347_v35 = vld [vmem:[#allocation2 + $0x8dc] ss:$24 sps:$4 sm:$0xff]  }
  0xe5   :  { %2246 = vmatprep.subr.bf16.mxu0 %v3260_v36  ;;  %v3350_v36 = vld [vmem:[#allocation2 + $0x5e4] ss:$24 sps:$4 sm:$0xff]  }
  0xe6   :  { %2120 = vmatmul.mubr.bf16.vlgmr.msra.gmra.mrb[8].mxu1 %v3574_v7  ;;  %v3275_v7 = vld [vmem:[#allocation2 + $0x69c] ss:$24 sps:$4 sm:$0xff]  }
  0xe7   :  { %2226 = vmatmul.mubr.bf16.vlgmr.msra.gmra.mrb[8].mxu0 %v3569_v4  ;;  %2141 = vmatpush1.bf16.msra.mxu1 %v3255_v37  ;;  %v3278_v4 = vld [vmem:[#allocation2 + $0x3a4] ss:$24 sps:$4 sm:$0xff]   ;;  %v3345_v37 = vld [vmem:[#allocation2 + $0x8d8] ss:$24 sps:$4 sm:$0xff]  }
  0xe8   :  { %2247 = vmatpush1.bf16.msra.mxu0 %v3258_v38  ;;  %2142 = vmatprep.subr.bf16.mxu1 %v3263_v39  ;;  %v3348_v38 = vld [vmem:[#allocation2 + $0x5e0] ss:$24 sps:$4 sm:$0xff]   ;;  %v3353_v39 = vld [vmem:[#allocation2 + $0x614] ss:$24 sps:$4 sm:$0xff]  }
  0xe9   :  { %2248 = vmatprep.subr.bf16.mxu0 %v3266_v41  ;;  %2129 = vmatprep.mubr.bf16.mxu1 %v3591_v32  ;;  %v3281_v32 = vld [vmem:[#allocation2 + $0x6cc] ss:$24 sps:$4 sm:$0xff]   ;;  %v3351_v41 = vld [vmem:[#allocation2 + $0x610] ss:$24 sps:$4 sm:$0xff]  }
  0xea   :  { %2235 = vmatprep.mubr.bf16.mxu0 %v3581_v30  ;;  %v3284_v30 = vld [vmem:[#allocation2 + $0x3d4] ss:$24 sps:$4 sm:$0xff]  }
  0xeb   :  { %2143 = vmatpush1.bf16.msra.mxu1 %v3261_v42  ;;  %v3356_v42 = vld [vmem:[#allocation2 + $0x644] ss:$24 sps:$4 sm:$0xff]  }
  0xec   :  { %2249 = vmatpush1.bf16.msra.mxu0 %v3264_v43  ;;  %2144 = vmatprep.subr.bf16.mxu1 %v3269_v44  ;;  %v3448_v43 = vld [vmem:[%s3768_s0 + $0x8] ss:$24 sps:$4 sm:$0xff]  }
  0xed   :  { %2250 = vmatprep.subr.bf16.mxu0 %v3272_v45  ;;  %v3354_v44 = vld [vmem:[#allocation2 + $0x640] ss:$24 sps:$4 sm:$0xff]   ;;  %v3359_v45 = vld [vmem:[#allocation2 + $0x674] ss:$24 sps:$4 sm:$0xff]  }
  0xee   :  { %2130 = vmatmul.mubr.bf16.gmra.mrb[12].mxu1 %v3596_v33  ;;  %v3279_v33 = vld [vmem:[#allocation2 + $0x6c8] ss:$24 sps:$4 sm:$0xff]  }
  0xef   :  { %2236 = vmatmul.mubr.bf16.gmra.mrb[12].mxu0 %v3586_v31  ;;  %2145 = vmatpush1.bf16.msra.mxu1 %v3267_v46  ;;  %v3287_v31 = vld [vmem:[#allocation2 + $0x6fc] ss:$24 sps:$4 sm:$0xff]  }
  0xf0   :  { %2251 = vmatpush1.bf16.msra.mxu0 %v3270_v47  ;;  %2146 = vmatprep.subr.bf16.mxu1 %v3275_v7  ;;  %v3449_v46 = vld [vmem:[%s3768_s0 + $0x3c] ss:$24 sps:$4 sm:$0xff]   ;;  %v3357_v47 = vld [vmem:[#allocation2 + $0x670] ss:$24 sps:$4 sm:$0xff]  }
  0xf1   :  { %2252 = vmatprep.subr.bf16.mxu0 %v3278_v4  ;;  %2172 = vmatprep.mubr.bf16.mxu1 %v3606_v40  ;;  %v3293_v40 = vld [vmem:[#allocation2 + $0x72c] ss:$24 sps:$4 sm:$0xff]   ;;  %v3450_v4 = vld [vmem:[%s3768_s0 + $0x38] ss:$24 sps:$4 sm:$0xff]  }
  0xf2   :  { %2278 = vmatprep.mubr.bf16.mxu0 %v3447_v49  ;;  %v3362_v7 = vld [vmem:[#allocation2 + $0x6a4] ss:$24 sps:$4 sm:$0xff]  }
  0xf3   :  { %2147 = vmatpush1.bf16.msra.mxu1 %v3273_v48  ;;  %v3360_v48 = vld [vmem:[#allocation2 + $0x6a0] ss:$24 sps:$4 sm:$0xff]   ;;  %v3368_v49 = vld [vmem:[#allocation2 + $0x704] ss:$24 sps:$4 sm:$0xff]  }
  0xf4   :  { %2253 = vmatpush1.bf16.msra.mxu0 %v3276_v50  ;;  %2148 = vmatprep.subr.bf16.mxu1 %v3281_v32  ;;  %v3365_v50 = vld [vmem:[#allocation2 + $0x6d4] ss:$24 sps:$4 sm:$0xff]  }
  0xf5   :  { %2254 = vmatprep.subr.bf16.mxu0 %v3284_v30  ;;  %v3451_v32 = vld [vmem:[%s3768_s0 + $0x14] ss:$24 sps:$4 sm:$0xff]   ;;  %v3363_v30 = vld [vmem:[#allocation2 + $0x6d0] ss:$24 sps:$4 sm:$0xff]  }
  0xf7   :  { %2149 = vmatpush1.bf16.msra.mxu1 %v3279_v33  ;;  %v3366_v33 = vld [vmem:[#allocation2 + $0x700] ss:$24 sps:$4 sm:$0xff]  }
  0xf8   :  { %2255 = vmatpush1.bf16.msra.mxu0 %v3282_v51  ;;  %2150 = vmatprep.subr.bf16.mxu1 %v3287_v31  ;;  %v3371_v51 = vld [vmem:[#allocation2 + $0x734] ss:$24 sps:$4 sm:$0xff]  }
  0xf9   :  { %2256 = vmatprep.subr.bf16.mxu0 %v3290_v52 }
  0xfb   :  { %2151 = vmatpush1.bf16.msra.mxu1 %v3285_v53 }
  0xfc   :  { %2257 = vmatpush1.bf16.msra.mxu0 %v3288_v54  ;;  %2152 = vmatprep.subr.bf16.mxu1 %v3293_v40  ;;  %v3374_v40 = vld [vmem:[#allocation2 + $0x764] ss:$24 sps:$4 sm:$0xff]  }
  0xfd   :  { %2258 = vmatprep.subr.bf16.mxu0 %v3296_v55  ;;  %v3372_v55 = vld [vmem:[#allocation2 + $0x760] ss:$24 sps:$4 sm:$0xff]  }
  0xff   :  { %2153 = vmatpush1.bf16.msra.mxu1 %v3291_v56  ;;  %v3377_v56 = vld [vmem:[#allocation2 + $0x794] ss:$24 sps:$4 sm:$0xff]  }
 0x100   :  { %2259 = vmatpush1.bf16.msra.mxu0 %v3294_v57  ;;  %2154 = vmatprep.subr.bf16.mxu1 %v3299_v58  ;;  %v3375_v57 = vld [vmem:[#allocation2 + $0x790] ss:$24 sps:$4 sm:$0xff]   ;;  %v3380_v58 = vld [vmem:[#allocation2 + $0x7c4] ss:$24 sps:$4 sm:$0xff]  }
 0x101   :  { %2260 = vmatprep.subr.bf16.mxu0 %v3302_v59  ;;  %v3378_v59 = vld [vmem:[#allocation2 + $0x7c0] ss:$24 sps:$4 sm:$0xff]  }
 0x103   :  { %2155 = vmatpush1.bf16.msra.mxu1 %v3297_v60  ;;  %v3383_v60 = vld [vmem:[#allocation2 + $0x7f4] ss:$24 sps:$4 sm:$0xff]  }
 0x104   :  { %2261 = vmatpush1.bf16.msra.mxu0 %v3300_v61  ;;  %2156 = vmatprep.subr.bf16.mxu1 %v3305_v62  ;;  %v3381_v61 = vld [vmem:[#allocation2 + $0x7f0] ss:$24 sps:$4 sm:$0xff]   ;;  %v3386_v62 = vld [vmem:[#allocation2 + $0x824] ss:$24 sps:$4 sm:$0xff]  }
 0x105   :  { %2262 = vmatprep.subr.bf16.mxu0 %v3308_v63 }
 0x107   :  { %2157 = vmatpush1.bf16.msra.mxu1 %v3303_v0 }
 0x108   :  { %2263 = vmatpush1.bf16.msra.mxu0 %v3306_v1  ;;  %2158 = vmatprep.subr.bf16.mxu1 %v3311_v2  ;;  %v3384_v1 = vld [vmem:[#allocation2 + $0x820] ss:$24 sps:$4 sm:$0xff]  }
 0x109   :  { %2264 = vmatprep.subr.bf16.mxu0 %v3314_v3  ;;  %v3389_v3 = vld [vmem:[#allocation2 + $0x854] ss:$24 sps:$4 sm:$0xff]  }
 0x10b   :  { %2159 = vmatpush1.bf16.msra.mxu1 %v3309_v5 }
 0x10c   :  { %2265 = vmatpush1.bf16.msra.mxu0 %v3312_v6  ;;  %2160 = vmatprep.subr.bf16.mxu1 %v3317_v8  ;;  %v3387_v6 = vld [vmem:[#allocation2 + $0x850] ss:$24 sps:$4 sm:$0xff]   ;;  %v3392_v8 = vld [vmem:[#allocation2 + $0x884] ss:$24 sps:$4 sm:$0xff]  }
 0x10d   :  { %2266 = vmatprep.subr.bf16.mxu0 %v3320_v9  ;;  %v3390_v9 = vld [vmem:[#allocation2 + $0x880] ss:$24 sps:$4 sm:$0xff]  }
 0x10f   :  { %2161 = vmatpush1.bf16.msra.mxu1 %v3315_v10  ;;  %v3395_v10 = vld [vmem:[#allocation2 + $0x8b4] ss:$24 sps:$4 sm:$0xff]  }
 0x110   :  { %2267 = vmatpush1.bf16.msra.mxu0 %v3318_v11  ;;  %2162 = vmatprep.subr.bf16.mxu1 %v3323_v12  ;;  %v3393_v11 = vld [vmem:[#allocation2 + $0x8b0] ss:$24 sps:$4 sm:$0xff]   ;;  %v3398_v12 = vld [vmem:[#allocation2 + $0x8e4] ss:$24 sps:$4 sm:$0xff]  }
 0x111   :  { %2268 = vmatprep.subr.bf16.mxu0 %v3326_v13  ;;  %v3396_v13 = vld [vmem:[#allocation2 + $0x8e0] ss:$24 sps:$4 sm:$0xff]  }
 0x113   :  { %2163 = vmatpush1.bf16.msra.mxu1 %v3321_v14  ;;  %v345_v14 = vlaneseq }
 0x114   :  { %2269 = vmatpush1.bf16.msra.mxu0 %v3324_v15  ;;  %2164 = vmatprep.subr.bf16.mxu1 %v3329_v17 }
 0x115   :  { %2270 = vmatprep.subr.bf16.mxu0 %v3332_v18  ;;  %v3680_v15 = vshrl.u32 %v345_v14, 7  ;;  %v3683_v18 = vld [vmem:[#allocation4] sm:$0x3f] }
 0x117   :  { %2165 = vmatpush1.bf16.msra.mxu1 %v3327_v19  ;;  %v347_v17 = vsub.s32 0, %v3680_v15  ;;  %v351_v19 = vsub.s32 1, %v3680_v15 }
 0x118   :  { %2271 = vmatpush1.bf16.msra.mxu0 %v3330_v20  ;;  %2166 = vmatprep.subr.bf16.mxu1 %v3335_v22 }
 0x119   :  { %2272 = vmatprep.subr.bf16.mxu0 %v3338_v23  ;;  %v348_v20 = vrot.slane %v3683_v18, %v347_v17  ;;  %v352_v22 = vrot.slane %v3683_v18, %v351_v19 }
 0x11b   :  { %2167 = vmatpush1.bf16.msra.mxu1 %v3333_v24 }
 0x11c   :  { %2273 = vmatpush1.bf16.msra.mxu0 %v3336_v25  ;;  %2168 = vmatprep.subr.bf16.mxu1 %v3341_v27 }
 0x11d   :  { %2274 = vmatprep.subr.bf16.mxu0 %v3344_v28 }
 0x11f   :  { %2169 = vmatpush1.bf16.msra.mxu1 %v3339_v29 }
 0x120   :  { %2275 = vmatpush1.bf16.msra.mxu0 %v3342_v34  ;;  %2170 = vmatprep.subr.bf16.mxu1 %v3347_v35 }
 0x121   :  { %2276 = vmatprep.subr.bf16.mxu0 %v3350_v36 }
 0x123   :  { %2171 = vmatpush1.bf16.msra.mxu1 %v3345_v37 }
 0x124   :  { %2277 = vmatpush1.bf16.msra.mxu0 %v3348_v38  ;;  %2838 = vmatprep.subr.bf16.mxu1 %v3353_v39 }
 0x125   :  { %2299 = vmatprep.subr.bf16.mxu0 %v3353_v39  ;;  %v3692_v39 = vpop.permute.xlu0 %2382 }
 0x126   :  { %2173 = vmatmul.mubr.bf16.vlgmr.msra.gmra.mrb[8].mxu1 %v3612_v16 }
 0x127   :  { %2279 = vmatmul.mubr.bf16.vlgmr.msra.gmra.mrb[8].mxu0 %v3448_v43  ;;  %2854 = vmatpush1.bf16.msra.mxu1 %v3351_v41 }
 0x128   :  { %2300 = vmatpush1.bf16.msra.mxu0 %v3351_v41  ;;  %2839 = vmatprep.subr.bf16.mxu1 %v3356_v42 }
 0x129   :  { %2301 = vmatprep.subr.bf16.mxu0 %v3356_v42  ;;  %2182 = vmatprep.mubr.bf16.mxu1 %v3617_v21 }
 0x12a   :  { %2288 = vmatprep.mubr.bf16.mxu0 %v3449_v46 }
 0x12b   :  { %2855 = vmatpush1.bf16.msra.mxu1 %v3354_v44 }
 0x12c   :  { %2302 = vmatpush1.bf16.msra.mxu0 %v3354_v44  ;;  %2840 = vmatprep.subr.bf16.mxu1 %v3359_v45 }
 0x12d   :  { %2303 = vmatprep.subr.bf16.mxu0 %v3359_v45 }
 0x12e   :  { %2183 = vmatmul.mubr.bf16.gmra.mrb[12].mxu1 %v3625_v26 }
 0x12f   :  { %2289 = vmatmul.mubr.bf16.gmra.mrb[12].mxu0 %v3450_v4  ;;  %2856 = vmatpush1.bf16.msra.mxu1 %v3357_v47 }
 0x130   :  { %2304 = vmatpush1.bf16.msra.mxu0 %v3357_v47  ;;  %2841 = vmatprep.subr.bf16.mxu1 %v3362_v7 }
 0x131   :  { %2305 = vmatprep.subr.bf16.mxu0 %v3362_v7  ;;  %2331 = vmatprep.mubr.bf16.mxu0 %v3451_v32 }
 0x132   :  { %2341 = vmatprep.mubr.bf16.mxu1 %v3617_v21  ;;  %v3369_v21 = vld [vmem:[#allocation2 + $0x730] ss:$24 sps:$4 sm:$0xff]  }
 0x133   :  { %2857 = vmatpush1.bf16.msra.mxu1 %v3360_v48 }
 0x134   :  { %2306 = vmatpush1.bf16.msra.mxu0 %v3360_v48  ;;  %2842 = vmatprep.subr.bf16.mxu1 %v3365_v50 }
 0x135   :  { %2307 = vmatprep.subr.bf16.mxu0 %v3365_v50 }
 0x137   :  { %2858 = vmatpush1.bf16.msra.mxu1 %v3363_v30 }
 0x138   :  { %2308 = vmatpush1.bf16.msra.mxu0 %v3363_v30  ;;  %2843 = vmatprep.subr.bf16.mxu1 %v3368_v49  ;;  %v3694_v30 = vpop.permute.xlu0 %2387 }
 0x139   :  { %2309 = vmatprep.subr.bf16.mxu0 %v3368_v49  ;;  %v3670_v31 = vpop.f32.mrb[0].mxu1 }
 0x13a   :  { %v3672_v52 = vpop.f32.mrb[1].mxu1  ;;  %v1910_v23 = vadd.f32 %v3670_v31, %v348_v20 }
 0x13b   :  { %v3674_v53 = vpop.f32.mrb[2].mxu1  ;;  %2859 = vmatpush1.bf16.msra.mxu1 %v3366_v33  ;;  %v1912_v24 = vadd.f32 %v3672_v52, %v352_v22  ;;  %v3698_v52 = vpop.permute.xlu1 %2392 }
 0x13c   :  { %2310 = vmatpush1.bf16.msra.mxu0 %v3366_v33  ;;  %v3676_v54 = vpop.f32.mrb[3].mxu1  ;;  %2844 = vmatprep.subr.bf16.mxu1 %v3371_v51 }
 0x13d   :  { %2311 = vmatprep.subr.bf16.mxu0 %v3371_v51  ;;  %v1916_v28 = vadd.f32 %v3676_v54, %v352_v22 }
 0x13f   :  { %2860 = vmatpush1.bf16.msra.mxu1 %v3369_v21 }
 0x140   :  { %2312 = vmatpush1.bf16.msra.mxu0 %v3369_v21  ;;  %2845 = vmatprep.subr.bf16.mxu1 %v3374_v40 }
 0x141   :  { %2313 = vmatprep.subr.bf16.mxu0 %v3374_v40  ;;  %v1919_v63 = vpop.f32.mrb[4].mxu1 }
 0x142   :  { %v1921_v0 = vpop.f32.mrb[5].mxu1  ;;  %v1920_v38 = vadd.f32 %v1919_v63, %v348_v20 }
 0x143   :  { %2861 = vmatpush1.bf16.msra.mxu1 %v3372_v55  ;;  %v1923_v2 = vpop.f32.mrb[6].mxu1  ;;  %v1922_v41 = vadd.f32 %v1921_v0, %v352_v22 }
 0x144   :  { %2314 = vmatpush1.bf16.msra.mxu0 %v3372_v55  ;;  %2846 = vmatprep.subr.bf16.mxu1 %v3377_v56  ;;  %v1925_v5 = vpop.f32.mrb[7].mxu1  ;;  %v1924_v43 = vadd.f32 %v1923_v2, %v348_v20 }
 0x145   :  { %2315 = vmatprep.subr.bf16.mxu0 %v3377_v56  ;;  %v1926_v46 = vadd.f32 %v1925_v5, %v352_v22  ;;  %v359_v5 = vsub.s32 3, %v3680_v15 }
 0x147   :  { %2862 = vmatpush1.bf16.msra.mxu1 %v3375_v57 }
 0x148   :  { %2316 = vmatpush1.bf16.msra.mxu0 %v3375_v57  ;;  %2847 = vmatprep.subr.bf16.mxu1 %v3380_v58  ;;  %v3708_v57 = vpop.permute.xlu1 %2397 }
 0x149   :  { %2317 = vmatprep.subr.bf16.mxu0 %v3380_v58 }
 0x14b   :  { %2863 = vmatpush1.bf16.msra.mxu1 %v3378_v59 }
 0x14c   :  { %2318 = vmatpush1.bf16.msra.mxu0 %v3378_v59  ;;  %2848 = vmatprep.subr.bf16.mxu1 %v3383_v60 }
 0x14d   :  { %2319 = vmatprep.subr.bf16.mxu0 %v3383_v60 }
 0x14f   :  { %2864 = vmatpush1.bf16.msra.mxu1 %v3381_v61 }
 0x150   :  { %2320 = vmatpush1.bf16.msra.mxu0 %v3381_v61  ;;  %2849 = vmatprep.subr.bf16.mxu1 %v3386_v62 }
 0x151   :  { %2321 = vmatprep.subr.bf16.mxu0 %v3386_v62 }
 0x153   :  { %2865 = vmatpush1.bf16.msra.mxu1 %v3384_v1 }
 0x154   :  { %2322 = vmatpush1.bf16.msra.mxu0 %v3384_v1  ;;  %2850 = vmatprep.subr.bf16.mxu1 %v3389_v3 }
 0x155   :  { %2323 = vmatprep.subr.bf16.mxu0 %v3389_v3  ;;  %v355_v3 = vsub.s32 2, %v3680_v15 }
 0x157   :  { %2866 = vmatpush1.bf16.msra.mxu1 %v3387_v6 }
 0x158   :  { %2324 = vmatpush1.bf16.msra.mxu0 %v3387_v6  ;;  %2851 = vmatprep.subr.bf16.mxu1 %v3392_v8  ;;  %v356_v6 = vrot.slane %v3683_v18, %v355_v3 }
 0x159   :  { %2325 = vmatprep.subr.bf16.mxu0 %v3392_v8  ;;  %v360_v8 = vrot.slane %v3683_v18, %v359_v5 }
 0x15b   :  { %2867 = vmatpush1.bf16.msra.mxu1 %v3390_v9 }
 0x15c   :  { %2326 = vmatpush1.bf16.msra.mxu0 %v3390_v9  ;;  %2852 = vmatprep.subr.bf16.mxu1 %v3395_v10 }
 0x15d   :  { %2327 = vmatprep.subr.bf16.mxu0 %v3395_v10 }
 0x15f   :  { %2868 = vmatpush1.bf16.msra.mxu1 %v3393_v11 }
 0x160   :  { %2328 = vmatpush1.bf16.msra.mxu0 %v3393_v11  ;;  %2853 = vmatprep.subr.bf16.mxu1 %v3398_v12 }
 0x161   :  { %2329 = vmatprep.subr.bf16.mxu0 %v3398_v12 }
 0x163   :  { %2869 = vmatpush1.bf16.msra.mxu1 %v3396_v13 }
 0x164   :  { %2330 = vmatpush1.bf16.msra.mxu0 %v3396_v13 }
 0x166   :  { %2342 = vmatmul.mubr.bf16.vlgmr.msra.gmra.mrb[16].mxu1 %v3625_v26  ;;  %v1914_v26 = vadd.f32 %v3674_v53, %v348_v20 }
 0x167   :  { %2332 = vmatmul.mubr.bf16.vlgmr.msra.gmra.mrb[8].mxu0 %v3612_v16 }
 0x17a   :  { %v2015_v16 = vpop.f32.mrb[0].mxu0 }
 0x17b   :  { %v2871_v25 = vadd.f32 %v2015_v16, %v1910_v23  ;;  %v2017_v27 = vpop.f32.mrb[1].mxu0 }
 0x17c   :  { %v2873_v29 = vadd.f32 %v2017_v27, %v1912_v24  ;;  %v2019_v34 = vpop.f32.mrb[2].mxu0 }
 0x17d   :  { %3399 = vtanh.f32 %v2871_v25  ;;  %v2875_v35 = vadd.f32 %v2019_v34, %v1914_v26  ;;  %v2021_v36 = vpop.f32.mrb[3].mxu0 }
 0x17e   :  { %3401 = vtanh.f32 %v2873_v29  ;;  %v2877_v37 = vadd.f32 %v2021_v36, %v1916_v28 }
 0x17f   :  { %3403 = vtanh.f32 %v2875_v35 }
 0x180   :  { %3405 = vtanh.f32 %v2877_v37 }
 0x182   :  { %v2025_v42 = vpop.f32.mrb[4].mxu0 }
 0x183   :  { %v2879_v44 = vadd.f32 %v2025_v42, %v1920_v38  ;;  %v2027_v45 = vpop.f32.mrb[5].mxu0 }
 0x184   :  { %v2881_v47 = vadd.f32 %v2027_v45, %v1922_v41  ;;  %v2029_v7 = vpop.f32.mrb[6].mxu0 }
 0x185   :  { %3407 = vtanh.f32 %v2879_v44  ;;  %v2883_v4 = vadd.f32 %v2029_v7, %v1924_v43  ;;  %v2031_v48 = vpop.f32.mrb[7].mxu0 }
 0x186   :  { %3409 = vtanh.f32 %v2881_v47  ;;  %v2885_v50 = vadd.f32 %v2031_v48, %v1926_v46 }
 0x187   :  { %v3400_v32 = vpop.eup %3399  ;;  %3411 = vtanh.f32 %v2883_v4 }
 0x188   :  { %v3402_v49 = vpop.eup %3401  ;;  %v2400_v33 = vmul.f32 %v3400_v32, %v3692_v39  ;;  %3413 = vtanh.f32 %v2885_v50 }
 0x189   :  { %v3404_v51 = vpop.eup %3403  ;;  %v2401_v31 = vmul.f32 %v3402_v49, %v3692_v39 }
 0x18a   :  { %v3406_v53 = vpop.eup %3405  ;;  %v2406_v21 = vmul.f32 %v3404_v51, %v3694_v30 }
 0x18b   :  { %v2826_v54 = vpack.c.bf16 %v2401_v31, %v2400_v33  ;;  %v2407_v40 = vmul.f32 %v3406_v53, %v3694_v30 }
 0x18d   :  { %2496 = vst [vmem:[%s3772_s4] sm:$0xff] %v2826_v54  ;;  %v2829_v55 = vpack.c.bf16 %v2407_v40, %v2406_v21  ;;  %v363_v21 = vsub.s32 4, %v3680_v15  ;;  %v367_v54 = vsub.s32 5, %v3680_v15 }
 0x18f   :  { %v3408_v56 = vpop.eup %3407  ;;  %2499 = vst [vmem:[%s3772_s4 + $0x18] sm:$0xff] %v2829_v55  ;;  %v364_v40 = vrot.slane %v3683_v18, %v363_v21  ;;  %v368_v55 = vrot.slane %v3683_v18, %v367_v54 }
 0x190   :  { %v3410_v58 = vpop.eup %3409  ;;  %v2412_v59 = vmul.f32 %v3408_v56, %v3698_v52 }
 0x191   :  { %v3412_v60 = vpop.eup %3411  ;;  %v2413_v61 = vmul.f32 %v3410_v58, %v3698_v52 }
 0x192   :  { %v3414_v62 = vpop.eup %3413  ;;  %v2418_v63 = vmul.f32 %v3412_v60, %v3708_v57 }
 0x193   :  { %v2832_v0 = vpack.c.bf16 %v2413_v61, %v2412_v59  ;;  %v2419_v1 = vmul.f32 %v3414_v62, %v3708_v57 }
 0x195   :  { %2502 = vst [vmem:[%s3772_s4 + $0x30] sm:$0xff] %v2832_v0  ;;  %v2835_v2 = vpack.c.bf16 %v2419_v1, %v2418_v63 }
 0x197   :  { %2505 = vst [vmem:[%s3772_s4 + $0x48] sm:$0xff] %v2835_v2 }
 0x1f9   :  { %v2174_v9 = vpop.f32.mrb[8].mxu1 }
 0x1fa   :  { %v2886_v10 = vadd.f32 %v2174_v9, %v356_v6  ;;  %v2176_v11 = vpop.f32.mrb[9].mxu1 }
 0x1fb   :  { %v2887_v12 = vadd.f32 %v2176_v11, %v360_v8  ;;  %v2178_v13 = vpop.f32.mrb[10].mxu1 }
 0x1fc   :  { %3415 = vtanh.f32 %v2886_v10  ;;  %v2888_v14 = vadd.f32 %v2178_v13, %v356_v6  ;;  %v2180_v17 = vpop.f32.mrb[11].mxu1 }
 0x1fd   :  { %3417 = vtanh.f32 %v2887_v12  ;;  %v2889_v19 = vadd.f32 %v2180_v17, %v360_v8 }
 0x1fe   :  { %3419 = vtanh.f32 %v2888_v14 }
 0x1ff   :  { %3421 = vtanh.f32 %v2889_v19 }
 0x201   :  { %v2184_v20 = vpop.f32.mrb[12].mxu1 }
 0x202   :  { %v2290_v22 = vpop.f32.mrb[12].mxu0  ;;  %v2890_v23 = vadd.f32 %v2184_v20, %v356_v6  ;;  %v2186_v24 = vpop.f32.mrb[13].mxu1 }
 0x203   :  { %v2292_v16 = vpop.f32.mrb[13].mxu0  ;;  %v2891_v26 = vadd.f32 %v2186_v24, %v360_v8  ;;  %v2188_v25 = vpop.f32.mrb[14].mxu1  ;;  %v2898_v56 = vadd.f32 %v2290_v22, %v364_v40 }
 0x204   :  { %v2294_v27 = vpop.f32.mrb[14].mxu0  ;;  %3423 = vtanh.f32 %v2890_v23  ;;  %v2892_v28 = vadd.f32 %v2188_v25, %v356_v6  ;;  %v2190_v29 = vpop.f32.mrb[15].mxu1  ;;  %v2900_v58 = vadd.f32 %v2292_v16, %v368_v55 }
 0x205   :  { %v2296_v34 = vpop.f32.mrb[15].mxu0  ;;  %3425 = vtanh.f32 %v2891_v26  ;;  %v2893_v35 = vadd.f32 %v2190_v29, %v360_v8  ;;  %v2902_v61 = vadd.f32 %v2294_v27, %v364_v40 }
 0x206   :  { %v3416_v36 = vpop.eup %3415  ;;  %3427 = vtanh.f32 %v2892_v28  ;;  %v2904_v2 = vadd.f32 %v2296_v34, %v368_v55 }
 0x207   :  { %v3418_v37 = vpop.eup %3417  ;;  %v2402_v38 = vmul.f32 %v3416_v36, %v3692_v39  ;;  %3429 = vtanh.f32 %v2893_v35 }
 0x208   :  { %v3420_v41 = vpop.eup %3419  ;;  %v2403_v42 = vmul.f32 %v3418_v37, %v3692_v39 }
 0x209   :  { %v3422_v43 = vpop.eup %3421  ;;  %v2408_v44 = vmul.f32 %v3420_v41, %v3694_v30 }
 0x20a   :  { %v2827_v45 = vpack.c.bf16 %v2403_v42, %v2402_v38  ;;  %v2409_v46 = vmul.f32 %v3422_v43, %v3694_v30 }
 0x20c   :  { %2497 = vst [vmem:[%s3772_s4 + $0x8] sm:$0xff] %v2827_v45  ;;  %v2830_v47 = vpack.c.bf16 %v2409_v46, %v2408_v44 }
 0x20e   :  { %v3424_v7 = vpop.eup %3423  ;;  %2500 = vst [vmem:[%s3772_s4 + $0x20] sm:$0xff] %v2830_v47 }
 0x20f   :  { %v3426_v4 = vpop.eup %3425  ;;  %v2414_v48 = vmul.f32 %v3424_v7, %v3698_v52 }
 0x210   :  { %v3428_v50 = vpop.eup %3427  ;;  %v2415_v32 = vmul.f32 %v3426_v4, %v3698_v52 }
 0x211   :  { %v3430_v49 = vpop.eup %3429  ;;  %v2420_v33 = vmul.f32 %v3428_v50, %v3708_v57 }
 0x212   :  { %v2833_v51 = vpack.c.bf16 %v2415_v32, %v2414_v48  ;;  %v2421_v31 = vmul.f32 %v3430_v49, %v3708_v57 }
 0x214   :  { %2503 = vst [vmem:[%s3772_s4 + $0x38] sm:$0xff] %v2833_v51  ;;  %v2836_v53 = vpack.c.bf16 %v2421_v31, %v2420_v33 }
 0x216   :  { %2506 = vst [vmem:[%s3772_s4 + $0x50] sm:$0xff] %v2836_v53 }
 0x239   :  { %v2343_v60 = vpop.f32.mrb[16].mxu1 }
 0x23a   :  { %v2333_v59 = vpop.f32.mrb[8].mxu0  ;;  %v2899_v63 = vadd.f32 %v2898_v56, %v2343_v60  ;;  %v2345_v1 = vpop.f32.mrb[17].mxu1 }
 0x23b   :  { %v2894_v62 = vadd.f32 %v2333_v59, %v364_v40  ;;  %v2335_v0 = vpop.f32.mrb[9].mxu0  ;;  %v2901_v5 = vadd.f32 %v2900_v58, %v2345_v1  ;;  %v2347_v8 = vpop.f32.mrb[18].mxu1 }
 0x23c   :  { %v2895_v3 = vadd.f32 %v2335_v0, %v368_v55  ;;  %v2337_v6 = vpop.f32.mrb[10].mxu0  ;;  %v2903_v9 = vadd.f32 %v2902_v61, %v2347_v8  ;;  %v2349_v11 = vpop.f32.mrb[19].mxu1 }
 0x23d   :  { %3431 = vtanh.f32 %v2894_v62  ;;  %v2896_v15 = vadd.f32 %v2337_v6, %v364_v40  ;;  %v2339_v10 = vpop.f32.mrb[11].mxu0  ;;  %v2905_v18 = vadd.f32 %v2904_v2, %v2349_v11 }
 0x23e   :  { %3433 = vtanh.f32 %v2899_v63  ;;  %v2897_v12 = vadd.f32 %v2339_v10, %v368_v55 }
 0x23f   :  { %3435 = vtanh.f32 %v2895_v3 }
 0x240   :  { %3437 = vtanh.f32 %v2901_v5 }
 0x241   :  { %3439 = vtanh.f32 %v2896_v15 }
 0x242   :  { %3441 = vtanh.f32 %v2903_v9 }
 0x243   :  { %3443 = vtanh.f32 %v2897_v12 }
 0x244   :  { %3445 = vtanh.f32 %v2905_v18 }
 0x247   :  { %v3432_v13 = vpop.eup %3431 }
 0x248   :  { %v3434_v14 = vpop.eup %3433  ;;  %v2404_v17 = vmul.f32 %v3432_v13, %v3692_v39 }
 0x249   :  { %v3436_v19 = vpop.eup %3435  ;;  %v2416_v20 = vmul.f32 %v3434_v14, %v3698_v52 }
 0x24a   :  { %v3438_v22 = vpop.eup %3437  ;;  %v2405_v23 = vmul.f32 %v3436_v19, %v3692_v39 }
 0x24b   :  { %v3440_v24 = vpop.eup %3439  ;;  %v2417_v16 = vmul.f32 %v3438_v22, %v3698_v52 }
 0x24c   :  { %v3442_v26 = vpop.eup %3441  ;;  %v2828_v25 = vpack.c.bf16 %v2405_v23, %v2404_v17  ;;  %v2410_v27 = vmul.f32 %v3440_v24, %v3694_v30 }
 0x24d   :  { %v3444_v28 = vpop.eup %3443  ;;  %v2834_v29 = vpack.c.bf16 %v2417_v16, %v2416_v20  ;;  %v2422_v34 = vmul.f32 %v3442_v26, %v3708_v57 }
 0x24e   :  { %v3446_v35 = vpop.eup %3445  ;;  %2498 = vst [vmem:[%s3772_s4 + $0x10] sm:$0xff] %v2828_v25  ;;  %v2411_v36 = vmul.f32 %v3444_v28, %v3694_v30 }
 0x24f   :  { %2504 = vst [vmem:[%s3772_s4 + $0x40] sm:$0xff] %v2834_v29  ;;  %v2423_v39 = vmul.f32 %v3446_v35, %v3708_v57 }
 0x250   :  { %v2831_v52 = vpack.c.bf16 %v2411_v36, %v2410_v27 }
 0x251   :  { %v2837_v37 = vpack.c.bf16 %v2423_v39, %v2422_v34 }
 0x252   :  { %2501 = vst [vmem:[%s3772_s4 + $0x28] sm:$0xff] %v2831_v52 }
 0x253   :  { %2507 = vst [vmem:[%s3772_s4 + $0x58] sm:$0xff] %v2837_v37 }
 0x254   :  { %2512 = vsyncpa [#allocation3], 1 }
 0x255   :  { %2513 = vsyncpa [#allocation5], 1 }

</bundles_post_ra>
